<compile_context>
chip_gen: v7x
topology: tpu7x:2x2x1
jax: 0.10.0
libtpu: 0.0.40
codegen_flags: <defaults>
</compile_context>

<pallas_src>
import functools

import jax
import jax.numpy as jnp
from jax.experimental import pallas as pl
from jax.experimental.pallas import tpu as pltpu


# --------------------------------------------------------------------------
# Fused kernel: (conv3x3 + BN + ReLU) x 2 on one (batch, row-tile) block.
# --------------------------------------------------------------------------
def _double_conv_kernel(x_ref, xt_ref, xb_ref,
                        w1_ref, s1_ref, b1_ref,
                        w2_ref, s2_ref, b2_ref,
                        o_ref, pad1, pad2,
                        *, TH, W, Wp, KH, KW):
    # x_ref:  (1, TH,  W, Cin)   main input row tile
    # xt_ref: (1, 2,   W, Cin)   2-row halo above (clamped at the image top)
    # xb_ref: (1, 2,   W, Cin)   2-row halo below (clamped at the image bottom)
    # w*_ref: (9*C, Cout) bf16   channel-major packed im2col weights
    # s*/b*:  (1, Cout) f32      fused BN scale / shift (+ conv bias)
    # o_ref:  (1, TH, W, Cout)   dense NHWC output tile
    # pad1:   (TH+4, Wp, Cin)  bf16 scratch, padded input tile
    # pad2:   (TH+2, Wp, Cmid) bf16 scratch, padded stage-1 output (stays in VMEM)
    t = pl.program_id(1)
    last = pl.num_programs(1) - 1
    cin = x_ref.shape[-1]
    cmid = pad2.shape[-1]
    cdt = pad1.dtype  # bf16 MXU-operand dtype

    # Column halo: zero only the thin border strips (interior is fully
    # rewritten below).  Re-done every step: scratch is per-core, never assume
    # prior contents under "parallel" grid splitting.
    pad1[:, pl.ds(0, 1), :] = jnp.zeros((TH + 4, 1, cin), cdt)
    pad1[:, pl.ds(W + 1, Wp - W - 1), :] = jnp.zeros((TH + 4, Wp - W - 1, cin), cdt)
    pad2[:, pl.ds(0, 1), :] = jnp.zeros((TH + 2, 1, cmid), cdt)
    pad2[:, pl.ds(W + 1, Wp - W - 1), :] = jnp.zeros((TH + 2, Wp - W - 1, cmid), cdt)

    # Stage-1 padded input tile: input rows [r0-2, r0+TH+2), image at cols [1, W+1).
    pad1[pl.ds(2, TH), pl.ds(1, W), :] = x_ref[0].astype(cdt)
    pad1[pl.ds(0, 2), pl.ds(1, W), :] = xt_ref[0].astype(cdt)
    pad1[pl.ds(TH + 2, 2), pl.ds(1, W), :] = xb_ref[0].astype(cdt)

    @pl.when(t == 0)
    def _():  # image top boundary: the 2-row input halo is SAME-padding zeros
        pad1[pl.ds(0, 2), :, :] = jnp.zeros((2, Wp, cin), cdt)

    @pl.when(t == last)
    def _():  # image bottom boundary
        pad1[pl.ds(TH + 2, 2), :, :] = jnp.zeros((2, Wp, cin), cdt)

    def conv_stage(pad_ref, rows, w_ref, s_ref, b_ref):
        # Channel-major packed contraction (K = KH*KW*C): each tap is read
        # once (no staging patch buffer) and fed straight into one MXU dot.
        c = pad_ref.shape[-1]
        taps = []
        for kh in range(KH):
            for kw in range(KW):
                taps.append(
                    pad_ref[pl.ds(kh, rows), pl.ds(kw, W), :].reshape(rows * W, c))
        patch = jnp.concatenate(taps, axis=-1)                 # (rows*W, KH*KW*c) bf16
        y = jnp.dot(patch, w_ref[...], preferred_element_type=jnp.float32)
        # Fused BN affine (+ conv bias) and ReLU, f32 epilogue.
        return jnp.maximum(y * s_ref[...] + b_ref[...], 0.0)

    # ---- stage 1: TH+2 output rows (1-row halo each side for stage 2) -----
    y1 = conv_stage(pad1, TH + 2, w1_ref, s1_ref, b1_ref)       # ((TH+2)*W, cmid) f32
    pad2[:, pl.ds(1, W), :] = y1.astype(cdt).reshape(TH + 2, W, cmid)

    @pl.when(t == 0)
    def _():  # stage-2 SAME padding at the image top: stage-1 "row -1" is zero
        pad2[pl.ds(0, 1), :, :] = jnp.zeros((1, Wp, cmid), cdt)

    @pl.when(t == last)
    def _():  # stage-1 "row H" is zero
        pad2[pl.ds(TH + 1, 1), :, :] = jnp.zeros((1, Wp, cmid), cdt)

    # ---- stage 2: TH output rows, written once, dense NHWC ----------------
    y2 = conv_stage(pad2, TH, w2_ref, s2_ref, b2_ref)           # (TH*W, Cout) f32
    o_ref[0] = y2.astype(o_ref.dtype).reshape(TH, W, o_ref.shape[-1])


# --------------------------------------------------------------------------
# Parameter preparation: fold BN + conv bias, pack weights channel-major bf16.
# --------------------------------------------------------------------------
def _prepare_stage(w_hwio, bias, bn, eps=1e-5):
    KH, KW, Cin, Cout = w_hwio.shape
    gamma, beta, mean, var = bn
    scale = gamma / jnp.sqrt(var + eps)
    shift = beta + (bias - mean) * scale
    # packed im2col weight: row k = (kh*KW + kw)*Cin + ci
    w_mat = w_hwio.astype(jnp.bfloat16).reshape(KH * KW * Cin, Cout)
    return (w_mat,
            scale.reshape(1, Cout).astype(jnp.float32),
            shift.reshape(1, Cout).astype(jnp.float32))


# --------------------------------------------------------------------------
# Parameter init (deterministic, matches the PyTorch module's shapes)
# --------------------------------------------------------------------------
def init_double_conv_params(key, in_channels, out_channels, kernel_size=3):
    ks = jax.random.split(key, 12)

    def conv_params(kw_, kb_, cin, cout):
        fan_in = cin * kernel_size * kernel_size
        bound = 1.0 / jnp.sqrt(fan_in)
        w = jax.random.uniform(kw_, (kernel_size, kernel_size, cin, cout),
                               minval=-bound, maxval=bound, dtype=jnp.float32)  # HWIO
        b = jax.random.uniform(kb_, (cout,), minval=-bound, maxval=bound,
                               dtype=jnp.float32)
        return w, b

    def bn_params(kg, kb, km, kv, c):
        gamma = 1.0 + 0.1 * jax.random.normal(kg, (c,), dtype=jnp.float32)
        beta = 0.1 * jax.random.normal(kb, (c,), dtype=jnp.float32)
        mean = 0.1 * jax.random.normal(km, (c,), dtype=jnp.float32)
        var = jax.random.uniform(kv, (c,), minval=0.5, maxval=1.5, dtype=jnp.float32)
        return gamma, beta, mean, var

    w1, b1 = conv_params(ks[0], ks[1], in_channels, out_channels)
    w2, b2 = conv_params(ks[2], ks[3], out_channels, out_channels)
    bn1 = bn_params(ks[4], ks[5], ks[6], ks[7], out_channels)
    bn2 = bn_params(ks[8], ks[9], ks[10], ks[11], out_channels)
    return dict(w1=w1, b1=b1, w2=w2, b2=b2, bn1=bn1, bn2=bn2)


# --------------------------------------------------------------------------
# Module forward: NCHW in, NCHW out (matching PyTorch Double_Conv2d)
# --------------------------------------------------------------------------
def double_conv2d(x_nchw, params, *, row_tile=32):
    N, Cin, H, W = x_nchw.shape
    KH, KW, _, Cout = params["w1"].shape
    assert (KH, KW) == (3, 3), "kernel assumes 3x3 convs with SAME (pad=1) semantics"
    assert W % 8 == 0, "W must be a multiple of 8 (layout-free tap reshapes)"
    assert H % 2 == 0, "H must be even (2-row halo blocks)"

    # Largest even row tile <= row_tile that divides H.  On v7x (64 MiB VMEM)
    # keep row_tile modest for wide images; v5e/v6e (128 MiB) can go larger.
    TH = min(row_tile, H)
    while TH > 2 and (H % TH or TH % 2):
        TH -= 1
    assert TH >= 2 and H % TH == 0 and TH % 2 == 0, "no valid even row tile"

    Wp = W + 8          # sublane-aligned padded width (image at cols [1, W+1))
    hb = TH // 2        # halo blocks are 2 rows -> row-block units of 2

    w1m, s1, b1 = _prepare_stage(params["w1"], params["b1"], params["bn1"])
    w2m, s2, b2 = _prepare_stage(params["w2"], params["b2"], params["bn2"])
    K1, K2 = w1m.shape[0], w2m.shape[0]

    x = jnp.transpose(x_nchw, (0, 2, 3, 1))        # NCHW -> NHWC, stays f32 in HBM

    kernel = functools.partial(_double_conv_kernel,
                               TH=TH, W=W, Wp=Wp, KH=KH, KW=KW)

    out = pl.pallas_call(
        kernel,
        out_shape=jax.ShapeDtypeStruct((N, H, W, Cout), x_nchw.dtype),
        grid_spec=pltpu.PrefetchScalarGridSpec(
            num_scalar_prefetch=0,
            grid=(N, H // TH),
            in_specs=[
                # main row tile + 2-row halos above/below (clamped at the image
                # edges; the kernel zeroes them at the boundary tiles).
                pl.BlockSpec((1, TH, W, Cin), lambda n, t: (n, t, 0, 0)),
                pl.BlockSpec((1, 2, W, Cin),
                             lambda n, t: (n, jnp.maximum(t * hb - 1, 0), 0, 0)),
                pl.BlockSpec((1, 2, W, Cin),
                             lambda n, t: (n, jnp.minimum((t + 1) * hb, H // 2 - 1),
                                           0, 0)),
                pl.BlockSpec((K1, Cout), lambda n, t: (0, 0)),
                pl.BlockSpec((1, Cout), lambda n, t: (0, 0)),
                pl.BlockSpec((1, Cout), lambda n, t: (0, 0)),
                pl.BlockSpec((K2, Cout), lambda n, t: (0, 0)),
                pl.BlockSpec((1, Cout), lambda n, t: (0, 0)),
                pl.BlockSpec((1, Cout), lambda n, t: (0, 0)),
            ],
            out_specs=pl.BlockSpec((1, TH, W, Cout), lambda n, t: (n, t, 0, 0)),
            scratch_shapes=[
                pltpu.VMEM((TH + 4, Wp, Cin), jnp.bfloat16),    # padded input tile
                pltpu.VMEM((TH + 2, Wp, Cout), jnp.bfloat16),   # padded stage-1 out
            ],
        ),
        compiler_params=pltpu.CompilerParams(
            dimension_semantics=("parallel", "parallel"),
            # 48 MiB fits under v7x's 64 MiB physical VMEM with double-buffer
            # headroom and lifts the 32 MiB scoped default on v5e/v6e.
            vmem_limit_bytes=48 * 1024 * 1024,
        ),
    )(x, x, x, w1m, s1, b1, w2m, s2, b2)

    return jnp.transpose(out, (0, 3, 1, 2))        # NHWC -> NCHW


# --------------------------------------------------------------------------
# Pure-JAX reference for the correctness check
# --------------------------------------------------------------------------
def _fuse_bn(bias, bn, eps=1e-5):
    gamma, beta, mean, var = bn
    scale = gamma / jnp.sqrt(var + eps)
    shift = beta + (bias - mean) * scale
    return scale, shift


def _ref_stage(x_nhwc, w_hwio, scale, shift):
    y = jax.lax.conv_general_dilated(
        x_nhwc, w_hwio, window_strides=(1, 1), padding="SAME",
        dimension_numbers=("NHWC", "HWIO", "NHWC"))
    y = y * scale.reshape(1, 1, 1, -1) + shift.reshape(1, 1, 1, -1)
    return jnp.maximum(y, 0.0)


def double_conv2d_ref(x_nchw, params):
    x = jnp.transpose(x_nchw, (0, 2, 3, 1))
    s1, sh1 = _fuse_bn(params["b1"], params["bn1"])
    s2, sh2 = _fuse_bn(params["b2"], params["bn2"])
    out = _ref_stage(x, params["w1"], s1, sh1)
    out = _ref_stage(out, params["w2"], s2, sh2)
    return jnp.transpose(out, (0, 3, 1, 2))


if __name__ == "__main__":
    key = jax.random.PRNGKey(0)
    k_x, k_p = jax.random.split(key)

    N, Cin, H, W = 2, 4, 16, 16
    Cout = 8
    x = jax.random.normal(k_x, (N, Cin, H, W), dtype=jnp.float32)
    params = init_double_conv_params(k_p, Cin, Cout)

    # row_tile=8 -> 2 row tiles per image: exercises the halo path on both
    # boundary tiles.
    out = jax.block_until_ready(double_conv2d(x, params, row_tile=8))
    ref = jax.block_until_ready(double_conv2d_ref(x, params))

    assert out.shape == (N, Cout, H, W), out.shape
    # bf16 MXU operands vs an f32 reference -> loosened tolerance.
    max_err = float(jnp.max(jnp.abs(out - ref)))
    assert jnp.allclose(out, ref, atol=5e-2, rtol=5e-2), max_err

    print("KERNEL_OK")
</pallas_src>

<mosaic_0001>
module attributes {stable_mosaic.version = 11 : i64} {
  func.func @_double_conv_kernel(%arg0: i32, %arg1: i32, %arg2: memref<1x8x16x4xf32, #tpu.memory_space<vmem>>, %arg3: memref<1x2x16x4xf32, #tpu.memory_space<vmem>>, %arg4: memref<1x2x16x4xf32, #tpu.memory_space<vmem>>, %arg5: memref<36x8xbf16, #tpu.memory_space<vmem>>, %arg6: memref<1x8xf32, #tpu.memory_space<vmem>>, %arg7: memref<1x8xf32, #tpu.memory_space<vmem>>, %arg8: memref<72x8xbf16, #tpu.memory_space<vmem>>, %arg9: memref<1x8xf32, #tpu.memory_space<vmem>>, %arg10: memref<1x8xf32, #tpu.memory_space<vmem>>, %arg11: memref<1x8x16x8xf32, #tpu.memory_space<vmem>>, %arg12: memref<12x24x4xbf16, #tpu.memory_space<vmem>>, %arg13: memref<10x24x8xbf16, #tpu.memory_space<vmem>>) attributes {dimension_semantics = [#tpu.dimension_semantics<parallel>, #tpu.dimension_semantics<parallel>], iteration_bounds = array<i64: 2, 2>, scalar_prefetch = 0 : i64, scratch_operands = 2 : i64, tpu.core_type = #tpu.core_type<tc>, window_params = [{transform_indices = @transform_0, window_bounds = array<i64: 1, 8, 16, 4>}, {transform_indices = @transform_1, window_bounds = array<i64: 1, 2, 16, 4>}, {transform_indices = @transform_2, window_bounds = array<i64: 1, 2, 16, 4>}, {pipeline_mode = #tpu.pipeline_mode<synchronous>, transform_indices = @transform_3, window_bounds = array<i64: 36, 8>}, {pipeline_mode = #tpu.pipeline_mode<synchronous>, transform_indices = @transform_4, window_bounds = array<i64: 1, 8>}, {pipeline_mode = #tpu.pipeline_mode<synchronous>, transform_indices = @transform_5, window_bounds = array<i64: 1, 8>}, {pipeline_mode = #tpu.pipeline_mode<synchronous>, transform_indices = @transform_6, window_bounds = array<i64: 72, 8>}, {pipeline_mode = #tpu.pipeline_mode<synchronous>, transform_indices = @transform_7, window_bounds = array<i64: 1, 8>}, {pipeline_mode = #tpu.pipeline_mode<synchronous>, transform_indices = @transform_8, window_bounds = array<i64: 1, 8>}, {transform_indices = @transform_9, window_bounds = array<i64: 1, 8, 16, 8>}]} {
    %cst = arith.constant 0.000000e+00 : bf16
    %0 = vector.broadcast %cst : bf16 to vector<12x1x4xbf16>
    %c0 = arith.constant 0 : index
    %c0_0 = arith.constant 0 : index
    %c0_1 = arith.constant 0 : index
    %1 = vector.load %arg12[%c0, %c0_0, %c0_1] : memref<12x24x4xbf16, #tpu.memory_space<vmem>>, vector<12x1x4xbf16>
    tpu.vector_store %arg12[%c0, %c0_0, %c0_1], %0 {strides = array<i32>} : memref<12x24x4xbf16, #tpu.memory_space<vmem>>, vector<12x1x4xbf16>,
    %cst_2 = arith.constant 0.000000e+00 : bf16
    %2 = vector.broadcast %cst_2 : bf16 to vector<12x7x4xbf16>
    %c0_3 = arith.constant 0 : index
    %c17 = arith.constant 17 : index
    %c0_4 = arith.constant 0 : index
    %3 = vector.load %arg12[%c0_3, %c17, %c0_4] : memref<12x24x4xbf16, #tpu.memory_space<vmem>>, vector<12x7x4xbf16>
    tpu.vector_store %arg12[%c0_3, %c17, %c0_4], %2 {strides = array<i32>} : memref<12x24x4xbf16, #tpu.memory_space<vmem>>, vector<12x7x4xbf16>,
    %cst_5 = arith.constant 0.000000e+00 : bf16
    %4 = vector.broadcast %cst_5 : bf16 to vector<10x1x8xbf16>
    %c0_6 = arith.constant 0 : index
    %c0_7 = arith.constant 0 : index
    %c0_8 = arith.constant 0 : index
    %5 = vector.load %arg13[%c0_6, %c0_7, %c0_8] : memref<10x24x8xbf16, #tpu.memory_space<vmem>>, vector<10x1x8xbf16>
    tpu.vector_store %arg13[%c0_6, %c0_7, %c0_8], %4 {strides = array<i32>} : memref<10x24x8xbf16, #tpu.memory_space<vmem>>, vector<10x1x8xbf16>,
    %cst_9 = arith.constant 0.000000e+00 : bf16
    %6 = vector.broadcast %cst_9 : bf16 to vector<10x7x8xbf16>
    %c0_10 = arith.constant 0 : index
    %c17_11 = arith.constant 17 : index
    %c0_12 = arith.constant 0 : index
    %7 = vector.load %arg13[%c0_10, %c17_11, %c0_12] : memref<10x24x8xbf16, #tpu.memory_space<vmem>>, vector<10x7x8xbf16>
    tpu.vector_store %arg13[%c0_10, %c17_11, %c0_12], %6 {strides = array<i32>} : memref<10x24x8xbf16, #tpu.memory_space<vmem>>, vector<10x7x8xbf16>,
    %c0_13 = arith.constant 0 : index
    %c0_14 = arith.constant 0 : index
    %c0_15 = arith.constant 0 : index
    %c0_16 = arith.constant 0 : index
    %8 = vector.load %arg2[%c0_13, %c0_14, %c0_15, %c0_16] : memref<1x8x16x4xf32, #tpu.memory_space<vmem>>, vector<1x8x16x4xf32>
    %9 = vector.shape_cast %8 : vector<1x8x16x4xf32> to vector<8x16x4xf32>
    %10 = arith.truncf %9 : vector<8x16x4xf32> to vector<8x16x4xbf16>
    %c2 = arith.constant 2 : index
    %c1 = arith.constant 1 : index
    %c0_17 = arith.constant 0 : index
    %11 = vector.load %arg12[%c2, %c1, %c0_17] : memref<12x24x4xbf16, #tpu.memory_space<vmem>>, vector<8x16x4xbf16>
    tpu.vector_store %arg12[%c2, %c1, %c0_17], %10 {strides = array<i32>} : memref<12x24x4xbf16, #tpu.memory_space<vmem>>, vector<8x16x4xbf16>,
    %c0_18 = arith.constant 0 : index
    %c0_19 = arith.constant 0 : index
    %c0_20 = arith.constant 0 : index
    %c0_21 = arith.constant 0 : index
    %12 = vector.load %arg3[%c0_18, %c0_19, %c0_20, %c0_21] : memref<1x2x16x4xf32, #tpu.memory_space<vmem>>, vector<1x2x16x4xf32>
    %13 = vector.shape_cast %12 : vector<1x2x16x4xf32> to vector<2x16x4xf32>
    %14 = arith.truncf %13 : vector<2x16x4xf32> to vector<2x16x4xbf16>
    %c0_22 = arith.constant 0 : index
    %c1_23 = arith.constant 1 : index
    %c0_24 = arith.constant 0 : index
    %15 = vector.load %arg12[%c0_22, %c1_23, %c0_24] : memref<12x24x4xbf16, #tpu.memory_space<vmem>>, vector<2x16x4xbf16>
    tpu.vector_store %arg12[%c0_22, %c1_23, %c0_24], %14 {strides = array<i32>} : memref<12x24x4xbf16, #tpu.memory_space<vmem>>, vector<2x16x4xbf16>,
    %c0_25 = arith.constant 0 : index
    %c0_26 = arith.constant 0 : index
    %c0_27 = arith.constant 0 : index
    %c0_28 = arith.constant 0 : index
    %16 = vector.load %arg4[%c0_25, %c0_26, %c0_27, %c0_28] : memref<1x2x16x4xf32, #tpu.memory_space<vmem>>, vector<1x2x16x4xf32>
    %17 = vector.shape_cast %16 : vector<1x2x16x4xf32> to vector<2x16x4xf32>
    %18 = arith.truncf %17 : vector<2x16x4xf32> to vector<2x16x4xbf16>
    %c10 = arith.constant 10 : index
    %c1_29 = arith.constant 1 : index
    %c0_30 = arith.constant 0 : index
    %19 = vector.load %arg12[%c10, %c1_29, %c0_30] : memref<12x24x4xbf16, #tpu.memory_space<vmem>>, vector<2x16x4xbf16>
    tpu.vector_store %arg12[%c10, %c1_29, %c0_30], %18 {strides = array<i32>} : memref<12x24x4xbf16, #tpu.memory_space<vmem>>, vector<2x16x4xbf16>,
    %c0_i32 = arith.constant 0 : i32
    %20 = arith.cmpi eq, %arg1, %c0_i32 : i32
    %21 = arith.extui %20 : i1 to i32
    %c0_i32_31 = arith.constant 0 : i32
    %22 = arith.cmpi ne, %21, %c0_i32_31 : i32
    scf.if %22 {
      %cst_114 = arith.constant 0.000000e+00 : bf16
      %97 = vector.broadcast %cst_114 : bf16 to vector<2x24x4xbf16>
      %c0_115 = arith.constant 0 : index
      %c0_116 = arith.constant 0 : index
      %c0_117 = arith.constant 0 : index
      %98 = vector.load %arg12[%c0_115, %c0_116, %c0_117] : memref<12x24x4xbf16, #tpu.memory_space<vmem>>, vector<2x24x4xbf16>
      tpu.vector_store %arg12[%c0_115, %c0_116, %c0_117], %97 {strides = array<i32>} : memref<12x24x4xbf16, #tpu.memory_space<vmem>>, vector<2x24x4xbf16>,
    } else {
    }
    %c1_i32 = arith.constant 1 : i32
    %23 = arith.cmpi eq, %arg1, %c1_i32 : i32
    %24 = arith.extui %23 : i1 to i32
    %c0_i32_32 = arith.constant 0 : i32
    %25 = arith.cmpi ne, %24, %c0_i32_32 : i32
    scf.if %25 {
      %cst_114 = arith.constant 0.000000e+00 : bf16
      %97 = vector.broadcast %cst_114 : bf16 to vector<2x24x4xbf16>
      %c10_115 = arith.constant 10 : index
      %c0_116 = arith.constant 0 : index
      %c0_117 = arith.constant 0 : index
      %98 = vector.load %arg12[%c10_115, %c0_116, %c0_117] : memref<12x24x4xbf16, #tpu.memory_space<vmem>>, vector<2x24x4xbf16>
      tpu.vector_store %arg12[%c10_115, %c0_116, %c0_117], %97 {strides = array<i32>} : memref<12x24x4xbf16, #tpu.memory_space<vmem>>, vector<2x24x4xbf16>,
    } else {
    }
    %c0_33 = arith.constant 0 : index
    %c0_34 = arith.constant 0 : index
    %c0_35 = arith.constant 0 : index
    %26 = vector.load %arg12[%c0_33, %c0_34, %c0_35] : memref<12x24x4xbf16, #tpu.memory_space<vmem>>, vector<10x16x4xbf16>
    %27 = vector.shape_cast %26 : vector<10x16x4xbf16> to vector<160x4xbf16>
    %c0_36 = arith.constant 0 : index
    %c1_37 = arith.constant 1 : index
    %c0_38 = arith.constant 0 : index
    %28 = vector.load %arg12[%c0_36, %c1_37, %c0_38] : memref<12x24x4xbf16, #tpu.memory_space<vmem>>, vector<10x16x4xbf16>
    %29 = vector.shape_cast %28 : vector<10x16x4xbf16> to vector<160x4xbf16>
    %c0_39 = arith.constant 0 : index
    %c2_40 = arith.constant 2 : index
    %c0_41 = arith.constant 0 : index
    %30 = vector.load %arg12[%c0_39, %c2_40, %c0_41] : memref<12x24x4xbf16, #tpu.memory_space<vmem>>, vector<10x16x4xbf16>
    %31 = vector.shape_cast %30 : vector<10x16x4xbf16> to vector<160x4xbf16>
    %c1_42 = arith.constant 1 : index
    %c0_43 = arith.constant 0 : index
    %c0_44 = arith.constant 0 : index
    %32 = vector.load %arg12[%c1_42, %c0_43, %c0_44] : memref<12x24x4xbf16, #tpu.memory_space<vmem>>, vector<10x16x4xbf16>
    %33 = vector.shape_cast %32 : vector<10x16x4xbf16> to vector<160x4xbf16>
    %c1_45 = arith.constant 1 : index
    %c1_46 = arith.constant 1 : index
    %c0_47 = arith.constant 0 : index
    %34 = vector.load %arg12[%c1_45, %c1_46, %c0_47] : memref<12x24x4xbf16, #tpu.memory_space<vmem>>, vector<10x16x4xbf16>
    %35 = vector.shape_cast %34 : vector<10x16x4xbf16> to vector<160x4xbf16>
    %c1_48 = arith.constant 1 : index
    %c2_49 = arith.constant 2 : index
    %c0_50 = arith.constant 0 : index
    %36 = vector.load %arg12[%c1_48, %c2_49, %c0_50] : memref<12x24x4xbf16, #tpu.memory_space<vmem>>, vector<10x16x4xbf16>
    %37 = vector.shape_cast %36 : vector<10x16x4xbf16> to vector<160x4xbf16>
    %c2_51 = arith.constant 2 : index
    %c0_52 = arith.constant 0 : index
    %c0_53 = arith.constant 0 : index
    %38 = vector.load %arg12[%c2_51, %c0_52, %c0_53] : memref<12x24x4xbf16, #tpu.memory_space<vmem>>, vector<10x16x4xbf16>
    %39 = vector.shape_cast %38 : vector<10x16x4xbf16> to vector<160x4xbf16>
    %c2_54 = arith.constant 2 : index
    %c1_55 = arith.constant 1 : index
    %c0_56 = arith.constant 0 : index
    %40 = vector.load %arg12[%c2_54, %c1_55, %c0_56] : memref<12x24x4xbf16, #tpu.memory_space<vmem>>, vector<10x16x4xbf16>
    %41 = vector.shape_cast %40 : vector<10x16x4xbf16> to vector<160x4xbf16>
    %c2_57 = arith.constant 2 : index
    %c2_58 = arith.constant 2 : index
    %c0_59 = arith.constant 0 : index
    %42 = vector.load %arg12[%c2_57, %c2_58, %c0_59] : memref<12x24x4xbf16, #tpu.memory_space<vmem>>, vector<10x16x4xbf16>
    %43 = vector.shape_cast %42 : vector<10x16x4xbf16> to vector<160x4xbf16>
    %44 = tpu.concatenate %27, %29, %31, %33, %35, %37, %39, %41, %43 in 1 : vector<160x4xbf16>, vector<160x4xbf16>, vector<160x4xbf16>, vector<160x4xbf16>, vector<160x4xbf16>, vector<160x4xbf16>, vector<160x4xbf16>, vector<160x4xbf16>, vector<160x4xbf16> -> vector<160x36xbf16>
    %c0_60 = arith.constant 0 : index
    %c0_61 = arith.constant 0 : index
    %45 = vector.load %arg5[%c0_60, %c0_61] : memref<36x8xbf16, #tpu.memory_space<vmem>>, vector<36x8xbf16>
    %cst_62 = arith.constant dense<0.000000e+00> : vector<160x8xf32>
    %46 = tpu.matmul %44, %45, %cst_62 {dimension_numbers = #tpu.dot_dimension_numbers<[1], [0], [0], [1], [0, 0, 1, 1], [], []>} : vector<160x36xbf16>, vector<36x8xbf16>, vector<160x8xf32> -> vector<160x8xf32>
    %c0_63 = arith.constant 0 : index
    %c0_64 = arith.constant 0 : index
    %47 = vector.load %arg6[%c0_63, %c0_64] : memref<1x8xf32, #tpu.memory_space<vmem>>, vector<1x8xf32>
    %48 = vector.broadcast %47 : vector<1x8xf32> to vector<160x8xf32>
    %49 = arith.mulf %46, %48 : vector<160x8xf32>
    %c0_65 = arith.constant 0 : index
    %c0_66 = arith.constant 0 : index
    %50 = vector.load %arg7[%c0_65, %c0_66] : memref<1x8xf32, #tpu.memory_space<vmem>>, vector<1x8xf32>
    %51 = vector.broadcast %50 : vector<1x8xf32> to vector<160x8xf32>
    %52 = arith.addf %49, %51 : vector<160x8xf32>
    %cst_67 = arith.constant 0.000000e+00 : f32
    %53 = vector.broadcast %cst_67 : f32 to vector<160x8xf32>
    %54 = arith.maximumf %52, %53 : vector<160x8xf32>
    %55 = arith.truncf %54 : vector<160x8xf32> to vector<160x8xbf16>
    %56 = vector.shape_cast %55 : vector<160x8xbf16> to vector<10x16x8xbf16>
    %c0_68 = arith.constant 0 : index
    %c1_69 = arith.constant 1 : index
    %c0_70 = arith.constant 0 : index
    %57 = vector.load %arg13[%c0_68, %c1_69, %c0_70] : memref<10x24x8xbf16, #tpu.memory_space<vmem>>, vector<10x16x8xbf16>
    tpu.vector_store %arg13[%c0_68, %c1_69, %c0_70], %56 {strides = array<i32>} : memref<10x24x8xbf16, #tpu.memory_space<vmem>>, vector<10x16x8xbf16>,
    %c0_i32_71 = arith.constant 0 : i32
    %58 = arith.cmpi eq, %arg1, %c0_i32_71 : i32
    %59 = arith.extui %58 : i1 to i32
    %c0_i32_72 = arith.constant 0 : i32
    %60 = arith.cmpi ne, %59, %c0_i32_72 : i32
    scf.if %60 {
      %cst_114 = arith.constant 0.000000e+00 : bf16
      %97 = vector.broadcast %cst_114 : bf16 to vector<1x24x8xbf16>
      %c0_115 = arith.constant 0 : index
      %c0_116 = arith.constant 0 : index
      %c0_117 = arith.constant 0 : index
      %98 = vector.load %arg13[%c0_115, %c0_116, %c0_117] : memref<10x24x8xbf16, #tpu.memory_space<vmem>>, vector<1x24x8xbf16>
      tpu.vector_store %arg13[%c0_115, %c0_116, %c0_117], %97 {strides = array<i32>} : memref<10x24x8xbf16, #tpu.memory_space<vmem>>, vector<1x24x8xbf16>,
    } else {
    }
    %c1_i32_73 = arith.constant 1 : i32
    %61 = arith.cmpi eq, %arg1, %c1_i32_73 : i32
    %62 = arith.extui %61 : i1 to i32
    %c0_i32_74 = arith.constant 0 : i32
    %63 = arith.cmpi ne, %62, %c0_i32_74 : i32
    scf.if %63 {
      %cst_114 = arith.constant 0.000000e+00 : bf16
      %97 = vector.broadcast %cst_114 : bf16 to vector<1x24x8xbf16>
      %c9 = arith.constant 9 : index
      %c0_115 = arith.constant 0 : index
      %c0_116 = arith.constant 0 : index
      %98 = vector.load %arg13[%c9, %c0_115, %c0_116] : memref<10x24x8xbf16, #tpu.memory_space<vmem>>, vector<1x24x8xbf16>
      tpu.vector_store %arg13[%c9, %c0_115, %c0_116], %97 {strides = array<i32>} : memref<10x24x8xbf16, #tpu.memory_space<vmem>>, vector<1x24x8xbf16>,
    } else {
    }
    %c0_75 = arith.constant 0 : index
    %c0_76 = arith.constant 0 : index
    %c0_77 = arith.constant 0 : index
    %64 = vector.load %arg13[%c0_75, %c0_76, %c0_77] : memref<10x24x8xbf16, #tpu.memory_space<vmem>>, vector<8x16x8xbf16>
    %65 = vector.shape_cast %64 : vector<8x16x8xbf16> to vector<128x8xbf16>
    %c0_78 = arith.constant 0 : index
    %c1_79 = arith.constant 1 : index
    %c0_80 = arith.constant 0 : index
    %66 = vector.load %arg13[%c0_78, %c1_79, %c0_80] : memref<10x24x8xbf16, #tpu.memory_space<vmem>>, vector<8x16x8xbf16>
    %67 = vector.shape_cast %66 : vector<8x16x8xbf16> to vector<128x8xbf16>
    %c0_81 = arith.constant 0 : index
    %c2_82 = arith.constant 2 : index
    %c0_83 = arith.constant 0 : index
    %68 = vector.load %arg13[%c0_81, %c2_82, %c0_83] : memref<10x24x8xbf16, #tpu.memory_space<vmem>>, vector<8x16x8xbf16>
    %69 = vector.shape_cast %68 : vector<8x16x8xbf16> to vector<128x8xbf16>
    %c1_84 = arith.constant 1 : index
    %c0_85 = arith.constant 0 : index
    %c0_86 = arith.constant 0 : index
    %70 = vector.load %arg13[%c1_84, %c0_85, %c0_86] : memref<10x24x8xbf16, #tpu.memory_space<vmem>>, vector<8x16x8xbf16>
    %71 = vector.shape_cast %70 : vector<8x16x8xbf16> to vector<128x8xbf16>
    %c1_87 = arith.constant 1 : index
    %c1_88 = arith.constant 1 : index
    %c0_89 = arith.constant 0 : index
    %72 = vector.load %arg13[%c1_87, %c1_88, %c0_89] : memref<10x24x8xbf16, #tpu.memory_space<vmem>>, vector<8x16x8xbf16>
    %73 = vector.shape_cast %72 : vector<8x16x8xbf16> to vector<128x8xbf16>
    %c1_90 = arith.constant 1 : index
    %c2_91 = arith.constant 2 : index
    %c0_92 = arith.constant 0 : index
    %74 = vector.load %arg13[%c1_90, %c2_91, %c0_92] : memref<10x24x8xbf16, #tpu.memory_space<vmem>>, vector<8x16x8xbf16>
    %75 = vector.shape_cast %74 : vector<8x16x8xbf16> to vector<128x8xbf16>
    %c2_93 = arith.constant 2 : index
    %c0_94 = arith.constant 0 : index
    %c0_95 = arith.constant 0 : index
    %76 = vector.load %arg13[%c2_93, %c0_94, %c0_95] : memref<10x24x8xbf16, #tpu.memory_space<vmem>>, vector<8x16x8xbf16>
    %77 = vector.shape_cast %76 : vector<8x16x8xbf16> to vector<128x8xbf16>
    %c2_96 = arith.constant 2 : index
    %c1_97 = arith.constant 1 : index
    %c0_98 = arith.constant 0 : index
    %78 = vector.load %arg13[%c2_96, %c1_97, %c0_98] : memref<10x24x8xbf16, #tpu.memory_space<vmem>>, vector<8x16x8xbf16>
    %79 = vector.shape_cast %78 : vector<8x16x8xbf16> to vector<128x8xbf16>
    %c2_99 = arith.constant 2 : index
    %c2_100 = arith.constant 2 : index
    %c0_101 = arith.constant 0 : index
    %80 = vector.load %arg13[%c2_99, %c2_100, %c0_101] : memref<10x24x8xbf16, #tpu.memory_space<vmem>>, vector<8x16x8xbf16>
    %81 = vector.shape_cast %80 : vector<8x16x8xbf16> to vector<128x8xbf16>
    %82 = tpu.concatenate %65, %67, %69, %71, %73, %75, %77, %79, %81 in 1 : vector<128x8xbf16>, vector<128x8xbf16>, vector<128x8xbf16>, vector<128x8xbf16>, vector<128x8xbf16>, vector<128x8xbf16>, vector<128x8xbf16>, vector<128x8xbf16>, vector<128x8xbf16> -> vector<128x72xbf16>
    %c0_102 = arith.constant 0 : index
    %c0_103 = arith.constant 0 : index
    %83 = vector.load %arg8[%c0_102, %c0_103] : memref<72x8xbf16, #tpu.memory_space<vmem>>, vector<72x8xbf16>
    %cst_104 = arith.constant dense<0.000000e+00> : vector<128x8xf32>
    %84 = tpu.matmul %82, %83, %cst_104 {dimension_numbers = #tpu.dot_dimension_numbers<[1], [0], [0], [1], [0, 0, 1, 1], [], []>} : vector<128x72xbf16>, vector<72x8xbf16>, vector<128x8xf32> -> vector<128x8xf32>
    %c0_105 = arith.constant 0 : index
    %c0_106 = arith.constant 0 : index
    %85 = vector.load %arg9[%c0_105, %c0_106] : memref<1x8xf32, #tpu.memory_space<vmem>>, vector<1x8xf32>
    %86 = vector.broadcast %85 : vector<1x8xf32> to vector<128x8xf32>
    %87 = arith.mulf %84, %86 : vector<128x8xf32>
    %c0_107 = arith.constant 0 : index
    %c0_108 = arith.constant 0 : index
    %88 = vector.load %arg10[%c0_107, %c0_108] : memref<1x8xf32, #tpu.memory_space<vmem>>, vector<1x8xf32>
    %89 = vector.broadcast %88 : vector<1x8xf32> to vector<128x8xf32>
    %90 = arith.addf %87, %89 : vector<128x8xf32>
    %cst_109 = arith.constant 0.000000e+00 : f32
    %91 = vector.broadcast %cst_109 : f32 to vector<128x8xf32>
    %92 = arith.maximumf %90, %91 : vector<128x8xf32>
    %93 = vector.shape_cast %92 : vector<128x8xf32> to vector<8x16x8xf32>
    %c0_110 = arith.constant 0 : index
    %c0_111 = arith.constant 0 : index
    %c0_112 = arith.constant 0 : index
    %c0_113 = arith.constant 0 : index
    %94 = vector.load %arg11[%c0_110, %c0_111, %c0_112, %c0_113] : memref<1x8x16x8xf32, #tpu.memory_space<vmem>>, vector<1x8x16x8xf32>
    %95 = vector.shape_cast %94 : vector<1x8x16x8xf32> to vector<8x16x8xf32>
    %96 = vector.shape_cast %93 : vector<8x16x8xf32> to vector<1x8x16x8xf32>
    tpu.vector_store %arg11[%c0_110, %c0_111, %c0_112, %c0_113], %96 {strides = array<i32>} : memref<1x8x16x8xf32, #tpu.memory_space<vmem>>, vector<1x8x16x8xf32>,
    return
  }
  func.func @transform_0(%arg0: i32, %arg1: i32) -> (i32, i32, i32, i32) {
    %c0_i32 = arith.constant 0 : i32
    %c0_i32_0 = arith.constant 0 : i32
    %c0_i32_1 = arith.constant 0 : i32
    return %arg0, %arg1, %c0_i32, %c0_i32_0 : i32, i32, i32, i32
  }
  func.func @transform_1(%arg0: i32, %arg1: i32) -> (i32, i32, i32, i32) {
    %c4_i32 = arith.constant 4 : i32
    %0 = arith.muli %arg1, %c4_i32 : i32
    %c1_i32 = arith.constant 1 : i32
    %1 = arith.subi %0, %c1_i32 : i32
    %c0_i32 = arith.constant 0 : i32
    %2 = arith.maxsi %1, %c0_i32 : i32
    %c0_i32_0 = arith.constant 0 : i32
    %c0_i32_1 = arith.constant 0 : i32
    %c0_i32_2 = arith.constant 0 : i32
    return %arg0, %2, %c0_i32_0, %c0_i32_1 : i32, i32, i32, i32
  }
  func.func @transform_2(%arg0: i32, %arg1: i32) -> (i32, i32, i32, i32) {
    %c1_i32 = arith.constant 1 : i32
    %0 = arith.addi %arg1, %c1_i32 : i32
    %c4_i32 = arith.constant 4 : i32
    %1 = arith.muli %0, %c4_i32 : i32
    %c7_i32 = arith.constant 7 : i32
    %2 = arith.minsi %1, %c7_i32 : i32
    %c0_i32 = arith.constant 0 : i32
    %c0_i32_0 = arith.constant 0 : i32
    %c0_i32_1 = arith.constant 0 : i32
    return %arg0, %2, %c0_i32, %c0_i32_0 : i32, i32, i32, i32
  }
  func.func @transform_3(%arg0: i32, %arg1: i32) -> (i32, i32) {
    %c0_i32 = arith.constant 0 : i32
    %c0_i32_0 = arith.constant 0 : i32
    %c0_i32_1 = arith.constant 0 : i32
    return %c0_i32, %c0_i32_0 : i32, i32
  }
  func.func @transform_4(%arg0: i32, %arg1: i32) -> (i32, i32) {
    %c0_i32 = arith.constant 0 : i32
    %c0_i32_0 = arith.constant 0 : i32
    %c0_i32_1 = arith.constant 0 : i32
    return %c0_i32, %c0_i32_0 : i32, i32
  }
  func.func @transform_5(%arg0: i32, %arg1: i32) -> (i32, i32) {
    %c0_i32 = arith.constant 0 : i32
    %c0_i32_0 = arith.constant 0 : i32
    %c0_i32_1 = arith.constant 0 : i32
    return %c0_i32, %c0_i32_0 : i32, i32
  }
  func.func @transform_6(%arg0: i32, %arg1: i32) -> (i32, i32) {
    %c0_i32 = arith.constant 0 : i32
    %c0_i32_0 = arith.constant 0 : i32
    %c0_i32_1 = arith.constant 0 : i32
    return %c0_i32, %c0_i32_0 : i32, i32
  }
  func.func @transform_7(%arg0: i32, %arg1: i32) -> (i32, i32) {
    %c0_i32 = arith.constant 0 : i32
    %c0_i32_0 = arith.constant 0 : i32
    %c0_i32_1 = arith.constant 0 : i32
    return %c0_i32, %c0_i32_0 : i32, i32
  }
  func.func @transform_8(%arg0: i32, %arg1: i32) -> (i32, i32) {
    %c0_i32 = arith.constant 0 : i32
    %c0_i32_0 = arith.constant 0 : i32
    %c0_i32_1 = arith.constant 0 : i32
    return %c0_i32, %c0_i32_0 : i32, i32
  }
  func.func @transform_9(%arg0: i32, %arg1: i32) -> (i32, i32, i32, i32) {
    %c0_i32 = arith.constant 0 : i32
    %c0_i32_0 = arith.constant 0 : i32
    %c0_i32_1 = arith.constant 0 : i32
    return %arg0, %arg1, %c0_i32, %c0_i32_0 : i32, i32, i32, i32
  }
}

</mosaic_0001>

<bundles_post_ra>
// kernel: tpu_custom_call.1
= control target key start
LH: loop header
LB: loop body
LE: loop exit
PB: predicated region body
PF: predicated region fallthrough
CT: control target
= control target key end

     0   :  { %s5961_s30 = smov 0   ;;  %s5963_s10 = smov 0   ;;  %s7907_s0 = inlined_call_operand.vmem [shape: f32[2,16,16,4], index: 0, kind: input, shape index: {}]   ;;  %s7908_s1 = inlined_call_operand.vmem [shape: f32[2,16,16,4], index: 1, kind: input, shape index: {}]   ;;  %s7909_s2 = inlined_call_operand.vmem [shape: f32[2,16,16,4], index: 2, kind: input, shape index: {}]   ;;  %s7910_s3 = inlined_call_operand.vmem [shape: bf16[36,8], index: 3, kind: input, shape index: {}]   ;;  %s7911_s4 = inlined_call_operand.vmem [shape: f32[1,8], index: 4, kind: input, shape index: {}]   ;;  %s7912_s5 = inlined_call_operand.vmem [shape: f32[1,8], index: 5, kind: input, shape index: {}]   ;;  %s7913_s6 = inlined_call_operand.vmem [shape: bf16[72,8], index: 6, kind: input, shape index: {}]   ;;  %s7914_s7 = inlined_call_operand.vmem [shape: f32[1,8], index: 7, kind: input, shape index: {}]   ;;  %s7915_s8 = inlined_call_operand.vmem [shape: f32[1,8], index: 8, kind: input, shape index: {}]   ;;  %s7916_s9 = inlined_call_operand.vmem [shape: f32[2,16,16,8], index: 9, kind: output, shape index: {}]  }
   0x1   :  { %s5965_s11 = smov 0   ;;  %s5967_s12 = smov 0  }
   0x2   :  { %s5969_s13 = smov 0  }
   0x3 LB: > { %s28_s14 = sadd.s32 1, %s5885_s11  ;;  %s31_s15 = sadd.s32 1, %s5889_s12  ;;  %s5893_s13 = sphi %s5969_s13, %s19_s13   ;;  %s5889_s12 = sphi %s5967_s12, %s7935_s12   ;;  %s5885_s11 = sphi %s5965_s11, %s7934_s11   ;;  %s5881_s10 = sphi %s5963_s10, %s7933_s10   ;;  %s5877_s30 = sphi %s5961_s30, %s7932_s30  }
   0x4   : > { %p29_p0 = scmp.ge.s32.totalorder %s28_s14, 2  ;;  %p5265_p1 = scmp.ge.s32.totalorder %s5893_s13, 1 }
   0x5   : > { %p377_p2 = scmp.lt.s32.totalorder %s5893_s13, 5 }
   0x6   : > { %s7937_s14 = smov (%p29_p0, %s28_s14), 0  ;;  %s7939_s15 = smov (!%p29_p0, %s31_s15), %s5889_s12 }
   0x7   : > { %p378_p3 = pnand %p5265_p1, %p377_p2  ;;  %p33_p4 = scmp.ge.s32.totalorder %s7939_s15, 2 }
   0x8   : > { %vm512_vm0 = vcmask (!%p378_p3), 24576   ;;  %vm513_vm1 = vsmask.f32 (!%p378_p3), 256  ;;  %v515_v0 = vld [vmem:[#allocation2] sm:$0x1] (!%p378_p3)  ;;  %vm551_vm4 = vcmask (!%p378_p3), 27648  }
   0x9   : > { %s7941_s15 = smov (%p33_p4, %s7939_s15), 0  ;;  %381 = sbr.rel (%p378_p3) target bundleno = 1167 (0x48f), region = 56 }
   0xa   : > { %vm5996_vm2 = vmand (!%p378_p3), %vm512_vm0, %vm513_vm1  ;;  %v518_v2 = vld [vmem:[#allocation2 + $0xc] sm:$0x1] (!%p378_p3)  ;;  %v521_v3 = vld [vmem:[#allocation2 + $0x18] sm:$0x1] (!%p378_p3)  ;;  %vm552_vm3 = vsmask.f32 (!%p378_p3), 7938 }
   0xb   : > { %v516_v4 = vsel (!%p378_p3), %vm5996_vm2, 0, %v515_v0  ;;  %v519_v5 = vsel (!%p378_p3), %vm5996_vm2, 0, %v518_v2  ;;  %v522_v6 = vsel (!%p378_p3), %vm5996_vm2, 0, %v521_v3  ;;  %v524_v7 = vld [vmem:[#allocation2 + $0x24] sm:$0x1] (!%p378_p3)  ;;  %vm590_vm5 = vcmask (!%p378_p3), 57344   ;;  %vm6018_vm6 = vmand (!%p378_p3), %vm551_vm4, %vm552_vm3 }
   0xc   : > { %517 = vst [vmem:[#allocation2] sm:$0x1] (!%p378_p3), %v516_v4  ;;  %520 = vst [vmem:[#allocation2 + $0xc] sm:$0x1] (!%p378_p3), %v519_v5  ;;  %v525_v8 = vsel (!%p378_p3), %vm5996_vm2, 0, %v524_v7  ;;  %vm622_vm7 = vcmask (!%p378_p3), 60416  }
   0xd   : > { %523 = vst [vmem:[#allocation2 + $0x18] sm:$0x1] (!%p378_p3), %v522_v6  ;;  %v527_v9 = vld [vmem:[#allocation2 + $0x30] sm:$0x1] (!%p378_p3)  ;;  %v530_v10 = vld [vmem:[#allocation2 + $0x3c] sm:$0x1] (!%p378_p3)  ;;  %vm6048_vm8 = vmand (!%p378_p3), %vm590_vm5, %vm513_vm1 }
   0xe   : > { %526 = vst [vmem:[#allocation2 + $0x24] sm:$0x1] (!%p378_p3), %v525_v8  ;;  %v528_v11 = vsel (!%p378_p3), %vm5996_vm2, 0, %v527_v9  ;;  %v531_v12 = vsel (!%p378_p3), %vm5996_vm2, 0, %v530_v10  ;;  %v533_v13 = vld [vmem:[#allocation2 + $0x48] sm:$0x1] (!%p378_p3)  ;;  %vm6074_vm9 = vmand (!%p378_p3), %vm622_vm7, %vm552_vm3 }
   0xf   : > { %v536_v14 = vld [vmem:[#allocation2 + $0x54] sm:$0x1] (!%p378_p3)  ;;  %529 = vst [vmem:[#allocation2 + $0x30] sm:$0x1] (!%p378_p3), %v528_v11  ;;  %532 = vst [vmem:[#allocation2 + $0x3c] sm:$0x1] (!%p378_p3), %v531_v12 }
  0x10   : > { %v534_v15 = vsel %vm5996_vm2, 0, %v533_v13  ;;  %v537_v16 = vsel %vm5996_vm2, 0, %v536_v14  ;;  %v539_v17 = vld [vmem:[#allocation2 + $0x60] sm:$0x1]  ;;  %v542_v18 = vld [vmem:[#allocation2 + $0x6c] sm:$0x1] }
  0x11   : > { %535 = vst [vmem:[#allocation2 + $0x48] sm:$0x1] %v534_v15  ;;  %538 = vst [vmem:[#allocation2 + $0x54] sm:$0x1] %v537_v16  ;;  %v540_v20 = vsel %vm5996_vm2, 0, %v539_v17  ;;  %v543_v21 = vsel %vm5996_vm2, 0, %v542_v18 }
  0x12   : > { %v545_v22 = vld [vmem:[#allocation2 + $0x78] sm:$0x1]  ;;  %v548_v23 = vld [vmem:[#allocation2 + $0x84] sm:$0x1]  ;;  %541 = vst [vmem:[#allocation2 + $0x60] sm:$0x1] %v540_v20 }
  0x13   : > { %544 = vst [vmem:[#allocation2 + $0x6c] sm:$0x1] %v543_v21  ;;  %v546_v24 = vsel %vm5996_vm2, 0, %v545_v22  ;;  %v549_v25 = vsel %vm5996_vm2, 0, %v548_v23  ;;  %v554_v26 = vld [vmem:[#allocation2 + $0x8] sm:$0xf] }
  0x14   : > { %v557_v27 = vld [vmem:[#allocation2 + $0x14] sm:$0xf]  ;;  %547 = vst [vmem:[#allocation2 + $0x78] sm:$0x1] %v546_v24  ;;  %550 = vst [vmem:[#allocation2 + $0x84] sm:$0x1] %v549_v25 }
  0x15   : > { %v555_v28 = vsel %vm6018_vm6, 0, %v554_v26  ;;  %v558_v29 = vsel %vm6018_vm6, 0, %v557_v27  ;;  %v560_v30 = vld [vmem:[#allocation2 + $0x20] sm:$0xf]  ;;  %v563_v31 = vld [vmem:[#allocation2 + $0x2c] sm:$0xf] }
  0x16   : > { %556 = vst [vmem:[#allocation2 + $0x8] sm:$0xf] %v555_v28  ;;  %559 = vst [vmem:[#allocation2 + $0x14] sm:$0xf] %v558_v29  ;;  %v561_v32 = vsel %vm6018_vm6, 0, %v560_v30  ;;  %v564_v33 = vsel %vm6018_vm6, 0, %v563_v31 }
  0x17   : > { %v566_v34 = vld [vmem:[#allocation2 + $0x38] sm:$0xf]  ;;  %v569_v35 = vld [vmem:[#allocation2 + $0x44] sm:$0xf]  ;;  %562 = vst [vmem:[#allocation2 + $0x20] sm:$0xf] %v561_v32 }
  0x18   : > { %565 = vst [vmem:[#allocation2 + $0x2c] sm:$0xf] %v564_v33  ;;  %v567_v36 = vsel %vm6018_vm6, 0, %v566_v34  ;;  %v570_v37 = vsel %vm6018_vm6, 0, %v569_v35  ;;  %v572_v38 = vld [vmem:[#allocation2 + $0x50] sm:$0xf] }
  0x19   : > { %v575_v39 = vld [vmem:[#allocation2 + $0x5c] sm:$0xf]  ;;  %568 = vst [vmem:[#allocation2 + $0x38] sm:$0xf] %v567_v36  ;;  %571 = vst [vmem:[#allocation2 + $0x44] sm:$0xf] %v570_v37 }
  0x1a   : > { %v573_v40 = vsel %vm6018_vm6, 0, %v572_v38  ;;  %v576_v41 = vsel %vm6018_vm6, 0, %v575_v39  ;;  %v578_v42 = vld [vmem:[#allocation2 + $0x68] sm:$0xf]  ;;  %v581_v43 = vld [vmem:[#allocation2 + $0x74] sm:$0xf] }
  0x1b   : > { %574 = vst [vmem:[#allocation2 + $0x50] sm:$0xf] %v573_v40  ;;  %577 = vst [vmem:[#allocation2 + $0x5c] sm:$0xf] %v576_v41  ;;  %v579_v45 = vsel %vm6018_vm6, 0, %v578_v42  ;;  %v582_v46 = vsel %vm6018_vm6, 0, %v581_v43 }
  0x1c   : > { %v584_v47 = vld [vmem:[#allocation2 + $0x80] sm:$0xf]  ;;  %v587_v48 = vld [vmem:[#allocation2 + $0x8c] sm:$0xf]  ;;  %580 = vst [vmem:[#allocation2 + $0x68] sm:$0xf] %v579_v45 }
  0x1d   : > { %583 = vst [vmem:[#allocation2 + $0x74] sm:$0xf] %v582_v46  ;;  %v585_v49 = vsel %vm6018_vm6, 0, %v584_v47  ;;  %v588_v50 = vsel %vm6018_vm6, 0, %v587_v48  ;;  %v592_v51 = vld [vmem:[#allocation3] sm:$0x1] }
  0x1e   : > { %v595_v52 = vld [vmem:[#allocation3 + $0xc] sm:$0x1]  ;;  %586 = vst [vmem:[#allocation2 + $0x80] sm:$0xf] %v585_v49  ;;  %589 = vst [vmem:[#allocation2 + $0x8c] sm:$0xf] %v588_v50 }
  0x1f   : > { %v593_v53 = vsel %vm6048_vm8, 0, %v592_v51  ;;  %v596_v54 = vsel %vm6048_vm8, 0, %v595_v52  ;;  %v598_v55 = vld [vmem:[#allocation3 + $0x18] sm:$0x1]  ;;  %v601_v56 = vld [vmem:[#allocation3 + $0x24] sm:$0x1] }
  0x20   : > { %594 = vst [vmem:[#allocation3] sm:$0x1] %v593_v53  ;;  %597 = vst [vmem:[#allocation3 + $0xc] sm:$0x1] %v596_v54  ;;  %v599_v57 = vsel %vm6048_vm8, 0, %v598_v55  ;;  %v602_v58 = vsel %vm6048_vm8, 0, %v601_v56 }
  0x21   : > { %v604_v59 = vld [vmem:[#allocation3 + $0x30] sm:$0x1]  ;;  %v607_v60 = vld [vmem:[#allocation3 + $0x3c] sm:$0x1]  ;;  %600 = vst [vmem:[#allocation3 + $0x18] sm:$0x1] %v599_v57 }
  0x22   : > { %603 = vst [vmem:[#allocation3 + $0x24] sm:$0x1] %v602_v58  ;;  %v605_v61 = vsel %vm6048_vm8, 0, %v604_v59  ;;  %v608_v62 = vsel %vm6048_vm8, 0, %v607_v60  ;;  %v610_v63 = vld [vmem:[#allocation3 + $0x48] sm:$0x1] }
  0x23   : > { %v613_v0 = vld [vmem:[#allocation3 + $0x54] sm:$0x1]  ;;  %606 = vst [vmem:[#allocation3 + $0x30] sm:$0x1] %v605_v61  ;;  %609 = vst [vmem:[#allocation3 + $0x3c] sm:$0x1] %v608_v62 }
  0x24   : > { %v611_v3 = vsel %vm6048_vm8, 0, %v610_v63  ;;  %v614_v4 = vsel %vm6048_vm8, 0, %v613_v0  ;;  %v616_v5 = vld [vmem:[#allocation3 + $0x60] sm:$0x1]  ;;  %v619_v6 = vld [vmem:[#allocation3 + $0x6c] sm:$0x1] }
  0x25   : > { %612 = vst [vmem:[#allocation3 + $0x48] sm:$0x1] %v611_v3  ;;  %615 = vst [vmem:[#allocation3 + $0x54] sm:$0x1] %v614_v4  ;;  %v617_v7 = vsel %vm6048_vm8, 0, %v616_v5  ;;  %v620_v8 = vsel %vm6048_vm8, 0, %v619_v6 }
  0x26   : > { %v624_v9 = vld [vmem:[#allocation3 + $0x8] sm:$0xf]  ;;  %v627_v10 = vld [vmem:[#allocation3 + $0x14] sm:$0xf]  ;;  %618 = vst [vmem:[#allocation3 + $0x60] sm:$0x1] %v617_v7 }
  0x27   : > { %621 = vst [vmem:[#allocation3 + $0x6c] sm:$0x1] %v620_v8  ;;  %v625_v11 = vsel %vm6074_vm9, 0, %v624_v9  ;;  %v628_v12 = vsel %vm6074_vm9, 0, %v627_v10  ;;  %v630_v13 = vld [vmem:[#allocation3 + $0x20] sm:$0xf] }
  0x28   : > { %v633_v14 = vld [vmem:[#allocation3 + $0x2c] sm:$0xf]  ;;  %626 = vst [vmem:[#allocation3 + $0x8] sm:$0xf] %v625_v11  ;;  %629 = vst [vmem:[#allocation3 + $0x14] sm:$0xf] %v628_v12 }
  0x29   : > { %v631_v15 = vsel %vm6074_vm9, 0, %v630_v13  ;;  %v634_v16 = vsel %vm6074_vm9, 0, %v633_v14  ;;  %v636_v17 = vld [vmem:[#allocation3 + $0x38] sm:$0xf]  ;;  %v639_v18 = vld [vmem:[#allocation3 + $0x44] sm:$0xf] }
  0x2a   : > { %632 = vst [vmem:[#allocation3 + $0x20] sm:$0xf] %v631_v15  ;;  %635 = vst [vmem:[#allocation3 + $0x2c] sm:$0xf] %v634_v16  ;;  %v637_v20 = vsel %vm6074_vm9, 0, %v636_v17  ;;  %v640_v21 = vsel %vm6074_vm9, 0, %v639_v18 }
  0x2b   : > { %v642_v22 = vld [vmem:[#allocation3 + $0x50] sm:$0xf]  ;;  %v645_v23 = vld [vmem:[#allocation3 + $0x5c] sm:$0xf]  ;;  %638 = vst [vmem:[#allocation3 + $0x38] sm:$0xf] %v637_v20 }
  0x2c   : > { %641 = vst [vmem:[#allocation3 + $0x44] sm:$0xf] %v640_v21  ;;  %v643_v24 = vsel %vm6074_vm9, 0, %v642_v22  ;;  %v646_v25 = vsel %vm6074_vm9, 0, %v645_v23  ;;  %v648_v26 = vld [vmem:[#allocation3 + $0x68] sm:$0xf] }
  0x2d   : > { %v651_v27 = vld [vmem:[#allocation3 + $0x74] sm:$0xf]  ;;  %644 = vst [vmem:[#allocation3 + $0x50] sm:$0xf] %v643_v24  ;;  %647 = vst [vmem:[#allocation3 + $0x5c] sm:$0xf] %v646_v25 }
  0x2e   : > { %v649_v28 = vsel %vm6074_vm9, 0, %v648_v26  ;;  %v652_v29 = vsel %vm6074_vm9, 0, %v651_v27  ;;  %s5266_s16 = sshll.u32 %s5877_s30, 3  ;;  %p452_p5 = scmp.lt.s32.totalorder %s5881_s10, 1  ;;  %vm718_vm10 = vsmask.f32 4368 }
  0x2f   : > { %650 = vst [vmem:[#allocation3 + $0x68] sm:$0xf] %v649_v28  ;;  %653 = vst [vmem:[#allocation3 + $0x74] sm:$0xf] %v652_v29  ;;  %p454_p6 = scmp.lt.s32.totalorder %s5266_s16, 15  ;;  %s5270_s17 = sshll.u32 %s5877_s30, 2 }
  0x30   : > { %s7943_s10 = smov (!%p452_p5, %s5881_s10), 1  ;;  %s5271_s19 = sadd.s32 4294967295, %s5270_s17  ;;  %v881_v47 = vld [vmem:[#allocation2 + $0x18] sm:$0xf]  ;;  %v886_v48 = vld [vmem:[#allocation2 + $0x20] sm:$0x1]  ;;  %vm6137_vm11 = vmor %vm513_vm1, %vm718_vm10 }
  0x31   : > { %s7945_s16 = smov (!%p454_p6, %s5266_s16), 15  ;;  %s6110_s18 = sshll.u32 %s7943_s10, 5  ;;  %v889_v4 = vld [vmem:[#allocation2 + $0x24] sm:$0xf]  ;;  %v893_v5 = vld [vmem:[#allocation2 + $0x2c] sm:$0x1] }
  0x32   : > { %s5267_s20 = sshll.u32 %s7945_s16, 1  ;;  %p464_p7 = scmp.gt.s32.totalorder %s5271_s19, 0  ;;  %v896_v22 = vld [vmem:[#allocation2 + $0x30] sm:$0xf]  ;;  %v900_v26 = vld [vmem:[#allocation2 + $0x38] sm:$0x1] }
  0x33   : > { %s458_s21 = sadd.s32 %s6110_s18, %s5267_s20  ;;  %s6131_s29 = sadd.s32 4, %s5270_s17 }
  0x34   : > { %s5269_s22 = sshll.u32 %s458_s21, 3  ;;  %s7947_s19 = smov (!%p464_p7, %s5271_s19), 0 }
  0x35   : > { %s6116_s25 = scalar_lea.vmem %s7907_s0, %s5269_s22  ;;  %s6121_s28 = scalar_lea.vmem %s7916_s9, %s5269_s22 }
  0x36   : > { %v654_v30 = vld [vmem:[%s6116_s25] sm:$0xff]  ;;  %v655_v31 = vld [vmem:[%s6116_s25 + $0x8] sm:$0xff]  ;;  %v656_v32 = vld [vmem:[%s6116_s25 + $0x10] sm:$0xff]  ;;  %s5272_s10 = sshll.u32 %s7947_s19, 1  ;;  %p483_p8 = scmp.lt.s32.totalorder %s6131_s29, 7 }
  0x37   : > { %v5587_v33 = vpack.c.bf16 %v654_v30, %v654_v30  ;;  %v5588_v34 = vpack.c.bf16 %v655_v31, %v655_v31  ;;  %v5589_v35 = vpack.c.bf16 %v656_v32, %v656_v32  ;;  %v657_v36 = vld [vmem:[%s6116_s25 + $0x18] sm:$0xff]  ;;  %v658_v37 = vld [vmem:[%s6116_s25 + $0x20] sm:$0xff]  ;;  %v659_v38 = vld [vmem:[%s6116_s25 + $0x28] sm:$0xff]  ;;  %p469_p9 = scmp.lt.s32.totalorder %s5272_s10, 15  ;;  %p5309_p11 = scmp.ne.s32.totalorder %s5877_s30, 0 }
  0x38   : > { %v5590_v39 = vpack.c.bf16 %v657_v36, %v657_v36  ;;  %v5591_v40 = vpack.c.bf16 %v658_v37, %v658_v37  ;;  %v5592_v41 = vpack.c.bf16 %v659_v38, %v659_v38  ;;  %v660_v10 = vld [vmem:[%s6116_s25 + $0x30] sm:$0xff]  ;;  %v661_v11 = vld [vmem:[%s6116_s25 + $0x38] sm:$0xff]  ;;  %v662_v16 = vld [vmem:[%s6116_s25 + $0x40] sm:$0xff]  ;;  %s7951_s29 = smov (!%p483_p8, %s6131_s29), 7  ;;  %v5895_v19 = vmov (!%p5309_p11), 0  }
  0x39   : > { %v721_v42 = vshrl.u32 %v5587_v33, 16  ;;  %v724_v43 = vshll.u32 %v5587_v33, 16  ;;  %v729_v45 = vshrl.u32 %v5588_v34, 16  ;;  %v732_v46 = vshll.u32 %v5588_v34, 16  ;;  %s7949_s10 = smov (!%p469_p9, %s5272_s10), 15  ;;  %v663_v17 = vld [vmem:[%s6116_s25 + $0x48] sm:$0xff] }
  0x3a   : > { %v738_v49 = vshrl.u32 %v5589_v35, 16  ;;  %v741_v50 = vshll.u32 %v5589_v35, 16  ;;  %v746_v51 = vshrl.u32 %v5590_v39, 16  ;;  %v749_v52 = vshll.u32 %v5590_v39, 16  ;;  %s5277_s16 = sshll.u32 %s7951_s29, 1  ;;  %v664_v37 = vld [vmem:[%s6116_s25 + $0x50] sm:$0xff] }
  0x3b   : > { %v723_v53 = vrot.slane %v721_v42, 7  ;;  %v731_v54 = vrot.slane %v729_v45, 7  ;;  %v755_v55 = vshrl.u32 %v5591_v40, 16  ;;  %v758_v56 = vshll.u32 %v5591_v40, 16  ;;  %p6171_p10 = scmp.lt.s32.totalorder %s5277_s16, 15  ;;  %v665_v38 = vld [vmem:[%s6116_s25 + $0x58] sm:$0xff] }
  0x3c   : > { %v740_v58 = vrot.slane %v738_v49, 7  ;;  %v748_v59 = vrot.slane %v746_v51, 7  ;;  %v763_v60 = vshrl.u32 %v5592_v41, 16  ;;  %v766_v61 = vshll.u32 %v5592_v41, 16  ;;  %s5273_s19 = sshll.u32 %s7949_s10, 1 }
  0x3d   : > { %v726_v62 = vor.u32 %v724_v43, %v723_v53  ;;  %v727_v63 = vrot.slane %v723_v53, 4  ;;  %v734_v0 = vor.u32 %v732_v46, %v731_v54  ;;  %v736_v3 = vrot.slane %v731_v54, 4  ;;  %s7953_s16 = smov (!%p6171_p10, %s5277_s16), 15  ;;  %v907_v49 = vld [vmem:[#allocation2 + $0x44] sm:$0x1]  ;;  %s6190_s20 = sadd.s32 %s5273_s19, %s6110_s18 }
  0x3e   : > { %v743_v6 = vor.u32 %v741_v50, %v740_v58  ;;  %v744_v7 = vrot.slane %v740_v58, 4  ;;  %v751_v8 = vor.u32 %v749_v52, %v748_v59  ;;  %v753_v9 = vrot.slane %v748_v59, 4  ;;  %v910_v59 = vld [vmem:[#allocation2 + $0x48] sm:$0xf]  ;;  %s5275_s21 = sshll.u32 %s6190_s20, 3  ;;  %s5278_s22 = sshll.u32 %s7953_s16, 1 }
  0x3f   : > { %v882_v12 = vsel %vm6018_vm6, %v726_v62, %v881_v47  ;;  %v735_v13 = vsel %vm6137_vm11, %v727_v63, %v734_v0  ;;  %v887_v14 = vsel %vm5996_vm2, %v736_v3, %v886_v48  ;;  %v757_v15 = vrot.slane %v755_v55, 7  ;;  %v903_v48 = vld [vmem:[#allocation2 + $0x3c] sm:$0xf]  ;;  %v666_v0 = vld [vmem:[%s6116_s25 + $0x60] sm:$0xff]  ;;  %v667_v3 = vld [vmem:[%s6116_s25 + $0x68] sm:$0xff]  ;;  %s6214_s26 = scalar_lea.vmem %s7908_s1, %s5275_s21  ;;  %s6217_s27 = sadd.s32 %s5278_s22, %s6110_s18 }
  0x40   : > { %883 = vst [vmem:[#allocation2 + $0x18] sm:$0xf] %v882_v12  ;;  %885 = vst.msk [vmem:[#allocation2 + $0x1c] sm:$0xf] %vm551_vm4, %v735_v13  ;;  %v890_v18 = vsel %vm6018_vm6, %v743_v6, %v889_v4  ;;  %v752_v20 = vsel %vm6137_vm11, %v744_v7, %v751_v8  ;;  %v894_v21 = vsel %vm5996_vm2, %v753_v9, %v893_v5  ;;  %v765_v23 = vrot.slane %v763_v60, 7  ;;  %s5280_s18 = sshll.u32 %s6217_s27, 3 }
  0x41   : > { %888 = vst [vmem:[#allocation2 + $0x20] sm:$0x1] %v887_v14  ;;  %891 = vst [vmem:[#allocation2 + $0x24] sm:$0xf] %v890_v18  ;;  %v760_v24 = vor.u32 %v758_v56, %v757_v15  ;;  %v761_v25 = vrot.slane %v757_v15, 4  ;;  %v5593_v27 = vpack.c.bf16 %v660_v10, %v660_v10  ;;  %v5594_v28 = vpack.c.bf16 %v661_v11, %v661_v11  ;;  %v668_v18 = vld [vmem:[%s6116_s25 + $0x70] sm:$0xff]  ;;  %s6234_s10 = scalar_lea.vmem %s7909_s2, %s5280_s18 }
  0x42   : > { %892 = vst.msk [vmem:[#allocation2 + $0x28] sm:$0xf] %vm551_vm4, %v752_v20  ;;  %895 = vst [vmem:[#allocation2 + $0x2c] sm:$0x1] %v894_v21  ;;  %v768_v29 = vor.u32 %v766_v61, %v765_v23  ;;  %v770_v30 = vrot.slane %v765_v23, 4  ;;  %v5595_v31 = vpack.c.bf16 %v662_v16, %v662_v16  ;;  %v5596_v32 = vpack.c.bf16 %v663_v17, %v663_v17  ;;  %v669_v20 = vld [vmem:[%s6116_s25 + $0x78] sm:$0xff] }
  0x43   : > { %v897_v33 = vsel %vm6018_vm6, %v760_v24, %v896_v22  ;;  %v772_v34 = vshrl.u32 %v5593_v27, 16  ;;  %v775_v35 = vshll.u32 %v5593_v27, 16  ;;  %v780_v36 = vshrl.u32 %v5594_v28, 16  ;;  %v914_v7 = vld [vmem:[#allocation2 + $0x50] sm:$0x1] }
  0x44   : > { %898 = vst [vmem:[#allocation2 + $0x30] sm:$0xf] %v897_v33  ;;  %v769_v39 = vsel %vm6137_vm11, %v761_v25, %v768_v29  ;;  %v901_v40 = vsel %vm5996_vm2, %v770_v30, %v900_v26  ;;  %v783_v41 = vshll.u32 %v5594_v28, 16  ;;  %v789_v42 = vshrl.u32 %v5595_v31, 16  ;;  %v917_v13 = vld [vmem:[#allocation2 + $0x54] sm:$0xf] }
  0x45   : > { %899 = vst.msk [vmem:[#allocation2 + $0x34] sm:$0xf] %vm551_vm4, %v769_v39  ;;  %902 = vst [vmem:[#allocation2 + $0x38] sm:$0x1] %v901_v40  ;;  %v774_v43 = vrot.slane %v772_v34, 7  ;;  %v782_v45 = vrot.slane %v780_v36, 7  ;;  %v5597_v52 = vpack.c.bf16 %v664_v37, %v664_v37  ;;  %v5598_v53 = vpack.c.bf16 %v665_v38, %v665_v38 }
  0x46   : > { %v792_v46 = vshll.u32 %v5595_v31, 16  ;;  %v797_v47 = vshrl.u32 %v5596_v32, 16  ;;  %v791_v50 = vrot.slane %v789_v42, 7  ;;  %v800_v51 = vshll.u32 %v5596_v32, 16  ;;  %v921_v30 = vld [vmem:[#allocation2 + $0x5c] sm:$0x1] }
  0x47   : > { %v777_v54 = vor.u32 %v775_v35, %v774_v43  ;;  %v778_v55 = vrot.slane %v774_v43, 4  ;;  %v785_v56 = vor.u32 %v783_v41, %v782_v45  ;;  %v787_v58 = vrot.slane %v782_v45, 4  ;;  %v924_v31 = vld [vmem:[#allocation2 + $0x60] sm:$0xf]  ;;  %v939_v45 = vld [vmem:[%s6214_s26 + $0x8] sm:$0xff] }
  0x48   : > { %v794_v60 = vor.u32 %v792_v46, %v791_v50  ;;  %v795_v61 = vrot.slane %v791_v50, 4  ;;  %v799_v62 = vrot.slane %v797_v47, 7  ;;  %v806_v63 = vshrl.u32 %v5597_v52, 16  ;;  %v938_v39 = vld [vmem:[%s6214_s26] sm:$0xff]  ;;  %v940_v46 = vld [vmem:[%s6214_s26 + $0x10] sm:$0xff] }
  0x49   : > { %v904_v4 = vsel %vm6018_vm6, %v777_v54, %v903_v48  ;;  %v786_v5 = vsel %vm6137_vm11, %v778_v55, %v785_v56  ;;  %v908_v6 = vsel %vm5996_vm2, %v787_v58, %v907_v49  ;;  %v809_v8 = vshll.u32 %v5597_v52, 16  ;;  %v931_v58 = vld [vmem:[#allocation2 + $0x6c] sm:$0xf] }
  0x4a   : > { %905 = vst [vmem:[#allocation2 + $0x3c] sm:$0xf] %v904_v4  ;;  %906 = vst.msk [vmem:[#allocation2 + $0x40] sm:$0xf] %vm551_vm4, %v786_v5  ;;  %v911_v9 = vsel %vm6018_vm6, %v794_v60, %v910_v59  ;;  %v802_v10 = vor.u32 %v800_v51, %v799_v62  ;;  %v804_v11 = vrot.slane %v799_v62, 4  ;;  %v808_v12 = vrot.slane %v806_v63, 7 }
  0x4b   : > { %909 = vst [vmem:[#allocation2 + $0x44] sm:$0x1] %v908_v6  ;;  %912 = vst [vmem:[#allocation2 + $0x48] sm:$0xf] %v911_v9  ;;  %v814_v14 = vshrl.u32 %v5598_v53, 16  ;;  %v817_v15 = vshll.u32 %v5598_v53, 16  ;;  %v5599_v16 = vpack.c.bf16 %v666_v0, %v666_v0  ;;  %v5600_v17 = vpack.c.bf16 %v667_v3, %v667_v3 }
  0x4c   : > { %v803_v21 = vsel %vm6137_vm11, %v795_v61, %v802_v10  ;;  %v915_v22 = vsel %vm5996_vm2, %v804_v11, %v914_v7  ;;  %v811_v23 = vor.u32 %v809_v8, %v808_v12  ;;  %v812_v24 = vrot.slane %v808_v12, 4  ;;  %v928_v51 = vld [vmem:[#allocation2 + $0x68] sm:$0x1]  ;;  %v935_v4 = vld [vmem:[#allocation2 + $0x74] sm:$0x1]  ;;  %v941_v9 = vld [vmem:[%s6214_s26 + $0x18] sm:$0xff] }
  0x4d   : > { %913 = vst.msk [vmem:[#allocation2 + $0x4c] sm:$0xf] %vm551_vm4, %v803_v21  ;;  %916 = vst [vmem:[#allocation2 + $0x50] sm:$0x1] %v915_v22  ;;  %v816_v25 = vrot.slane %v814_v14, 7  ;;  %v823_v26 = vshrl.u32 %v5599_v16, 16  ;;  %v5601_v33 = vpack.c.bf16 %v668_v18, %v668_v18  ;;  %v5602_v34 = vpack.c.bf16 %v669_v20, %v669_v20 }
  0x4e   : > { %v826_v27 = vshll.u32 %v5599_v16, 16  ;;  %v831_v28 = vshrl.u32 %v5600_v17, 16  ;;  %v918_v29 = vsel %vm6018_vm6, %v811_v23, %v917_v13  ;;  %v834_v32 = vshll.u32 %v5600_v17, 16  ;;  %v1008_v10 = vld [vmem:[%s6234_s10] sm:$0xff]  ;;  %v1010_v21 = vld [vmem:[%s6234_s10 + $0x10] sm:$0xff] }
  0x4f   : > { %919 = vst [vmem:[#allocation2 + $0x54] sm:$0xf] %v918_v29  ;;  %v819_v35 = vor.u32 %v817_v15, %v816_v25  ;;  %v821_v36 = vrot.slane %v816_v25, 4  ;;  %v825_v37 = vrot.slane %v823_v26, 7  ;;  %v840_v40 = vshrl.u32 %v5601_v33, 16  ;;  %v1009_v15 = vld [vmem:[%s6234_s10 + $0x8] sm:$0xff] }
  0x50   : > { %v833_v38 = vrot.slane %v831_v28, 7  ;;  %v843_v41 = vshll.u32 %v5601_v33, 16  ;;  %v848_v42 = vshrl.u32 %v5602_v34, 16  ;;  %v851_v43 = vshll.u32 %v5602_v34, 16  ;;  %v994_v22 = vld [vmem:[#allocation2] sm:$0xf] }
  0x51   : > { %v820_v47 = vsel %vm6137_vm11, %v812_v24, %v819_v35  ;;  %v922_v48 = vsel %vm5996_vm2, %v821_v36, %v921_v30  ;;  %v828_v49 = vor.u32 %v826_v27, %v825_v37  ;;  %v829_v50 = vrot.slane %v825_v37, 4  ;;  %v998_v29 = vld [vmem:[#allocation2 + $0x8] sm:$0x1]  ;;  %v1001_v30 = vld [vmem:[#allocation2 + $0xc] sm:$0xf] }
  0x52   : > { %920 = vst.msk [vmem:[#allocation2 + $0x58] sm:$0xf] %vm551_vm4, %v820_v47  ;;  %923 = vst [vmem:[#allocation2 + $0x5c] sm:$0x1] %v922_v48  ;;  %v836_v52 = vor.u32 %v834_v32, %v833_v38  ;;  %v838_v53 = vrot.slane %v833_v38, 4  ;;  %v842_v54 = vrot.slane %v840_v40, 7  ;;  %v5603_v59 = vpack.c.bf16 %v938_v39, %v938_v39 }
  0x53   : > { %v850_v55 = vrot.slane %v848_v42, 7  ;;  %v925_v56 = vsel %vm6018_vm6, %v828_v49, %v924_v31  ;;  %v5604_v60 = vpack.c.bf16 %v939_v45, %v939_v45  ;;  %v5605_v61 = vpack.c.bf16 %v940_v46, %v940_v46  ;;  %v1011_v40 = vld [vmem:[%s6234_s10 + $0x18] sm:$0xff]  ;;  %v1005_v48 = vld [vmem:[#allocation2 + $0x14] sm:$0x1] }
  0x54   : > { %926 = vst [vmem:[#allocation2 + $0x60] sm:$0xf] %v925_v56  ;;  %v837_v62 = vsel %vm6137_vm11, %v829_v50, %v836_v52  ;;  %v929_v63 = vsel %vm5996_vm2, %v838_v53, %v928_v51  ;;  %v845_v0 = vor.u32 %v843_v41, %v842_v54  ;;  %v846_v3 = vrot.slane %v842_v54, 4  ;;  %v1065_v51 = vld [vmem:[#allocation2 + $0x78] sm:$0xf] }
  0x55   : > { %927 = vst.msk [vmem:[#allocation2 + $0x64] sm:$0xf] %vm551_vm4, %v837_v62  ;;  %930 = vst [vmem:[#allocation2 + $0x68] sm:$0x1] %v929_v63  ;;  %v853_v5 = vor.u32 %v851_v43, %v850_v55  ;;  %v855_v6 = vrot.slane %v850_v55, 4  ;;  %v955_v7 = vshrl.u32 %v5603_v59, 16  ;;  %v5606_v25 = vpack.c.bf16 %v941_v9, %v941_v9 }
  0x56   : > { %v958_v8 = vshll.u32 %v5603_v59, 16  ;;  %v932_v11 = vsel %vm6018_vm6, %v845_v0, %v931_v58  ;;  %v963_v12 = vshrl.u32 %v5604_v60, 16  ;;  %v966_v13 = vshll.u32 %v5604_v60, 16 }
  0x57   : > { %v972_v14 = vshrl.u32 %v5605_v61, 16  ;;  %933 = vst [vmem:[#allocation2 + $0x6c] sm:$0xf] %v932_v11  ;;  %v854_v16 = vsel %vm6137_vm11, %v846_v3, %v853_v5  ;;  %v936_v17 = vsel %vm5996_vm2, %v855_v6, %v935_v4  ;;  %v957_v18 = vrot.slane %v955_v7, 7  ;;  %v1069_v5 = vld [vmem:[#allocation2 + $0x80] sm:$0x1] }
  0x58   : > { %v975_v20 = vshll.u32 %v5605_v61, 16  ;;  %934 = vst.msk [vmem:[#allocation2 + $0x70] sm:$0xf] %vm551_vm4, %v854_v16  ;;  %937 = vst [vmem:[#allocation2 + $0x74] sm:$0x1] %v936_v17  ;;  %v965_v23 = vrot.slane %v963_v12, 7  ;;  %v5607_v26 = vpack.c.bf16 %v1008_v10, %v1008_v10  ;;  %v5608_v31 = vpack.c.bf16 %v1009_v15, %v1009_v15 }
  0x59   : > { %v974_v24 = vrot.slane %v972_v14, 7  ;;  %v960_v27 = vor.u32 %v958_v8, %v957_v18  ;;  %v961_v28 = vrot.slane %v957_v18, 4  ;;  %v5609_v35 = vpack.c.bf16 %v1010_v21, %v1010_v21  ;;  %v1072_v6 = vld [vmem:[#allocation2 + $0x84] sm:$0xf]  ;;  %v1076_v16 = vld [vmem:[#allocation2 + $0x8c] sm:$0x1] }
  0x5a   : > { %v968_v32 = vor.u32 %v966_v13, %v965_v23  ;;  %v970_v33 = vrot.slane %v965_v23, 4  ;;  %v980_v37 = vshrl.u32 %v5606_v25, 16  ;;  %v983_v38 = vshll.u32 %v5606_v25, 16 }
  0x5b   : > { %v977_v34 = vor.u32 %v975_v20, %v974_v24  ;;  %v995_v36 = vsel %vm6018_vm6, %v960_v27, %v994_v22  ;;  %v1025_v39 = vshrl.u32 %v5607_v26, 16  ;;  %v1028_v45 = vshll.u32 %v5607_v26, 16 }
  0x5c   : > { %996 = vst [vmem:[#allocation2] sm:$0xf] %v995_v36  ;;  %v969_v41 = vsel %vm6137_vm11, %v961_v28, %v968_v32  ;;  %v999_v42 = vsel %vm5996_vm2, %v970_v33, %v998_v29  ;;  %v978_v46 = vrot.slane %v974_v24, 4  ;;  %v982_v47 = vrot.slane %v980_v37, 7 }
  0x5d   : > { %v1002_v43 = vsel %vm6018_vm6, %v977_v34, %v1001_v30  ;;  %997 = vst.msk [vmem:[#allocation2 + $0x4] sm:$0xf] %vm551_vm4, %v969_v41  ;;  %1000 = vst [vmem:[#allocation2 + $0x8] sm:$0x1] %v999_v42  ;;  %v1027_v49 = vrot.slane %v1025_v39, 7  ;;  %v1033_v50 = vshrl.u32 %v5608_v31, 16  ;;  %v5610_v55 = vpack.c.bf16 %v1011_v40, %v1011_v40 }
  0x5e   : > { %1003 = vst [vmem:[#allocation2 + $0xc] sm:$0xf] %v1002_v43  ;;  %v1036_v52 = vshll.u32 %v5608_v31, 16  ;;  %v1042_v53 = vshrl.u32 %v5609_v35, 16  ;;  %v1045_v54 = vshll.u32 %v5609_v35, 16  ;;  %v985_v56 = vor.u32 %v983_v38, %v982_v47 }
  0x5f   : > { %v987_v58 = vrot.slane %v982_v47, 4  ;;  %v1030_v59 = vor.u32 %v1028_v45, %v1027_v49  ;;  %v1031_v60 = vrot.slane %v1027_v49, 4  ;;  %v1035_v61 = vrot.slane %v1033_v50, 7  ;;  %1083 = vst.msk [vmem:[#allocation2] sm:$0xf] (!%p5309_p11), %vm551_vm4, %v5895_v19 }
  0x60   : > { %v1044_v62 = vrot.slane %v1042_v53, 7  ;;  %v1050_v63 = vshrl.u32 %v5610_v55, 16  ;;  %v986_v0 = vsel %vm6137_vm11, %v978_v46, %v985_v56  ;;  %v1053_v7 = vshll.u32 %v5610_v55, 16  ;;  %1084 = vst.msk [vmem:[#allocation2 + $0x4] sm:$0xf] (!%p5309_p11), %vm551_vm4, %v5895_v19 }
  0x61   : > { %v1006_v3 = vsel %vm5996_vm2, %v987_v58, %v1005_v48  ;;  %v1066_v4 = vsel %vm6018_vm6, %v1030_v59, %v1065_v51  ;;  %1004 = vst.msk [vmem:[#allocation2 + $0x10] sm:$0xf] %vm551_vm4, %v986_v0  ;;  %v1038_v8 = vor.u32 %v1036_v52, %v1035_v61  ;;  %v1040_v9 = vrot.slane %v1035_v61, 4  ;;  %1082 = sbr.rel (%p5309_p11) target bundleno = 104 (0x68), region = 60  ;;  %1085 = vst.msk [vmem:[#allocation2 + $0x8] sm:$0xf] (!%p5309_p11), %vm551_vm4, %v5895_v19 }
  0x62   : > { %1007 = vst [vmem:[#allocation2 + $0x14] sm:$0x1] %v1006_v3  ;;  %1067 = vst [vmem:[#allocation2 + $0x78] sm:$0xf] %v1066_v4  ;;  %v1047_v10 = vor.u32 %v1045_v54, %v1044_v62  ;;  %v1048_v11 = vrot.slane %v1044_v62, 4  ;;  %v1052_v12 = vrot.slane %v1050_v63, 7 }
  0x63   : > { %v1039_v13 = vsel %vm6137_vm11, %v1031_v60, %v1038_v8  ;;  %v1070_v14 = vsel %vm5996_vm2, %v1040_v9, %v1069_v5  ;;  %1086 = vst.msk [vmem:[#allocation2 + $0xc] sm:$0xf] (!%p5309_p11), %vm551_vm4, %v5895_v19  ;;  %1087 = vst.msk [vmem:[#allocation2 + $0x10] sm:$0xf] (!%p5309_p11), %vm551_vm4, %v5895_v19 }
  0x64   : > { %v1073_v15 = vsel %vm6018_vm6, %v1047_v10, %v1072_v6  ;;  %1068 = vst.msk [vmem:[#allocation2 + $0x7c] sm:$0xf] %vm551_vm4, %v1039_v13  ;;  %1071 = vst [vmem:[#allocation2 + $0x80] sm:$0x1] %v1070_v14  ;;  %v1055_v17 = vor.u32 %v1053_v7, %v1052_v12  ;;  %v1057_v18 = vrot.slane %v1052_v12, 4 }
  0x65   : > { %1074 = vst [vmem:[#allocation2 + $0x84] sm:$0xf] %v1073_v15  ;;  %1088 = vst.msk [vmem:[#allocation2 + $0x14] sm:$0xf] (!%p5309_p11), %vm551_vm4, %v5895_v19 }
  0x66   : > { %v1056_v20 = vsel %vm6137_vm11, %v1048_v11, %v1055_v17  ;;  %v1077_v21 = vsel %vm5996_vm2, %v1057_v18, %v1076_v16 }
  0x67   : > { %1075 = vst.msk [vmem:[#allocation2 + $0x88] sm:$0xf] %vm551_vm4, %v1056_v20  ;;  %1078 = vst [vmem:[#allocation2 + $0x8c] sm:$0x1] %v1077_v21 }
  0x68 PF: > { %p5310_p12 = scmp.ne.s32.totalorder %s5877_s30, 1 }
  0x69   : > { %v5896_v1 = vmov (!%p5310_p12), 0  }
  0x6a   : > { %1092 = sbr.rel (%p5310_p12) target bundleno = 113 (0x71), region = 64  ;;  %1093 = vst.msk [vmem:[#allocation2 + $0x78] sm:$0xf] (!%p5310_p12), %vm551_vm4, %v5896_v1  ;;  %1094 = vst.msk [vmem:[#allocation2 + $0x7c] sm:$0xf] (!%p5310_p12), %vm551_vm4, %v5896_v1 }
  0x6b   : > { %1095 = vst.msk [vmem:[#allocation2 + $0x80] sm:$0xf] (!%p5310_p12), %vm551_vm4, %v5896_v1  ;;  %1096 = vst.msk [vmem:[#allocation2 + $0x84] sm:$0xf] (!%p5310_p12), %vm551_vm4, %v5896_v1 }
  0x6c   : > { %1097 = vst.msk [vmem:[#allocation2 + $0x88] sm:$0xf] (!%p5310_p12), %vm551_vm4, %v5896_v1  ;;  %1098 = vst.msk [vmem:[#allocation2 + $0x8c] sm:$0xf] (!%p5310_p12), %vm551_vm4, %v5896_v1 }
  0x71 PF: > { %v1488_v22 = vld [vmem:[#allocation2 + $0x18] sm:$0xf]  ;;  %v6301_v23 = vld [vmem:[#allocation2 + $0x1c] sm:$0xf]  ;;  %vm1412_vm12 = vcmask 1042432   ;;  %vm1413_vm13 = vcmask 1046532  }
  0x72   : > { %v1550_v24 = vshll.u32 %v6301_v23, 16  ;;  %v1554_v25 = vshrl.u32 %v6301_v23, 16  ;;  %v5372_v26 = vcombine.low %v1488_v22, %v6301_v23  ;;  %v1541_v27 = vshrl.u32 %v1488_v22, 16  ;;  %v1486_v28 = vld [vmem:[#allocation2 + $0xc] sm:$0xf]  ;;  %s5897_s16 = smov 12   ;;  %vm6318_vm14 = vmor %vm1412_vm12, %vm1413_vm13 }
  0x73   : > { %v1544_v29 = vshll.u32 %v1488_v22, 16  ;;  %v6306_v30 = vld [vmem:[#allocation2 + $0x10] sm:$0xf]  ;;  %v1517_v31 = vshrl.u32 %v1486_v28, 16  ;;  %v1520_v32 = vshll.u32 %v1486_v28, 16  ;;  %s5898_s17 = smov 8  }
  0x74   : > { %v6308_v33 = vrot.slane %v1554_v25, 4  ;;  %2428 = vrot.lane.b32.xlu1 %v5372_v26, %s5897_s16  ;;  %v1543_v34 = vrot.slane %v1541_v27, 4  ;;  %v1526_v35 = vshll.u32 %v6306_v30, 16  ;;  %v1530_v36 = vshrl.u32 %v6306_v30, 16  ;;  %v1100_v37 = vld [vmem:[#allocation2 + $0x4] sm:$0xf] }
  0x75   : > { %v1546_v38 = vrot.slane %v1544_v29, 5  ;;  %v5371_v39 = vcombine.low %v1486_v28, %v6306_v30  ;;  %v1519_v40 = vrot.slane %v1517_v31, 4  ;;  %v1522_v41 = vrot.slane %v1520_v32, 5  ;;  %v1119_v42 = vld [vmem:[#allocation2 + $0x8] sm:$0x1]  ;;  %s5899_s19 = smov 16  }
  0x76   : > { %v6314_v43 = vrot.slane %v1530_v36, 4  ;;  %v1372_v45 = vld [vmem:[#allocation2] sm:$0xe]  ;;  %v1417_v47 = vrot.slane %v1100_v37, 5  ;;  %v1420_v48 = vrot.slane %v1119_v42, 5  ;;  %v1142_v49 = vshll.u32 %v1100_v37, 16 }
  0x77   : > { %v1547_v50 = vor.u32 %v1546_v38, %v1543_v34  ;;  %2426 = vrot.lane.b32.xlu0 %v5371_v39, %s5897_s16  ;;  %v1523_v51 = vor.u32 %v1522_v41, %v1519_v40  ;;  %v5311_v52 = vrot.slane %v1372_v45, 9  ;;  %v1102_v53 = vld [vmem:[#allocation2 + $0x10] sm:$0xf]  ;;  %v1120_v54 = vld [vmem:[#allocation2 + $0x14] sm:$0x1]  ;;  %v1146_v55 = vshrl.u32 %v1100_v37, 16 }
  0x78   : > { %v1419_v56 = vrot.slane %v1417_v47, 4  ;;  %v1373_v58 = vld [vmem:[#allocation2 + $0xc] sm:$0xe]  ;;  %v1424_v59 = vrot.slane %v1102_v53, 5  ;;  %v1427_v60 = vrot.slane %v1120_v54, 5  ;;  %v1144_v61 = vrot.slane %v1142_v49, 5 }
  0x79   : > { %v1548_v62 = vrot.slane %v1547_v50, 4  ;;  %v6323_v63 = vrot.slane %v1523_v51, 4  ;;  %v1418_v0 = vsel %vm6318_vm14, %v5311_v52, %v1417_v47  ;;  %v5312_v3 = vrot.slane %v1373_v58, 9  ;;  %v1099_v4 = vld [vmem:[#allocation2] sm:$0xf]  ;;  %s5900_s20 = smov 4  }
  0x7a   : > { %v1421_v5 = vsel %vm6318_vm14, %v1419_v56, %v1420_v48  ;;  %v1426_v6 = vrot.slane %v1424_v59, 4  ;;  %vm1129_vm15 = vsmask.f32 3328  ;;  %vm1130_vm0 = vsmask.f32 7440  ;;  %s5901_s21 = smov 20  }
  0x7b   : > { %v5361_v7 = vcombine.low %v1418_v0, %v1421_v5  ;;  %v1425_v8 = vsel %vm6318_vm14, %v5312_v3, %v1424_v59  ;;  %v1133_v9 = vshrl.u32 %v1099_v4, 16  ;;  %v1136_v10 = vshll.u32 %v1099_v4, 16  ;;  %v6331_v11 = vld [vmem:[#allocation2 + $0x20] sm:$0x1]  ;;  %v1101_v16 = vld [vmem:[#allocation2 + $0xc] sm:$0xf]  ;;  %vm6337_vm1 = vmor %vm1129_vm15, %vm1130_vm0 }
  0x7c   : > { %v1428_v12 = vsel %vm6318_vm14, %v1426_v6, %v1427_v60  ;;  %v1148_v13 = vrot.slane %v1146_v55, 4  ;;  %v1152_v14 = vshll.u32 %v1119_v42, 16  ;;  %v1552_v15 = vrot.slane %v1550_v24, 5  ;;  %v1757_v41 = vld [vmem:[#allocation2 + $0x18] sm:$0xe]  ;;  %s5902_s22 = smov 24  }
  0x7d   : > { %2366 = vrot.lane.b32.xlu1 %v5361_v7, %s5898_s17  ;;  %v5362_v17 = vcombine.low %v1425_v8, %v1428_v12  ;;  %v1135_v20 = vrot.slane %v1133_v9, 4  ;;  %v1138_v21 = vrot.slane %v1136_v10, 5  ;;  %v1560_v19 = vshll.u32 %v6331_v11, 16  ;;  %v1506_v48 = vld [vmem:[#allocation2 + $0x14] sm:$0x1]  ;;  %s5903_s23 = smov 28  }
  0x7e   : > { %v1149_v1 = vor.u32 %v1148_v13, %v1144_v61  ;;  %v1154_v22 = vrot.slane %v1152_v14, 5  ;;  %v1553_v25 = vsel %vm6337_vm1, %v1548_v62, %v1552_v15  ;;  %v1557_v24 = vor.u32 %v6308_v33, %v1552_v15  ;;  %v6360_v5 = vld [vmem:[#allocation2 + $0x28] sm:$0xf]  ;;  %v1756_v9 = vld [vmem:[#allocation2 + $0xc] sm:$0xe]  ;;  %s5904_s27 = smov 32  }
  0x7f   : > { %v1139_v26 = vor.u32 %v1138_v21, %v1135_v20  ;;  %v1562_v27 = vrot.slane %v1560_v19, 5  ;;  %v1157_v28 = vshrl.u32 %v1101_v16, 16  ;;  %v1160_v29 = vshll.u32 %v1101_v16, 16  ;;  %v6373_v20 = vld [vmem:[#allocation2 + $0x2c] sm:$0x1] }
  0x80   : > { %v1150_v31 = vrot.slane %v1149_v1, 4  ;;  %v1558_v32 = vrot.slane %v1557_v24, 4  ;;  %v1166_v34 = vshll.u32 %v1102_v53, 16  ;;  %v1170_v36 = vshrl.u32 %v1102_v53, 16  ;;  %v1868_v53 = vld [vmem:[#allocation2 + $0x24] sm:$0xf] }
  0x81   : > { %2368 = vrot.lane.b32.xlu1 %v5362_v17, %s5898_s17  ;;  %v1140_v37 = vrot.slane %v1139_v26, 4  ;;  %v1159_v38 = vrot.slane %v1157_v28, 4  ;;  %v1162_v39 = vrot.slane %v1160_v29, 5  ;;  %v1176_v40 = vshll.u32 %v1120_v54, 16  ;;  %v6377_v1 = vld [vmem:[#allocation2 + $0x18] sm:$0xf] }
  0x82   : > { %v1155_v42 = vsel %vm6337_vm1, %v1150_v31, %v1154_v22  ;;  %v1563_v33 = vsel %vm6337_vm1, %v1558_v32, %v1562_v27  ;;  %v1168_v45 = vrot.slane %v1166_v34, 5  ;;  %v1172_v47 = vrot.slane %v1170_v36, 4  ;;  %v6384_v27 = vld [vmem:[#allocation2 + $0x1c] sm:$0xf] }
  0x83   : > { %v1145_v49 = vsel %vm6337_vm1, %v1140_v37, %v1144_v61  ;;  %v5382_v50 = vcombine.low %v1553_v25, %v1563_v33  ;;  %v1163_v51 = vor.u32 %v1162_v39, %v1159_v38  ;;  %v1178_v52 = vrot.slane %v1176_v40, 5  ;;  %v1103_v38 = vld [vmem:[#allocation2 + $0x18] sm:$0xf]  ;;  %v6396_v33 = vld [vmem:[#allocation2 + $0x1c] sm:$0xf] }
  0x84   : > { %v5351_v55 = vcombine.low %v1145_v49, %v1155_v42  ;;  %v1173_v56 = vor.u32 %v1172_v47, %v1168_v45  ;;  %v5322_v54 = vrot.slane %v1757_v41, 9  ;;  %v1805_v58 = vrot.slane %v6301_v23, 5 }
  0x85   : > { %2478 = vrot.lane.b32.xlu1 %v5382_v50, %s5899_s19  ;;  %v1164_v59 = vrot.slane %v1163_v51, 4  ;;  %v1808_v60 = vrot.slane %v6331_v11, 5  ;;  %v1528_v62 = vrot.slane %v1526_v35, 5  ;;  %v1536_v0 = vshll.u32 %v1506_v48, 16 }
  0x86   : > { %2316 = vrot.lane.b32.xlu0 %v5351_v55, %s5900_s20  ;;  %v1174_v61 = vrot.slane %v1173_v56, 4  ;;  %v1806_v3 = vsel %vm6318_vm14, %v5322_v54, %v1805_v58  ;;  %v1807_v4 = vrot.slane %v1805_v58, 4  ;;  %v1921_v23 = vshrl.u32 %v1868_v53, 16 }
  0x87   : > { %v1169_v6 = vsel %vm6337_vm1, %v1164_v59, %v1168_v45  ;;  %v1529_v7 = vsel %vm6337_vm1, %v6323_v63, %v1528_v62  ;;  %v1533_v35 = vor.u32 %v6314_v43, %v1528_v62  ;;  %v1538_v8 = vrot.slane %v1536_v0, 5  ;;  %v6398_v45 = vld [vmem:[#allocation2 + $0x20] sm:$0x1] }
  0x88   : > { %v1179_v10 = vsel %vm6337_vm1, %v1174_v61, %v1178_v52  ;;  %v1809_v11 = vsel %vm6318_vm14, %v1807_v4, %v1808_v60  ;;  %v1923_v12 = vrot.slane %v1921_v23, 4  ;;  %v1924_v13 = vshll.u32 %v1868_v53, 16  ;;  %v6407_v60 = vld [vmem:[#allocation2 + $0x20] sm:$0x1]  ;;  %v1105_v4 = vld [vmem:[#allocation2 + $0x24] sm:$0xf] }
  0x89   : > { %v5352_v14 = vcombine.low %v1169_v6, %v1179_v10  ;;  %v5392_v15 = vcombine.low %v1806_v3, %v1809_v11  ;;  %v1534_v16 = vrot.slane %v1533_v35, 4  ;;  %v1934_v17 = vshrl.u32 %v6360_v5, 16 }
  0x8a   : > { %v1926_v63 = vrot.slane %v1924_v13, 5  ;;  %v5402_v43 = vcombine.low %v1868_v53, %v6360_v5  ;;  %v5321_v21 = vrot.slane %v1756_v9, 9  ;;  %v1798_v19 = vrot.slane %v6306_v30, 5 }
  0x8b   : > { %2318 = vrot.lane.b32.xlu0 %v5352_v14, %s5900_s20  ;;  %2528 = vrot.lane.b32.xlu1 %v5392_v15, %s5901_s21  ;;  %v1539_v22 = vsel %vm6337_vm1, %v1534_v16, %v1538_v8  ;;  %v1801_v25 = vrot.slane %v1506_v48, 5  ;;  %v1930_v24 = vshll.u32 %v6360_v5, 16  ;;  %v1936_v26 = vrot.slane %v1934_v17, 4  ;;  %v1106_v8 = vld [vmem:[#allocation2 + $0x28] sm:$0xf] }
  0x8c   : > { %v5381_v28 = vcombine.low %v1529_v7, %v1539_v22  ;;  %v1799_v30 = vsel %vm6318_vm14, %v5321_v21, %v1798_v19  ;;  %v1800_v29 = vrot.slane %v1798_v19, 4  ;;  %v1927_v31 = vor.u32 %v1926_v63, %v1923_v12  ;;  %v1122_v16 = vld [vmem:[#allocation2 + $0x2c] sm:$0x1] }
  0x8d   : > { %v1932_v32 = vrot.slane %v1930_v24, 5  ;;  %v1940_v34 = vshll.u32 %v6373_v20, 16  ;;  %v1897_v36 = vshrl.u32 %v6377_v1, 16  ;;  %v1900_v37 = vshll.u32 %v6377_v1, 16 }
  0x8e   : > { %v1802_v39 = vsel %vm6318_vm14, %v1800_v29, %v1801_v25  ;;  %v1928_v40 = vrot.slane %v1927_v31, 4  ;;  %v1910_v41 = vshrl.u32 %v6384_v27, 16  ;;  %v5401_v42 = vcombine.low %v6377_v1, %v6384_v27  ;;  %v2136_v1 = vld [vmem:[#allocation2 + $0x18] sm:$0xe] }
  0x8f   : > { %2476 = vrot.lane.b32.xlu0 %v5381_v28, %s5899_s19  ;;  %2588 = vrot.lane.b32.xlu1 %v5402_v43, %s5902_s22  ;;  %v5391_v47 = vcombine.low %v1799_v30, %v1802_v39  ;;  %v1937_v48 = vor.u32 %v1936_v26, %v1932_v32  ;;  %v1942_v49 = vrot.slane %v1940_v34, 5  ;;  %v1899_v50 = vrot.slane %v1897_v36, 4 }
  0x90   : > { %v1933_v51 = vsel %vm6337_vm1, %v1928_v40, %v1932_v32  ;;  %v1902_v52 = vrot.slane %v1900_v37, 5  ;;  %v1181_v53 = vshrl.u32 %v1103_v38, 16  ;;  %v1184_v55 = vshll.u32 %v1103_v38, 16  ;;  %v1375_v32 = vld [vmem:[#allocation2 + $0x24] sm:$0xe] }
  0x91   : > { %v1938_v56 = vrot.slane %v1937_v48, 4  ;;  %v1190_v54 = vshll.u32 %v6396_v33, 16  ;;  %v1194_v58 = vshrl.u32 %v6396_v33, 16  ;;  %v1200_v59 = vshll.u32 %v6398_v45, 16 }
  0x92   : > { %v1183_v62 = vrot.slane %v1181_v53, 4  ;;  %v1186_v0 = vrot.slane %v1184_v55, 5  ;;  %v1903_v61 = vor.u32 %v1902_v52, %v1899_v50  ;;  %v1906_v3 = vshll.u32 %v6384_v27, 16 }
  0x93   : > { %2526 = vrot.lane.b32.xlu0 %v5391_v47, %s5901_s21  ;;  %v1943_v23 = vsel %vm6337_vm1, %v1938_v56, %v1942_v49  ;;  %v1192_v6 = vrot.slane %v1190_v54, 5  ;;  %v1196_v7 = vrot.slane %v1194_v58, 4  ;;  %v1202_v35 = vrot.slane %v1200_v59, 5  ;;  %v2137_v47 = vld [vmem:[#allocation2 + $0x24] sm:$0xe] }
  0x94   : > { %v5412_v9 = vcombine.low %v1933_v51, %v1943_v23  ;;  %v1187_v10 = vor.u32 %v1186_v0, %v1183_v62  ;;  %v1904_v11 = vrot.slane %v1903_v61, 4  ;;  %v1908_v12 = vrot.slane %v1906_v3, 5  ;;  %v6429_v54 = vld [vmem:[#allocation2 + $0x30] sm:$0xf] }
  0x95   : > { %v1197_v13 = vor.u32 %v1196_v7, %v1192_v6  ;;  %v1912_v14 = vrot.slane %v1910_v41, 4  ;;  %v1916_v15 = vshll.u32 %v6407_v60, 16  ;;  %v1205_v17 = vshrl.u32 %v1105_v4, 16 }
  0x96   : > { %2638 = vrot.lane.b32.xlu1 %v5412_v9, %s5903_s23  ;;  %v1188_v63 = vrot.slane %v1187_v10, 4  ;;  %v1909_v43 = vsel %vm6337_vm1, %v1904_v11, %v1908_v12  ;;  %v1208_v21 = vshll.u32 %v1105_v4, 16  ;;  %v1214_v19 = vshll.u32 %v1106_v8, 16  ;;  %v5786_v4 = vld [vmem:[%s7910_s3] sm:$0xff]   ;;  %v1374_v11 = vld [vmem:[#allocation2 + $0x18] sm:$0xe] }
  0x97   : > { %2586 = vrot.lane.b32.xlu0 %v5401_v42, %s5902_s22  ;;  %v1198_v22 = vrot.slane %v1197_v13, 4  ;;  %v1913_v25 = vor.u32 %v1912_v14, %v1908_v12  ;;  %v1918_v24 = vrot.slane %v1916_v15, 5  ;;  %v1207_v26 = vrot.slane %v1205_v17, 4  ;;  %5657 = vmatprep.subr.bf16.mxu0 %v5786_v4 }
  0x98   : > { %v1193_v28 = vsel %vm6337_vm1, %v1188_v63, %v1192_v6  ;;  %v1210_v30 = vrot.slane %v1208_v21, 5  ;;  %v1216_v29 = vrot.slane %v1214_v19, 5  ;;  %v1218_v31 = vshrl.u32 %v1106_v8, 16  ;;  %5658 = vmatpush3.bf16.msra.mxu0 %v5786_v4  ;;  %v1490_v19 = vld [vmem:[#allocation2 + $0x24] sm:$0xf] }
  0x99   : > { %v1203_v34 = vsel %vm6337_vm1, %v1198_v22, %v1202_v35  ;;  %v1914_v36 = vrot.slane %v1913_v25, 4  ;;  %v1224_v37 = vshll.u32 %v1122_v16, 16  ;;  %v5331_v38 = vrot.slane %v2136_v1, 9  ;;  %v6443_v35 = vld [vmem:[#allocation2 + $0x34] sm:$0xf] }
  0x9a   : > { %v5353_v39 = vcombine.low %v1193_v28, %v1203_v34  ;;  %v1211_v40 = vor.u32 %v1210_v30, %v1207_v26  ;;  %v1220_v41 = vrot.slane %v1218_v31, 4  ;;  %v2178_v42 = vrot.slane %v6384_v27, 5  ;;  %v6463_v26 = vld [vmem:[#allocation2 + $0x28] sm:$0xf] }
  0x9b   : > { %v1919_v48 = vsel %vm6337_vm1, %v1914_v36, %v1918_v24  ;;  %v1226_v49 = vrot.slane %v1224_v37, 5  ;;  %v2181_v50 = vrot.slane %v6407_v60, 5  ;;  %v5314_v51 = vrot.slane %v1375_v32, 9  ;;  %v5789_v28 = vld [vmem:[%s7910_s3 + $0x8] sm:$0xff]  }
  0x9c   : > { %2320 = vrot.lane.b32.xlu1 %v5353_v39, %s5900_s20  ;;  %v5411_v52 = vcombine.low %v1909_v43, %v1919_v48  ;;  %v1212_v53 = vrot.slane %v1211_v40, 4  ;;  %v1221_v55 = vor.u32 %v1220_v41, %v1216_v29  ;;  %v2179_v56 = vsel %vm6318_vm14, %v5331_v38, %v2178_v42  ;;  %5659 = vmatprep.subr.bf16.mxu0 %v5789_v28 }
  0x9d   : > { %v2180_v58 = vrot.slane %v2178_v42, 4  ;;  %v1438_v27 = vrot.slane %v1106_v8, 5  ;;  %v1441_v59 = vrot.slane %v1122_v16, 5  ;;  %v5332_v62 = vrot.slane %v2137_v47, 9  ;;  %v6453_v16 = vld [vmem:[#allocation2 + $0x38] sm:$0x1]  ;;  %5660 = vmatpush3.bf16.msra.mxu0 %v5789_v28 }
  0x9e   : > { %2636 = vrot.lane.b32.xlu0 %v5411_v52, %s5903_s23  ;;  %v1217_v60 = vsel %vm6337_vm1, %v1212_v53, %v1216_v29  ;;  %v1222_v0 = vrot.slane %v1221_v55, 4  ;;  %v2185_v61 = vrot.slane %v6360_v5, 5  ;;  %v2188_v3 = vrot.slane %v6373_v20, 5 }
  0x9f   : > { %v2182_v23 = vsel %vm6318_vm14, %v2180_v58, %v2181_v50  ;;  %v1439_v6 = vsel %vm6318_vm14, %v5314_v51, %v1438_v27  ;;  %v1440_v7 = vrot.slane %v1438_v27, 4  ;;  %v1589_v8 = vshrl.u32 %v6429_v54, 16  ;;  %v1508_v50 = vld [vmem:[#allocation2 + $0x2c] sm:$0x1] }
  0xa0   : > { %v1227_v5 = vsel %vm6337_vm1, %v1222_v0, %v1226_v49  ;;  %v5421_v9 = vcombine.low %v2179_v56, %v2182_v23  ;;  %v2186_v20 = vsel %vm6318_vm14, %v5332_v62, %v2185_v61  ;;  %v2187_v10 = vrot.slane %v2185_v61, 4  ;;  %v6479_v56 = vld [vmem:[#allocation2 + $0x3c] sm:$0xf] }
  0xa1   : > { %v5354_v12 = vcombine.low %v1217_v60, %v1227_v5  ;;  %v1442_v13 = vsel %vm6318_vm14, %v1440_v7, %v1441_v59  ;;  %v1591_v14 = vrot.slane %v1589_v8, 4  ;;  %v1592_v15 = vshll.u32 %v6429_v54, 16 }
  0xa2   : > { %2686 = vrot.lane.b32.xlu0 %v5421_v9, %s5904_s27  ;;  %v5364_v17 = vcombine.low %v1439_v6, %v1442_v13  ;;  %v2189_v63 = vsel %vm6318_vm14, %v2187_v10, %v2188_v3  ;;  %v1602_v43 = vshrl.u32 %v6443_v35, 16  ;;  %v5374_v21 = vcombine.low %v6429_v54, %v6443_v35  ;;  %v6490_v6 = vld [vmem:[#allocation2 + $0x40] sm:$0xf] }
  0xa3   : > { %2322 = vrot.lane.b32.xlu1 %v5354_v12, %s5900_s20  ;;  %v5422_v1 = vcombine.low %v2186_v20, %v2189_v63  ;;  %v1594_v22 = vrot.slane %v1592_v15, 5  ;;  %v5313_v25 = vrot.slane %v1374_v11, 9  ;;  %v1431_v24 = vrot.slane %v6396_v33, 5  ;;  %v1759_v33 = vld [vmem:[#allocation2 + $0x30] sm:$0xe] }
  0xa4   : > { %v1434_v30 = vrot.slane %v6398_v45, 5  ;;  %v1598_v29 = vshll.u32 %v6443_v35, 16  ;;  %v1604_v31 = vrot.slane %v1602_v43, 4  ;;  %v1608_v32 = vshll.u32 %v6453_v16, 16  ;;  %v1758_v20 = vld [vmem:[#allocation2 + $0x24] sm:$0xe] }
  0xa5   : > { %v1432_v34 = vsel %vm6318_vm14, %v5313_v25, %v1431_v24  ;;  %v1433_v36 = vrot.slane %v1431_v24, 4  ;;  %v1595_v37 = vor.u32 %v1594_v22, %v1591_v14  ;;  %v1565_v38 = vshrl.u32 %v1490_v19, 16  ;;  %v6502_v63 = vld [vmem:[#allocation2 + $0x44] sm:$0x1]  ;;  %v6508_v22 = vld [vmem:[#allocation2 + $0x30] sm:$0xf] }
  0xa6   : > { %2688 = vrot.lane.b32.xlu0 %v5422_v1, %s5904_s27  ;;  %v1600_v39 = vrot.slane %v1598_v29, 5  ;;  %v1610_v40 = vrot.slane %v1608_v32, 5  ;;  %v1568_v41 = vshll.u32 %v1490_v19, 16  ;;  %v1578_v45 = vshrl.u32 %v6463_v26, 16  ;;  %v6511_v29 = vld [vmem:[#allocation2 + $0x34] sm:$0xf] }
  0xa7   : > { %2372 = vrot.lane.b32.xlu1 %v5364_v17, %s5898_s17  ;;  %v1435_v42 = vsel %vm6318_vm14, %v1433_v36, %v1434_v30  ;;  %v1596_v47 = vrot.slane %v1595_v37, 4  ;;  %v1567_v48 = vrot.slane %v1565_v38, 4  ;;  %v5373_v49 = vcombine.low %v1490_v19, %v6463_v26  ;;  %v1107_v37 = vld [vmem:[#allocation2 + $0x30] sm:$0xf] }
  0xa8   : > { %v5363_v51 = vcombine.low %v1432_v34, %v1435_v42  ;;  %v1605_v52 = vor.u32 %v1604_v31, %v1600_v39  ;;  %v1570_v53 = vrot.slane %v1568_v41, 5  ;;  %v5324_v55 = vrot.slane %v1759_v33, 9 }
  0xa9   : > { %v1601_v54 = vsel %vm6337_vm1, %v1596_v47, %v1600_v39  ;;  %v1819_v58 = vrot.slane %v6443_v35, 5  ;;  %v1822_v27 = vrot.slane %v6453_v16, 5  ;;  %v1574_v59 = vshll.u32 %v6463_v26, 16 }
  0xaa   : > { %2370 = vrot.lane.b32.xlu0 %v5363_v51, %s5898_s17  ;;  %v1606_v62 = vrot.slane %v1605_v52, 4  ;;  %v1571_v60 = vor.u32 %v1570_v53, %v1567_v48  ;;  %v1580_v0 = vrot.slane %v1578_v45, 4  ;;  %v1584_v61 = vshll.u32 %v1508_v50, 16  ;;  %v6526_v48 = vld [vmem:[#allocation2 + $0x38] sm:$0x1] }
  0xab   : > { %2432 = vrot.lane.b32.xlu1 %v5374_v21, %s5897_s16  ;;  %v1820_v3 = vsel %vm6318_vm14, %v5324_v55, %v1819_v58  ;;  %v1821_v4 = vrot.slane %v1819_v58, 4  ;;  %v1576_v23 = vrot.slane %v1574_v59, 5  ;;  %v1969_v7 = vshrl.u32 %v6479_v56, 16 }
  0xac   : > { %v1611_v35 = vsel %vm6337_vm1, %v1606_v62, %v1610_v40  ;;  %v1572_v8 = vrot.slane %v1571_v60, 4  ;;  %v1586_v5 = vrot.slane %v1584_v61, 5  ;;  %v1972_v9 = vshll.u32 %v6479_v56, 16  ;;  %v6519_v40 = vld [vmem:[#allocation2 + $0x34] sm:$0xf] }
  0xad   : > { %v5384_v10 = vcombine.low %v1601_v54, %v1611_v35  ;;  %v1823_v11 = vsel %vm6318_vm14, %v1821_v4, %v1822_v27  ;;  %v1581_v12 = vor.u32 %v1580_v0, %v1576_v23  ;;  %v1971_v13 = vrot.slane %v1969_v7, 4  ;;  %v6536_v60 = vld [vmem:[#allocation2 + $0x38] sm:$0x1] }
  0xae   : > { %2430 = vrot.lane.b32.xlu0 %v5373_v49, %s5897_s16  ;;  %v5394_v14 = vcombine.low %v1820_v3, %v1823_v11  ;;  %v1577_v15 = vsel %vm6337_vm1, %v1572_v8, %v1576_v23  ;;  %v1974_v16 = vrot.slane %v1972_v9, 5  ;;  %v1982_v17 = vshrl.u32 %v6490_v6, 16  ;;  %v1109_v23 = vld [vmem:[#allocation2 + $0x3c] sm:$0xf]  ;;  %v1110_v9 = vld [vmem:[#allocation2 + $0x40] sm:$0xf] }
  0xaf   : > { %2482 = vrot.lane.b32.xlu1 %v5384_v10, %s5899_s19  ;;  %v1582_v43 = vrot.slane %v1581_v12, 4  ;;  %v5404_v21 = vcombine.low %v6479_v56, %v6490_v6  ;;  %v5323_v19 = vrot.slane %v1758_v20, 9  ;;  %v1812_v1 = vrot.slane %v6463_v26, 5 }
  0xb0   : > { %v1815_v25 = vrot.slane %v1508_v50, 5  ;;  %v1975_v24 = vor.u32 %v1974_v16, %v1971_v13  ;;  %v1978_v28 = vshll.u32 %v6490_v6, 16  ;;  %v1984_v30 = vrot.slane %v1982_v17, 4  ;;  %v1124_v16 = vld [vmem:[#allocation2 + $0x44] sm:$0x1] }
  0xb1   : > { %v1587_v31 = vsel %vm6337_vm1, %v1582_v43, %v1586_v5  ;;  %v1813_v32 = vsel %vm6318_vm14, %v5323_v19, %v1812_v1  ;;  %v1814_v34 = vrot.slane %v1812_v1, 4  ;;  %v1988_v36 = vshll.u32 %v6502_v63, 16 }
  0xb2   : > { %v5383_v26 = vcombine.low %v1577_v15, %v1587_v31  ;;  %v1976_v38 = vrot.slane %v1975_v24, 4  ;;  %v1980_v33 = vrot.slane %v1978_v28, 5  ;;  %v1945_v39 = vshrl.u32 %v6508_v22, 16 }
  0xb3   : > { %2532 = vrot.lane.b32.xlu1 %v5394_v14, %s5901_s21  ;;  %v1816_v41 = vsel %vm6318_vm14, %v1814_v34, %v1815_v25  ;;  %v1990_v45 = vrot.slane %v1988_v36, 5  ;;  %v1948_v42 = vshll.u32 %v6508_v22, 16  ;;  %v1958_v47 = vshrl.u32 %v6511_v29, 16 }
  0xb4   : > { %2480 = vrot.lane.b32.xlu0 %v5383_v26, %s5899_s19  ;;  %v5393_v49 = vcombine.low %v1813_v32, %v1816_v41  ;;  %v1981_v50 = vsel %vm6337_vm1, %v1976_v38, %v1980_v33  ;;  %v1985_v51 = vor.u32 %v1984_v30, %v1980_v33  ;;  %v1947_v52 = vrot.slane %v1945_v39, 4 }
  0xb5   : > { %v1950_v53 = vrot.slane %v1948_v42, 5  ;;  %v5403_v55 = vcombine.low %v6508_v22, %v6511_v29  ;;  %v1229_v56 = vshrl.u32 %v1107_v37, 16  ;;  %v1232_v54 = vshll.u32 %v1107_v37, 16  ;;  %v2138_v22 = vld [vmem:[#allocation2 + $0x30] sm:$0xe] }
  0xb6   : > { %v1986_v58 = vrot.slane %v1985_v51, 4  ;;  %v1238_v27 = vshll.u32 %v6519_v40, 16  ;;  %v1242_v59 = vshrl.u32 %v6519_v40, 16  ;;  %v1248_v62 = vshll.u32 %v6526_v48, 16  ;;  %v1377_v37 = vld [vmem:[#allocation2 + $0x3c] sm:$0xe] }
  0xb7   : > { %2592 = vrot.lane.b32.xlu1 %v5404_v21, %s5902_s22  ;;  %v1231_v0 = vrot.slane %v1229_v56, 4  ;;  %v1234_v61 = vrot.slane %v1232_v54, 5  ;;  %v1951_v3 = vor.u32 %v1950_v53, %v1947_v52  ;;  %v1954_v4 = vshll.u32 %v6511_v29, 16 }
  0xb8   : > { %2530 = vrot.lane.b32.xlu0 %v5393_v49, %s5901_s21  ;;  %v1991_v7 = vsel %vm6337_vm1, %v1986_v58, %v1990_v45  ;;  %v1240_v35 = vrot.slane %v1238_v27, 5  ;;  %v1244_v8 = vrot.slane %v1242_v59, 4  ;;  %v1250_v5 = vrot.slane %v1248_v62, 5  ;;  %v2139_v49 = vld [vmem:[#allocation2 + $0x3c] sm:$0xe] }
  0xb9   : > { %v5414_v20 = vcombine.low %v1981_v50, %v1991_v7  ;;  %v1235_v10 = vor.u32 %v1234_v61, %v1231_v0  ;;  %v1952_v11 = vrot.slane %v1951_v3, 4  ;;  %v1956_v12 = vrot.slane %v1954_v4, 5  ;;  %v6559_v27 = vld [vmem:[#allocation2 + $0x48] sm:$0xf] }
  0xba   : > { %v1245_v13 = vor.u32 %v1244_v8, %v1240_v35  ;;  %v1960_v14 = vrot.slane %v1958_v47, 4  ;;  %v1964_v15 = vshll.u32 %v6536_v60, 16  ;;  %v1253_v17 = vshrl.u32 %v1109_v23, 16  ;;  %v1497_v8 = vld [vmem:[#allocation2 + $0x4c] sm:$0xf] }
  0xbb   : > { %2642 = vrot.lane.b32.xlu1 %v5414_v20, %s5903_s23  ;;  %v1236_v43 = vrot.slane %v1235_v10, 4  ;;  %v1957_v21 = vsel %vm6337_vm1, %v1952_v11, %v1956_v12  ;;  %v1256_v19 = vshll.u32 %v1109_v23, 16  ;;  %v1262_v1 = vshll.u32 %v1110_v9, 16  ;;  %v1376_v11 = vld [vmem:[#allocation2 + $0x30] sm:$0xe] }
  0xbc   : > { %2590 = vrot.lane.b32.xlu0 %v5403_v55, %s5902_s22  ;;  %v1246_v25 = vrot.slane %v1245_v13, 4  ;;  %v1961_v24 = vor.u32 %v1960_v14, %v1956_v12  ;;  %v1966_v28 = vrot.slane %v1964_v15, 5  ;;  %v1255_v30 = vrot.slane %v1253_v17, 4  ;;  %v1511_v15 = vld [vmem:[#allocation2 + $0x50] sm:$0x1] }
  0xbd   : > { %v1241_v31 = vsel %vm6337_vm1, %v1236_v43, %v1240_v35  ;;  %v1258_v32 = vrot.slane %v1256_v19, 5  ;;  %v1264_v34 = vrot.slane %v1262_v1, 5  ;;  %v1266_v36 = vshrl.u32 %v1110_v9, 16  ;;  %v1494_v19 = vld [vmem:[#allocation2 + $0x3c] sm:$0xf] }
  0xbe   : > { %v1251_v26 = vsel %vm6337_vm1, %v1246_v25, %v1250_v5  ;;  %v1962_v38 = vrot.slane %v1961_v24, 4  ;;  %v1272_v33 = vshll.u32 %v1124_v16, 16  ;;  %v5333_v39 = vrot.slane %v2138_v22, 9 }
  0xbf   : > { %v5355_v41 = vcombine.low %v1241_v31, %v1251_v26  ;;  %v1259_v45 = vor.u32 %v1258_v32, %v1255_v30  ;;  %v1268_v42 = vrot.slane %v1266_v36, 4  ;;  %v2192_v47 = vrot.slane %v6511_v29, 5 }
  0xc0   : > { %v1967_v50 = vsel %vm6337_vm1, %v1962_v38, %v1966_v28  ;;  %v1274_v51 = vrot.slane %v1272_v33, 5  ;;  %v2195_v52 = vrot.slane %v6536_v60, 5  ;;  %v5316_v53 = vrot.slane %v1377_v37, 9  ;;  %v6584_v28 = vld [vmem:[#allocation2 + $0x40] sm:$0xf] }
  0xc1   : > { %2324 = vrot.lane.b32.xlu1 %v5355_v41, %s5900_s20  ;;  %v5413_v55 = vcombine.low %v1957_v21, %v1967_v50  ;;  %v1260_v56 = vrot.slane %v1259_v45, 4  ;;  %v1269_v54 = vor.u32 %v1268_v42, %v1264_v34  ;;  %v2193_v58 = vsel %vm6318_vm14, %v5333_v39, %v2192_v47  ;;  %v1761_v33 = vld [vmem:[#allocation2 + $0x48] sm:$0xe]  ;;  %v1510_v50 = vld [vmem:[#allocation2 + $0x44] sm:$0x1] }
  0xc2   : > { %v2194_v59 = vrot.slane %v2192_v47, 4  ;;  %v1452_v29 = vrot.slane %v1110_v9, 5  ;;  %v1455_v62 = vrot.slane %v1124_v16, 5  ;;  %v5334_v0 = vrot.slane %v2139_v49, 9 }
  0xc3   : > { %2640 = vrot.lane.b32.xlu0 %v5413_v55, %s5903_s23  ;;  %v1265_v60 = vsel %vm6337_vm1, %v1260_v56, %v1264_v34  ;;  %v1270_v61 = vrot.slane %v1269_v54, 4  ;;  %v2199_v3 = vrot.slane %v6490_v6, 5  ;;  %v2202_v4 = vrot.slane %v6502_v63, 5  ;;  %v6595_v56 = vld [vmem:[#allocation2 + $0x54] sm:$0xf] }
  0xc4   : > { %v2196_v23 = vsel %vm6318_vm14, %v2194_v59, %v2195_v52  ;;  %v1453_v7 = vsel %vm6318_vm14, %v5316_v53, %v1452_v29  ;;  %v1454_v35 = vrot.slane %v1452_v29, 4  ;;  %v1637_v5 = vshrl.u32 %v6559_v27, 16 }
  0xc5   : > { %v1275_v9 = vsel %vm6337_vm1, %v1270_v61, %v1274_v51  ;;  %v5423_v20 = vcombine.low %v2193_v58, %v2196_v23  ;;  %v2200_v10 = vsel %vm6318_vm14, %v5334_v0, %v2199_v3  ;;  %v2201_v6 = vrot.slane %v2199_v3, 4  ;;  %v6604_v23 = vld [vmem:[#allocation2 + $0x58] sm:$0xf] }
  0xc6   : > { %v5356_v63 = vcombine.low %v1265_v60, %v1275_v9  ;;  %v1456_v12 = vsel %vm6318_vm14, %v1454_v35, %v1455_v62  ;;  %v1639_v13 = vrot.slane %v1637_v5, 4  ;;  %v1640_v14 = vshll.u32 %v6559_v27, 16 }
  0xc7   : > { %2690 = vrot.lane.b32.xlu0 %v5423_v20, %s5904_s27  ;;  %v5366_v16 = vcombine.low %v1453_v7, %v1456_v12  ;;  %v2203_v17 = vsel %vm6318_vm14, %v2201_v6, %v2202_v4  ;;  %v1650_v43 = vshrl.u32 %v1497_v8, 16  ;;  %v5376_v21 = vcombine.low %v6559_v27, %v1497_v8  ;;  %v1760_v20 = vld [vmem:[#allocation2 + $0x3c] sm:$0xe] }
  0xc8   : > { %2326 = vrot.lane.b32.xlu1 %v5356_v63, %s5900_s20  ;;  %v5424_v1 = vcombine.low %v2200_v10, %v2203_v17  ;;  %v1642_v22 = vrot.slane %v1640_v14, 5  ;;  %v5315_v25 = vrot.slane %v1376_v11, 9  ;;  %v1445_v24 = vrot.slane %v6519_v40, 5 }
  0xc9   : > { %v1448_v30 = vrot.slane %v6526_v48, 5  ;;  %v1646_v31 = vshll.u32 %v1497_v8, 16  ;;  %v1652_v32 = vrot.slane %v1650_v43, 4  ;;  %v1656_v34 = vshll.u32 %v1511_v15, 16 }
  0xca   : > { %v1446_v36 = vsel %vm6318_vm14, %v5315_v25, %v1445_v24  ;;  %v1447_v37 = vrot.slane %v1445_v24, 4  ;;  %v1643_v26 = vor.u32 %v1642_v22, %v1639_v13  ;;  %v1613_v38 = vshrl.u32 %v1494_v19, 16 }
  0xcb   : > { %2692 = vrot.lane.b32.xlu0 %v5424_v1, %s5904_s27  ;;  %v1648_v39 = vrot.slane %v1646_v31, 5  ;;  %v1658_v41 = vrot.slane %v1656_v34, 5  ;;  %v1616_v45 = vshll.u32 %v1494_v19, 16  ;;  %v1626_v40 = vshrl.u32 %v6584_v28, 16  ;;  %v6622_v1 = vld [vmem:[#allocation2 + $0x48] sm:$0xf] }
  0xcc   : > { %2376 = vrot.lane.b32.xlu1 %v5366_v16, %s5898_s17  ;;  %v1449_v48 = vsel %vm6318_vm14, %v1447_v37, %v1448_v30  ;;  %v1644_v42 = vrot.slane %v1643_v26, 4  ;;  %v1615_v47 = vrot.slane %v1613_v38, 4  ;;  %v5375_v49 = vcombine.low %v1494_v19, %v6584_v28  ;;  %v6616_v16 = vld [vmem:[#allocation2 + $0x5c] sm:$0x1]  ;;  %v6625_v31 = vld [vmem:[#allocation2 + $0x4c] sm:$0xf] }
  0xcd   : > { %v5365_v51 = vcombine.low %v1446_v36, %v1449_v48  ;;  %v1653_v52 = vor.u32 %v1652_v32, %v1648_v39  ;;  %v1618_v53 = vrot.slane %v1616_v45, 5  ;;  %v5326_v55 = vrot.slane %v1761_v33, 9  ;;  %v1111_v26 = vld [vmem:[#allocation2 + $0x48] sm:$0xf] }
  0xce   : > { %v1649_v54 = vsel %vm6337_vm1, %v1644_v42, %v1648_v39  ;;  %v1833_v58 = vrot.slane %v1497_v8, 5  ;;  %v1836_v27 = vrot.slane %v1511_v15, 5  ;;  %v1622_v59 = vshll.u32 %v6584_v28, 16 }
  0xcf   : > { %2374 = vrot.lane.b32.xlu0 %v5365_v51, %s5898_s17  ;;  %v1654_v29 = vrot.slane %v1653_v52, 4  ;;  %v1619_v62 = vor.u32 %v1618_v53, %v1615_v47  ;;  %v1628_v0 = vrot.slane %v1626_v40, 4  ;;  %v1632_v60 = vshll.u32 %v1510_v50, 16  ;;  %v6640_v47 = vld [vmem:[#allocation2 + $0x50] sm:$0x1] }
  0xd0   : > { %2436 = vrot.lane.b32.xlu1 %v5376_v21, %s5897_s16  ;;  %v1834_v61 = vsel %vm6318_vm14, %v5326_v55, %v1833_v58  ;;  %v1835_v3 = vrot.slane %v1833_v58, 4  ;;  %v1624_v4 = vrot.slane %v1622_v59, 5  ;;  %v2017_v7 = vshrl.u32 %v6595_v56, 16 }
  0xd1   : > { %v1659_v35 = vsel %vm6337_vm1, %v1654_v29, %v1658_v41  ;;  %v1620_v8 = vrot.slane %v1619_v62, 4  ;;  %v1634_v5 = vrot.slane %v1632_v60, 5  ;;  %v2020_v9 = vshll.u32 %v6595_v56, 16  ;;  %v6633_v41 = vld [vmem:[#allocation2 + $0x4c] sm:$0xf] }
  0xd2   : > { %v5386_v10 = vcombine.low %v1649_v54, %v1659_v35  ;;  %v1837_v6 = vsel %vm6318_vm14, %v1835_v3, %v1836_v27  ;;  %v1629_v11 = vor.u32 %v1628_v0, %v1624_v4  ;;  %v2019_v63 = vrot.slane %v2017_v7, 4  ;;  %v6650_v62 = vld [vmem:[#allocation2 + $0x50] sm:$0x1] }
  0xd3   : > { %2434 = vrot.lane.b32.xlu0 %v5375_v49, %s5897_s16  ;;  %v5396_v12 = vcombine.low %v1834_v61, %v1837_v6  ;;  %v1625_v13 = vsel %vm6337_vm1, %v1620_v8, %v1624_v4  ;;  %v2022_v14 = vrot.slane %v2020_v9, 5  ;;  %v2030_v15 = vshrl.u32 %v6604_v23, 16  ;;  %v1113_v4 = vld [vmem:[#allocation2 + $0x54] sm:$0xf]  ;;  %v1114_v9 = vld [vmem:[#allocation2 + $0x58] sm:$0xf] }
  0xd4   : > { %2486 = vrot.lane.b32.xlu1 %v5386_v10, %s5899_s19  ;;  %v1630_v17 = vrot.slane %v1629_v11, 4  ;;  %v5406_v43 = vcombine.low %v6595_v56, %v6604_v23  ;;  %v5325_v21 = vrot.slane %v1760_v20, 9  ;;  %v1826_v19 = vrot.slane %v6584_v28, 5 }
  0xd5   : > { %v1829_v22 = vrot.slane %v1510_v50, 5  ;;  %v2023_v25 = vor.u32 %v2022_v14, %v2019_v63  ;;  %v2026_v24 = vshll.u32 %v6604_v23, 16  ;;  %v2032_v30 = vrot.slane %v2030_v15, 4  ;;  %v1126_v14 = vld [vmem:[#allocation2 + $0x5c] sm:$0x1] }
  0xd6   : > { %v1635_v32 = vsel %vm6337_vm1, %v1630_v17, %v1634_v5  ;;  %v1827_v34 = vsel %vm6318_vm14, %v5325_v21, %v1826_v19  ;;  %v1828_v36 = vrot.slane %v1826_v19, 4  ;;  %v2036_v37 = vshll.u32 %v6616_v16, 16 }
  0xd7   : > { %v5385_v28 = vcombine.low %v1625_v13, %v1635_v32  ;;  %v2024_v38 = vrot.slane %v2023_v25, 4  ;;  %v2028_v33 = vrot.slane %v2026_v24, 5  ;;  %v1993_v39 = vshrl.u32 %v6622_v1, 16 }
  0xd8   : > { %2536 = vrot.lane.b32.xlu1 %v5396_v12, %s5901_s21  ;;  %v1830_v45 = vsel %vm6318_vm14, %v1828_v36, %v1829_v22  ;;  %v2038_v40 = vrot.slane %v2036_v37, 5  ;;  %v1996_v48 = vshll.u32 %v6622_v1, 16  ;;  %v2006_v42 = vshrl.u32 %v6625_v31, 16 }
  0xd9   : > { %2484 = vrot.lane.b32.xlu0 %v5385_v28, %s5899_s19  ;;  %v5395_v49 = vcombine.low %v1827_v34, %v1830_v45  ;;  %v2029_v50 = vsel %vm6337_vm1, %v2024_v38, %v2028_v33  ;;  %v2033_v51 = vor.u32 %v2032_v30, %v2028_v33  ;;  %v1995_v52 = vrot.slane %v1993_v39, 4 }
  0xda   : > { %v1998_v53 = vrot.slane %v1996_v48, 5  ;;  %v5405_v55 = vcombine.low %v6622_v1, %v6625_v31  ;;  %v1277_v56 = vshrl.u32 %v1111_v26, 16  ;;  %v1280_v54 = vshll.u32 %v1111_v26, 16  ;;  %v2140_v1 = vld [vmem:[#allocation2 + $0x48] sm:$0xe] }
  0xdb   : > { %v2034_v58 = vrot.slane %v2033_v51, 4  ;;  %v1286_v27 = vshll.u32 %v6633_v41, 16  ;;  %v1290_v59 = vshrl.u32 %v6633_v41, 16  ;;  %v1296_v29 = vshll.u32 %v6640_v47, 16  ;;  %v1379_v26 = vld [vmem:[#allocation2 + $0x54] sm:$0xe] }
  0xdc   : > { %2596 = vrot.lane.b32.xlu1 %v5406_v43, %s5902_s22  ;;  %v1279_v0 = vrot.slane %v1277_v56, 4  ;;  %v1282_v60 = vrot.slane %v1280_v54, 5  ;;  %v1999_v61 = vor.u32 %v1998_v53, %v1995_v52  ;;  %v2002_v3 = vshll.u32 %v6625_v31, 16 }
  0xdd   : > { %2534 = vrot.lane.b32.xlu0 %v5395_v49, %s5901_s21  ;;  %v2039_v7 = vsel %vm6337_vm1, %v2034_v58, %v2038_v40  ;;  %v1288_v35 = vrot.slane %v1286_v27, 5  ;;  %v1292_v8 = vrot.slane %v1290_v59, 4  ;;  %v1298_v5 = vrot.slane %v1296_v29, 5  ;;  %v2141_v49 = vld [vmem:[#allocation2 + $0x54] sm:$0xe] }
  0xde   : > { %v5416_v20 = vcombine.low %v2029_v50, %v2039_v7  ;;  %v1283_v10 = vor.u32 %v1282_v60, %v1279_v0  ;;  %v2000_v6 = vrot.slane %v1999_v61, 4  ;;  %v2004_v11 = vrot.slane %v2002_v3, 5  ;;  %v6673_v27 = vld [vmem:[#allocation2 + $0x60] sm:$0xf] }
  0xdf   : > { %v1293_v63 = vor.u32 %v1292_v8, %v1288_v35  ;;  %v2008_v12 = vrot.slane %v2006_v42, 4  ;;  %v2012_v13 = vshll.u32 %v6650_v62, 16  ;;  %v1301_v15 = vshrl.u32 %v1113_v4, 16  ;;  %v6684_v8 = vld [vmem:[#allocation2 + $0x64] sm:$0xf] }
  0xe0   : > { %2646 = vrot.lane.b32.xlu1 %v5416_v20, %s5903_s23  ;;  %v1284_v17 = vrot.slane %v1283_v10, 4  ;;  %v2005_v43 = vsel %vm6337_vm1, %v2000_v6, %v2004_v11  ;;  %v1304_v21 = vshll.u32 %v1113_v4, 16  ;;  %v1310_v19 = vshll.u32 %v1114_v9, 16  ;;  %v1378_v6 = vld [vmem:[#allocation2 + $0x48] sm:$0xe] }
  0xe1   : > { %2594 = vrot.lane.b32.xlu0 %v5405_v55, %s5902_s22  ;;  %v1294_v22 = vrot.slane %v1293_v63, 4  ;;  %v2009_v25 = vor.u32 %v2008_v12, %v2004_v11  ;;  %v2014_v24 = vrot.slane %v2012_v13, 5  ;;  %v1303_v30 = vrot.slane %v1301_v15, 4 }
  0xe2   : > { %v1289_v32 = vsel %vm6337_vm1, %v1284_v17, %v1288_v35  ;;  %v1306_v34 = vrot.slane %v1304_v21, 5  ;;  %v1312_v36 = vrot.slane %v1310_v19, 5  ;;  %v1314_v37 = vshrl.u32 %v1114_v9, 16  ;;  %v1498_v19 = vld [vmem:[#allocation2 + $0x54] sm:$0xf] }
  0xe3   : > { %v1299_v28 = vsel %vm6337_vm1, %v1294_v22, %v1298_v5  ;;  %v2010_v38 = vrot.slane %v2009_v25, 4  ;;  %v1320_v33 = vshll.u32 %v1126_v14, 16  ;;  %v5335_v39 = vrot.slane %v2140_v1, 9 }
  0xe4   : > { %v5357_v45 = vcombine.low %v1289_v32, %v1299_v28  ;;  %v1307_v40 = vor.u32 %v1306_v34, %v1303_v30  ;;  %v1316_v48 = vrot.slane %v1314_v37, 4  ;;  %v2206_v42 = vrot.slane %v6625_v31, 5  ;;  %v6706_v30 = vld [vmem:[#allocation2 + $0x58] sm:$0xf] }
  0xe5   : > { %v2015_v50 = vsel %vm6337_vm1, %v2010_v38, %v2014_v24  ;;  %v1322_v51 = vrot.slane %v1320_v33, 5  ;;  %v2209_v52 = vrot.slane %v6650_v62, 5  ;;  %v5318_v53 = vrot.slane %v1379_v26, 9 }
  0xe6   : > { %2328 = vrot.lane.b32.xlu1 %v5357_v45, %s5900_s20  ;;  %v5415_v55 = vcombine.low %v2005_v43, %v2015_v50  ;;  %v1308_v56 = vrot.slane %v1307_v40, 4  ;;  %v1317_v54 = vor.u32 %v1316_v48, %v1312_v36  ;;  %v2207_v58 = vsel %vm6318_vm14, %v5335_v39, %v2206_v42  ;;  %v1763_v39 = vld [vmem:[#allocation2 + $0x60] sm:$0xe] }
  0xe7   : > { %v2208_v59 = vrot.slane %v2206_v42, 4  ;;  %v1466_v31 = vrot.slane %v1114_v9, 5  ;;  %v1469_v29 = vrot.slane %v1126_v14, 5  ;;  %v5336_v0 = vrot.slane %v2141_v49, 9  ;;  %v6687_v9 = vpop.permute.xlu1 %2428  ;;  %v6696_v14 = vld [vmem:[#allocation2 + $0x68] sm:$0x1] }
  0xe8   : > { %2644 = vrot.lane.b32.xlu0 %v5415_v55, %s5903_s23  ;;  %v1313_v62 = vsel %vm6337_vm1, %v1308_v56, %v1312_v36  ;;  %v1318_v60 = vrot.slane %v1317_v54, 4  ;;  %v2213_v61 = vrot.slane %v6604_v23, 5  ;;  %v2216_v3 = vrot.slane %v6616_v16, 5 }
  0xe9   : > { %v2210_v4 = vsel %vm6318_vm14, %v2208_v59, %v2209_v52  ;;  %v1467_v7 = vsel %vm6318_vm14, %v5318_v53, %v1466_v31  ;;  %v1468_v35 = vrot.slane %v1466_v31, 4  ;;  %v1685_v5 = vshrl.u32 %v6673_v27, 16  ;;  %v1512_v52 = vld [vmem:[#allocation2 + $0x5c] sm:$0x1] }
  0xea   : > { %v1323_v20 = vsel %vm6337_vm1, %v1318_v60, %v1322_v51  ;;  %v5425_v10 = vcombine.low %v2207_v58, %v2210_v4  ;;  %v2214_v23 = vsel %vm6318_vm14, %v5336_v0, %v2213_v61  ;;  %v2215_v16 = vrot.slane %v2213_v61, 4  ;;  %v6721_v58 = vld [vmem:[#allocation2 + $0x6c] sm:$0xf] }
  0xeb   : > { %v5358_v11 = vcombine.low %v1313_v62, %v1323_v20  ;;  %v1470_v63 = vsel %vm6318_vm14, %v1468_v35, %v1469_v29  ;;  %v1687_v12 = vrot.slane %v1685_v5, 4  ;;  %v1688_v13 = vshll.u32 %v6673_v27, 16 }
  0xec   : > { %2694 = vrot.lane.b32.xlu0 %v5425_v10, %s5904_s27  ;;  %v5368_v15 = vcombine.low %v1467_v7, %v1470_v63  ;;  %v2217_v17 = vsel %vm6318_vm14, %v2215_v16, %v2216_v3  ;;  %v1698_v43 = vshrl.u32 %v6684_v8, 16  ;;  %v5378_v21 = vcombine.low %v6673_v27, %v6684_v8  ;;  %v6723_v27 = vpop.permute.xlu0 %2426 }
  0xed   : > { %2330 = vrot.lane.b32.xlu1 %v5358_v11, %s5900_s20  ;;  %v5426_v1 = vcombine.low %v2214_v23, %v2217_v17  ;;  %v1690_v22 = vrot.slane %v1688_v13, 5  ;;  %v5317_v25 = vrot.slane %v1378_v6, 9  ;;  %v1459_v24 = vrot.slane %v6633_v41, 5  ;;  %v1762_v11 = vld [vmem:[#allocation2 + $0x54] sm:$0xe] }
  0xee   : > { %v1462_v32 = vrot.slane %v6640_v47, 5  ;;  %v1694_v34 = vshll.u32 %v6684_v8, 16  ;;  %v1700_v36 = vrot.slane %v1698_v43, 4  ;;  %v1704_v37 = vshll.u32 %v6696_v14, 16 }
  0xef   : > { %v1460_v26 = vsel %vm6318_vm14, %v5317_v25, %v1459_v24  ;;  %v1461_v28 = vrot.slane %v1459_v24, 4  ;;  %v1691_v38 = vor.u32 %v1690_v22, %v1687_v12  ;;  %v1661_v33 = vshrl.u32 %v1498_v19, 16  ;;  %v6713_v45 = vpop.permute.xlu1 %2366 }
  0xf0   : > { %2696 = vrot.lane.b32.xlu0 %v5426_v1, %s5904_s27  ;;  %v1696_v41 = vrot.slane %v1694_v34, 5  ;;  %v1706_v40 = vrot.slane %v1704_v37, 5  ;;  %v1664_v48 = vshll.u32 %v1498_v19, 16  ;;  %v1674_v47 = vshrl.u32 %v6706_v30, 16  ;;  %v6756_v34 = vld [vmem:[#allocation2 + $0x60] sm:$0xf] }
  0xf1   : > { %2380 = vrot.lane.b32.xlu1 %v5368_v15, %s5898_s17  ;;  %v1463_v42 = vsel %vm6318_vm14, %v1461_v28, %v1462_v32  ;;  %v1692_v49 = vrot.slane %v1691_v38, 4  ;;  %v1663_v50 = vrot.slane %v1661_v33, 4  ;;  %v5377_v51 = vcombine.low %v1498_v19, %v6706_v30  ;;  %v6748_v19 = vld [vmem:[#allocation2 + $0x74] sm:$0x1] }
  0xf2   : > { %v5367_v53 = vcombine.low %v1460_v26, %v1463_v42  ;;  %v1701_v55 = vor.u32 %v1700_v36, %v1696_v41  ;;  %v1666_v56 = vrot.slane %v1664_v48, 5  ;;  %v5328_v54 = vrot.slane %v1763_v39, 9 }
  0xf3   : > { %v1697_v59 = vsel %vm6337_vm1, %v1692_v49, %v1696_v41  ;;  %v1847_v31 = vrot.slane %v6684_v8, 5  ;;  %v1850_v29 = vrot.slane %v6696_v14, 5  ;;  %v1670_v0 = vshll.u32 %v6706_v30, 16  ;;  %v6730_v62 = vpop.permute.xlu1 %2368  ;;  %v6736_v8 = vld [vmem:[#allocation2 + $0x70] sm:$0xf] }
  0xf4   : > { %2378 = vrot.lane.b32.xlu0 %v5367_v53, %s5898_s17  ;;  %v1702_v60 = vrot.slane %v1701_v55, 4  ;;  %v1667_v61 = vor.u32 %v1666_v56, %v1663_v50  ;;  %v1676_v3 = vrot.slane %v1674_v47, 4  ;;  %v1680_v4 = vshll.u32 %v1512_v52, 16 }
  0xf5   : > { %2440 = vrot.lane.b32.xlu1 %v5378_v21, %s5897_s16  ;;  %v1848_v7 = vsel %vm6318_vm14, %v5328_v54, %v1847_v31  ;;  %v1849_v35 = vrot.slane %v1847_v31, 4  ;;  %v1672_v5 = vrot.slane %v1670_v0, 5  ;;  %v2065_v20 = vshrl.u32 %v6721_v58, 16 }
  0xf6   : > { %v1707_v10 = vsel %vm6337_vm1, %v1702_v60, %v1706_v40  ;;  %v1668_v23 = vrot.slane %v1667_v61, 4  ;;  %v1682_v16 = vrot.slane %v1680_v4, 5  ;;  %v2068_v6 = vshll.u32 %v6721_v58, 16  ;;  %v6764_v40 = vld [vmem:[#allocation2 + $0x64] sm:$0xf] }
  0xf7   : > { %v5388_v63 = vcombine.low %v1697_v59, %v1707_v10  ;;  %v1851_v12 = vsel %vm6318_vm14, %v1849_v35, %v1850_v29  ;;  %v1677_v13 = vor.u32 %v1676_v3, %v1672_v5  ;;  %v2067_v14 = vrot.slane %v2065_v20, 4  ;;  %v6744_v15 = vpop.permute.xlu1 %2478  ;;  %v6779_v29 = vld [vmem:[#allocation2 + $0x64] sm:$0xf]  ;;  %v6789_v35 = vld [vmem:[#allocation2] sm:$0xf] }
  0xf8   : > { %2438 = vrot.lane.b32.xlu0 %v5377_v51, %s5897_s16  ;;  %v5398_v17 = vcombine.low %v1848_v7, %v1851_v12  ;;  %v2070_v43 = vrot.slane %v2068_v6, 5  ;;  %v2078_v21 = vshrl.u32 %v6736_v8, 16  ;;  %v6750_v1 = vpop.permute.xlu0 %2316  ;;  %v1673_v22 = vsel %vm6337_vm1, %v1668_v23, %v1672_v5  ;;  %v6787_v7 = vld [vmem:[#allocation2 + $0x4] sm:$0xf] }
  0xf9   : > { %2490 = vrot.lane.b32.xlu1 %v5388_v63, %s5899_s19  ;;  %v1678_v25 = vrot.slane %v1677_v13, 4  ;;  %v5327_v24 = vrot.slane %v1762_v11, 9  ;;  %v1840_v32 = vrot.slane %v6706_v30, 5  ;;  %v1843_v36 = vrot.slane %v1512_v52, 5  ;;  %v6773_v52 = vld [vmem:[#allocation2 + $0x60] sm:$0xf] }
  0xfa   : > { %v2071_v37 = vor.u32 %v2070_v43, %v2067_v14  ;;  %v2074_v26 = vshll.u32 %v6736_v8, 16  ;;  %v2080_v28 = vrot.slane %v2078_v21, 4  ;;  %v2084_v41 = vshll.u32 %v6748_v19, 16  ;;  %v6799_v11 = vld [vmem:[#allocation2 + $0x68] sm:$0x1] }
  0xfb   : > { %v1683_v38 = vsel %vm6337_vm1, %v1678_v25, %v1682_v16  ;;  %v1841_v33 = vsel %vm6318_vm14, %v5327_v24, %v1840_v32  ;;  %v1842_v39 = vrot.slane %v1840_v32, 4  ;;  %v2041_v42 = vshrl.u32 %v6756_v34, 16 }
  0xfc   : > { %v5387_v48 = vcombine.low %v1673_v22, %v1683_v38  ;;  %v2072_v30 = vrot.slane %v2071_v37, 4  ;;  %v2076_v47 = vrot.slane %v2074_v26, 5  ;;  %v5408_v49 = vcombine.low %v6721_v58, %v6736_v8  ;;  %v6781_v58 = vld [vmem:[#allocation2 + $0x68] sm:$0x1]  ;;  %v5802_v38 = vld [vmem:[#allocation2 + $0x10] sm:$0xf] }
  0xfd   : > { %2540 = vrot.lane.b32.xlu1 %v5398_v17, %s5901_s21  ;;  %v1844_v50 = vsel %vm6318_vm14, %v1842_v39, %v1843_v36  ;;  %v2044_v51 = vshll.u32 %v6756_v34, 16  ;;  %v2319_v53 = vpop.permute.xlu0 %2318  ;;  %v6775_v55 = vpop.permute.xlu1 %2528  ;;  %v2086_v59 = vrot.slane %v2084_v41, 5  ;;  %v2054_v31 = vshrl.u32 %v6764_v40, 16  ;;  %v6806_v17 = vld [vmem:[#allocation2 + $0x6c] sm:$0xf] }
  0xfe   : > { %2488 = vrot.lane.b32.xlu0 %v5387_v48, %s5899_s19  ;;  %v5397_v56 = vcombine.low %v1841_v33, %v1844_v50  ;;  %v2081_v54 = vor.u32 %v2080_v28, %v2076_v47  ;;  %v2077_v0 = vsel %vm6337_vm1, %v2072_v30, %v2076_v47  ;;  %v2043_v60 = vrot.slane %v2041_v42, 4  ;;  %v5803_v33 = vld [vmem:[#allocation2 + $0xc] sm:$0xf]  ;;  %v6813_v41 = vld [vmem:[#allocation2 + $0x70] sm:$0xf] }
  0xff   : > { %v2046_v61 = vrot.slane %v2044_v51, 5  ;;  %v5407_v3 = vcombine.low %v6756_v34, %v6764_v40  ;;  %v5341_v5 = vcombine.low %v6789_v35, %v6787_v7  ;;  %v1325_v20 = vshrl.u32 %v6773_v52, 16  ;;  %v6819_v50 = vld [vmem:[#allocation2 + $0x74] sm:$0x1] }
 0x100   : > { %v2082_v4 = vrot.slane %v2081_v54, 4  ;;  %v1328_v10 = vshll.u32 %v6773_v52, 16  ;;  %vm2706_vm2 = vcmask 31744   ;;  %v1334_v23 = vshll.u32 %v6779_v29, 16 }
 0x101   : > { %2600 = vrot.lane.b32.xlu1 %v5408_v49, %s5902_s22  ;;  %v1338_v16 = vshrl.u32 %v6779_v29, 16  ;;  %v1344_v6 = vshll.u32 %v6781_v58, 16  ;;  %v6801_v63 = vpop.permute.xlu0 %2476  ;;  %vm2737_vm3 = vcmask 64512   ;;  %v1327_v13 = vrot.slane %v1325_v20, 4  ;;  %v6808_v24 = vpop.permute.xlu1 %2588 }
 0x102   : > { %2538 = vrot.lane.b32.xlu0 %v5397_v56, %s5901_s21  ;;  %v2087_v12 = vsel %vm6337_vm1, %v2082_v4, %v2086_v59  ;;  %v1330_v14 = vrot.slane %v1328_v10, 5  ;;  %v1336_v21 = vrot.slane %v1334_v23, 5  ;;  %v2047_v34 = vor.u32 %v2046_v61, %v2043_v60 }
 0x103   : > { %v5418_v43 = vcombine.low %v2077_v0, %v2087_v12  ;;  %v1340_v22 = vrot.slane %v1338_v16, 4  ;;  %v1346_v25 = vrot.slane %v1344_v6, 5  ;;  %v2050_v36 = vshll.u32 %v6764_v40, 16  ;;  %v2142_v0 = vld [vmem:[#allocation2 + $0x60] sm:$0xe] }
 0x104   : > { %v1331_v32 = vor.u32 %v1330_v14, %v1327_v13  ;;  %v2056_v37 = vrot.slane %v2054_v31, 4  ;;  %v2060_v28 = vshll.u32 %v6799_v11, 16  ;;  %v5342_v39 = vcombine.low %v5803_v33, %v5802_v38  ;;  %v1381_v33 = vld [vmem:[#allocation2 + $0x6c] sm:$0xe] }
 0x105   : > { %2650 = vrot.lane.b32.xlu1 %v5418_v43, %s5903_s23  ;;  %v1341_v26 = vor.u32 %v1340_v22, %v1336_v21  ;;  %v1349_v48 = vshrl.u32 %v6806_v17, 16  ;;  %v6816_v30 = vpop.permute.xlu0 %2526  ;;  %v2048_v42 = vrot.slane %v2047_v34, 4  ;;  %v2052_v49 = vrot.slane %v2050_v36, 5 }
 0x106   : > { %2598 = vrot.lane.b32.xlu0 %v5407_v3, %s5902_s22  ;;  %v1332_v47 = vrot.slane %v1331_v32, 4  ;;  %v1352_v51 = vshll.u32 %v6806_v17, 16  ;;  %v2062_v54 = vrot.slane %v2060_v28, 5  ;;  %v2712_v59 = vsel %vm2706_vm2, %v5342_v39, %v2319_v53 }
 0x107   : > { %v1342_v56 = vrot.slane %v1341_v26, 4  ;;  %v1351_v31 = vrot.slane %v1349_v48, 4  ;;  %v2053_v61 = vsel %vm6337_vm1, %v2048_v42, %v2052_v49  ;;  %v2057_v3 = vor.u32 %v2056_v37, %v2052_v49 }
 0x108   : > { %v1337_v60 = vsel %vm6337_vm1, %v1332_v47, %v1336_v21  ;;  %v2741_v4 = vsel %vm2737_vm3, %v2712_v59, %v6730_v62  ;;  %v1354_v10 = vrot.slane %v1352_v51, 5  ;;  %v1358_v23 = vshll.u32 %v6813_v41, 16  ;;  %v6833_v16 = vpop.permute.xlu1 %2638  ;;  %v1504_v59 = vld [vmem:[#allocation2 + $0x78] sm:$0xf] }
 0x109   : > { %v1347_v20 = vsel %vm6337_vm1, %v1342_v56, %v1346_v25  ;;  %v1362_v53 = vshrl.u32 %v6813_v41, 16  ;;  %v2058_v12 = vrot.slane %v2057_v3, 4  ;;  %v1368_v13 = vshll.u32 %v6819_v50, 16  ;;  %v6836_v43 = vpop.permute.xlu0 %2586  ;;  %v6871_v3 = vld [vmem:[#allocation2 + $0x7c] sm:$0xf] }
 0x10a   : > { %v5359_v6 = vcombine.low %v1337_v60, %v1347_v20  ;;  %v5337_v14 = vrot.slane %v2142_v0, 9  ;;  %v1355_v21 = vor.u32 %v1354_v10, %v1351_v31  ;;  %v1360_v22 = vrot.slane %v1358_v23, 5  ;;  %v1380_v10 = vld [vmem:[#allocation2 + $0x60] sm:$0xe] }
 0x10b   : > { %v1364_v62 = vrot.slane %v1362_v53, 4  ;;  %v2220_v32 = vrot.slane %v6764_v40, 5  ;;  %v2709_v25 = vsel %vm2706_vm2, %v5341_v5, %v6750_v1  ;;  %v2063_v34 = vsel %vm6337_vm1, %v2058_v12, %v2062_v54 }
 0x10c   : > { %2332 = vrot.lane.b32.xlu1 %v5359_v6, %s5900_s20  ;;  %v1370_v36 = vrot.slane %v1368_v13, 5  ;;  %v2223_v37 = vrot.slane %v6799_v11, 5  ;;  %v5417_v26 = vcombine.low %v2053_v61, %v2063_v34  ;;  %v1356_v28 = vrot.slane %v1355_v21, 4  ;;  %v2143_v11 = vld [vmem:[#allocation2 + $0x6c] sm:$0xe] }
 0x10d   : > { %v1365_v38 = vor.u32 %v1364_v62, %v1360_v22  ;;  %vm2758_vm4 = vcmask 97280   ;;  %v2221_v40 = vsel %vm6318_vm14, %v5337_v14, %v2220_v32  ;;  %v2222_v39 = vrot.slane %v2220_v32, 4  ;;  %v6894_v32 = vld [vmem:[#allocation2 + $0x80] sm:$0x1] }
 0x10e   : > { %vm2779_vm5 = vcmask 130048   ;;  %v2762_v1 = vsel %vm2758_vm4, %v2741_v4, %v6687_v9  ;;  %v2739_v7 = vsel %vm2737_vm3, %v2709_v25, %v6713_v45  ;;  %2648 = vrot.lane.b32.xlu0 %v5417_v26, %s5903_s23  ;;  %v1361_v35 = vsel %vm6337_vm1, %v1356_v28, %v1360_v22  ;;  %v6857_v48 = vpop.permute.xlu1 %2320 }
 0x10f   : > { %v1366_v5 = vrot.slane %v1365_v38, 4  ;;  %v2224_v47 = vsel %vm6318_vm14, %v2222_v39, %v2223_v37  ;;  %vm2800_vm6 = vcmask 162816   ;;  %v2783_v42 = vsel %vm2779_vm5, %v2762_v1, %v6744_v15  ;;  %v1502_v37 = vld [vmem:[#allocation2 + $0x6c] sm:$0xf] }
 0x110   : > { %v5320_v9 = vrot.slane %v1381_v33, 9  ;;  %v6863_v49 = vpop.permute.xlu0 %2636  ;;  %v5427_v51 = vcombine.low %v2221_v40, %v2224_v47  ;;  %v1480_v56 = vrot.slane %v6813_v41, 5  ;;  %v1483_v54 = vrot.slane %v6819_v50, 5  ;;  %v6901_v33 = vld [vmem:[#allocation2 + $0x70] sm:$0xf] }
 0x111   : > { %v1371_v45 = vsel %vm6337_vm1, %v1366_v5, %v1370_v36  ;;  %v5338_v0 = vrot.slane %v2143_v11, 9  ;;  %v2227_v60 = vrot.slane %v6736_v8, 5  ;;  %v2230_v61 = vrot.slane %v6748_v19, 5 }
 0x112   : > { %v5360_v31 = vcombine.low %v1361_v35, %v1371_v45  ;;  %2698 = vrot.lane.b32.xlu0 %v5427_v51, %s5904_s27  ;;  %v2760_v15 = vsel %vm2758_vm4, %v2739_v7, %v6723_v27  ;;  %v1481_v4 = vsel %vm6318_vm14, %v5320_v9, %v1480_v56  ;;  %v1482_v20 = vrot.slane %v1480_v56, 4  ;;  %v1765_v56 = vld [vmem:[#allocation2 + $0x78] sm:$0xe] }
 0x113   : > { %v2804_v50 = vsel %vm2800_vm6, %v2783_v42, %v6775_v55  ;;  %v2228_v8 = vsel %vm6318_vm14, %v5338_v0, %v2227_v60  ;;  %v2229_v19 = vrot.slane %v2227_v60, 4  ;;  %v1733_v23 = vshrl.u32 %v1504_v59, 16 }
 0x114   : > { %2334 = vrot.lane.b32.xlu1 %v5360_v31, %s5900_s20  ;;  %v6883_v53 = vpop.permute.xlu0 %2686  ;;  %v2781_v27 = vsel %vm2779_vm5, %v2760_v15, %v6801_v63  ;;  %v1484_v6 = vsel %vm6318_vm14, %v1482_v20, %v1483_v54  ;;  %v1736_v12 = vshll.u32 %v1504_v59, 16  ;;  %v1746_v13 = vshrl.u32 %v6871_v3, 16 }
 0x115   : > { %v6890_v14 = vpop.permute.xlu1 %2322  ;;  %v5370_v21 = vcombine.low %v1481_v4, %v1484_v6  ;;  %v2231_v55 = vsel %vm6318_vm14, %v2229_v19, %v2230_v61  ;;  %v1735_v22 = vrot.slane %v1733_v23, 4  ;;  %v5319_v62 = vrot.slane %v1380_v10, 9  ;;  %v6924_v4 = vld [vmem:[#allocation2 + $0x74] sm:$0x1] }
 0x116   : > { %v5428_v25 = vcombine.low %v2228_v8, %v2231_v55  ;;  %v1738_v34 = vrot.slane %v1736_v12, 5  ;;  %v1473_v63 = vrot.slane %v6779_v29, 5  ;;  %v1476_v36 = vrot.slane %v6781_v58, 5 }
 0x117   : > { %vm2821_vm10 = vcmask 195584   ;;  %v5380_v26 = vcombine.low %v1504_v59, %v6871_v3  ;;  %v1742_v28 = vshll.u32 %v6871_v3, 16  ;;  %v1748_v38 = vrot.slane %v1746_v13, 4  ;;  %v6934_v13 = vld [vmem:[#allocation2 + $0x84] sm:$0xf] }
 0x118   : > { %2384 = vrot.lane.b32.xlu1 %v5370_v21, %s5898_s17  ;;  %v6903_v40 = vpop.permute.xlu0 %2688  ;;  %2700 = vrot.lane.b32.xlu0 %v5428_v25, %s5904_s27  ;;  %v2802_v39 = vsel %vm2800_vm6, %v2781_v27, %v6816_v30  ;;  %v1474_v58 = vsel %vm6318_vm14, %v5319_v62, %v1473_v63  ;;  %v1475_v1 = vrot.slane %v1473_v63, 4  ;;  %v1739_v7 = vor.u32 %v1738_v34, %v1735_v22  ;;  %v5791_v62 = vld [vmem:[%s7910_s3 + $0x10] ss:$0 sps:$4 sm:$0x33]  }
 0x119   : > { %v6910_v35 = vpop.permute.xlu1 %2372  ;;  %v1744_v5 = vrot.slane %v1742_v28, 5  ;;  %v1752_v11 = vshll.u32 %v6894_v32, 16  ;;  %v1709_v47 = vshrl.u32 %v1502_v37, 16  ;;  %v1712_v42 = vshll.u32 %v1502_v37, 16 }
 0x11a   : > { %v2825_v9 = vsel %vm2821_vm10, %v2804_v50, %v6808_v24  ;;  %v1477_v45 = vsel %vm6318_vm14, %v1475_v1, %v1476_v36  ;;  %v1740_v51 = vrot.slane %v1739_v7, 4  ;;  %v1722_v30 = vshrl.u32 %v6901_v33, 16  ;;  %v6948_v36 = vld [vmem:[#allocation2 + $0x88] sm:$0xf] }
 0x11b   : > { %v5369_v54 = vcombine.low %v1474_v58, %v1477_v45  ;;  %v1749_v59 = vor.u32 %v1748_v38, %v1744_v5  ;;  %v1754_v31 = vrot.slane %v1752_v11, 5  ;;  %v1711_v0 = vrot.slane %v1709_v47, 4 }
 0x11c   : > { %2444 = vrot.lane.b32.xlu1 %v5380_v26, %s5897_s16  ;;  %v6919_v60 = vpop.permute.xlu0 %2370  ;;  %vm2842_vm12 = vcmask 228352   ;;  %v1745_v61 = vsel %vm6337_vm1, %v1740_v51, %v1744_v5  ;;  %v1714_v24 = vrot.slane %v1712_v42, 5  ;;  %v5379_v15 = vcombine.low %v1502_v37, %v6901_v33 }
 0x11d   : > { %v6926_v20 = vpop.permute.xlu1 %2432  ;;  %2382 = vrot.lane.b32.xlu0 %v5369_v54, %s5898_s17  ;;  %v1750_v10 = vrot.slane %v1749_v59, 4  ;;  %v5330_v50 = vrot.slane %v1765_v56, 9  ;;  %v1861_v8 = vrot.slane %v6871_v3, 5  ;;  %v1864_v19 = vrot.slane %v6894_v32, 5  ;;  %v1895_v59 = vld [vmem:[#allocation2 + $0x8c] sm:$0x1] }
 0x11e   : > { %v2823_v23 = vsel %vm2821_vm10, %v2802_v39, %v6836_v43  ;;  %v1715_v27 = vor.u32 %v1714_v24, %v1711_v0  ;;  %v1718_v6 = vshll.u32 %v6901_v33, 16  ;;  %v1724_v12 = vrot.slane %v1722_v30, 4  ;;  %v1764_v39 = vld [vmem:[#allocation2 + $0x6c] sm:$0xe] }
 0x11f   : > { %v1755_v21 = vsel %vm6337_vm1, %v1750_v10, %v1754_v31  ;;  %v1862_v55 = vsel %vm6318_vm14, %v5330_v50, %v1861_v8  ;;  %v1863_v22 = vrot.slane %v1861_v8, 4  ;;  %v1728_v3 = vshll.u32 %v6924_v4, 16  ;;  %v6983_v8 = vld [vmem:[#allocation2 + $0x7c] sm:$0xf] }
 0x120   : > { %v6944_v43 = vpop.permute.xlu0 %2430  ;;  %v2846_v32 = vsel %vm2842_vm12, %v2825_v9, %v6833_v16  ;;  %v5390_v25 = vcombine.low %v1745_v61, %v1755_v21  ;;  %v1716_v34 = vrot.slane %v1715_v27, 4  ;;  %v1720_v63 = vrot.slane %v1718_v6, 5 }
 0x121   : > { %v6950_v37 = vpop.permute.xlu1 %2482  ;;  %2442 = vrot.lane.b32.xlu0 %v5379_v15, %s5897_s16  ;;  %v2844_v26 = vsel %vm2842_vm12, %v2823_v23, %v6863_v49  ;;  %v1865_v28 = vsel %vm6318_vm14, %v1863_v22, %v1864_v19  ;;  %vm2925_vm13 = vcmask 1041408   ;;  %v2113_v38 = vshrl.u32 %v6934_v13, 16  ;;  %v1882_v15 = vld [vmem:[#allocation2 + $0x78] sm:$0xf] }
 0x122   : > { %2494 = vrot.lane.b32.xlu1 %v5390_v25, %s5899_s19  ;;  %v5400_v16 = vcombine.low %v1862_v55, %v1865_v28  ;;  %v1721_v58 = vsel %vm6337_vm1, %v1716_v34, %v1720_v63  ;;  %v1725_v1 = vor.u32 %v1724_v12, %v1720_v63  ;;  %v1730_v7 = vrot.slane %v1728_v3, 5  ;;  %5709 = vmatprep.subr.msk.bf16.mxu0 %vm2925_vm13, %v5791_v62  ;;  %v5804_v22 = vld [vmem:[#allocation2 + $0x18] sm:$0xf]  ;;  %v5805_v3 = vld [vmem:[#allocation2 + $0x1c] sm:$0xf] }
 0x123   : > { %v2115_v5 = vrot.slane %v2113_v38, 4  ;;  %v2116_v49 = vshll.u32 %v6934_v13, 16  ;;  %v2126_v11 = vshrl.u32 %v6948_v36, 16  ;;  %v5410_v47 = vcombine.low %v6934_v13, %v6948_v36  ;;  %v5806_v63 = vld [vmem:[#allocation2 + $0x24] sm:$0xf] }
 0x124   : > { %v1726_v42 = vrot.slane %v1725_v1, 4  ;;  %v5329_v9 = vrot.slane %v1764_v39, 9  ;;  %v1854_v45 = vrot.slane %v6901_v33, 5  ;;  %v1857_v51 = vrot.slane %v6924_v4, 5 }
 0x125   : > { %v6968_v30 = vpop.permute.xlu1 %2532  ;;  %v2118_v56 = vrot.slane %v2116_v49, 5  ;;  %vm2863_vm15 = vcmask 261120   ;;  %vm2904_vm0 = vcmask 293888   ;;  %v2927_v54 = vsel %vm2925_vm13, %v5791_v62, 0 }
 0x126   : > { %v6971_v31 = vpop.permute.xlu0 %2480  ;;  %2544 = vrot.lane.b32.xlu1 %v5400_v16, %s5901_s21  ;;  %v1731_v0 = vsel %vm6337_vm1, %v1726_v42, %v1730_v7  ;;  %v1855_v33 = vsel %vm6318_vm14, %v5329_v9, %v1854_v45  ;;  %v1856_v61 = vrot.slane %v1854_v45, 4  ;;  %v2865_v24 = vsel %vm2863_vm15, %v2844_v26, %v6883_v53  ;;  %5662 = vmatpush3.bf16.msra.mxu0 %v2927_v54  ;;  %v5807_v26 = vld [vmem:[#allocation2 + $0x28] sm:$0xf] }
 0x127   : > { %v5389_v4 = vcombine.low %v1721_v58, %v1731_v0  ;;  %5663 = vmatprep.mubr.msk.bf16.mxu0 %vm2904_vm0, %v2865_v24  ;;  %v2867_v10 = vsel %vm2863_vm15, %v2846_v32, %v6903_v40  ;;  %v2119_v50 = vor.u32 %v2118_v56, %v2115_v5  ;;  %v2122_v23 = vshll.u32 %v6948_v36, 16  ;;  %v2145_v40 = vld [vmem:[#allocation2 + $0x84] sm:$0xe]  ;;  %v1894_v58 = vld [vmem:[#allocation2 + $0x80] sm:$0x1] }
 0x128   : > { %v1858_v19 = vsel %vm6318_vm14, %v1856_v61, %v1857_v51  ;;  %v2128_v27 = vrot.slane %v2126_v11, 4  ;;  %v2132_v6 = vshll.u32 %v1895_v59, 16  ;;  %v2089_v13 = vshrl.u32 %v1882_v15, 16 }
 0x129   : > { %v6988_v12 = vpop.permute.xlu1 %2592  ;;  %2492 = vrot.lane.b32.xlu0 %v5389_v4, %s5899_s19  ;;  %v5399_v53 = vcombine.low %v1855_v33, %v1858_v19  ;;  %v2092_v21 = vshll.u32 %v1882_v15, 16  ;;  %5664 = vmatmul.mubr.msk.bf16.vlgmr.msra.gmra.mrb[0].mxu0 %vm2904_vm0, %v2867_v10  ;;  %v5343_v62 = vcombine.low %v5804_v22, %v5805_v3  ;;  %v2120_v32 = vrot.slane %v2119_v50, 4  ;;  %v2144_v33 = vld [vmem:[#allocation2 + $0x78] sm:$0xe] }
 0x12a   : > { %v2531_v55 = vpop.permute.xlu0 %2530  ;;  %2604 = vrot.lane.b32.xlu1 %v5410_v47, %s5902_s22  ;;  %v2124_v25 = vrot.slane %v2122_v23, 5  ;;  %v2102_v34 = vshrl.u32 %v6983_v8, 16  ;;  %v5344_v28 = vcombine.low %v5806_v63, %v5807_v26  ;;  %v2134_v38 = vrot.slane %v2132_v6, 5 }
 0x12b   : > { %v2091_v39 = vrot.slane %v2089_v13, 4  ;;  %v2094_v16 = vrot.slane %v2092_v21, 5  ;;  %v5409_v7 = vcombine.low %v1882_v15, %v6983_v8  ;;  %v5340_v5 = vrot.slane %v2145_v40, 9 }
 0x12c   : > { %v2129_v1 = vor.u32 %v2128_v27, %v2124_v25  ;;  %v2241_v49 = vrot.slane %v6948_v36, 5  ;;  %v2244_v11 = vrot.slane %v1895_v59, 5  ;;  %v2098_v42 = vshll.u32 %v6983_v8, 16 }
 0x12d   : > { %2542 = vrot.lane.b32.xlu0 %v5399_v53, %s5901_s21  ;;  %v2095_v47 = vor.u32 %v2094_v16, %v2091_v39  ;;  %v2104_v9 = vrot.slane %v2102_v34, 4  ;;  %v2643_v45 = vpop.permute.xlu1 %2642  ;;  %v2125_v51 = vsel %vm6337_vm1, %v2120_v32, %v2124_v25  ;;  %v2108_v0 = vshll.u32 %v1894_v58, 16 }
 0x12e   : > { %v2130_v56 = vrot.slane %v2129_v1, 4  ;;  %v2243_v54 = vrot.slane %v2241_v49, 4  ;;  %v2591_v61 = vpop.permute.xlu0 %2590  ;;  %v2100_v15 = vrot.slane %v2098_v42, 5  ;;  %v2242_v59 = vsel %vm6318_vm14, %v5340_v5, %v2241_v49 }
 0x12f   : > { %v2096_v24 = vrot.slane %v2095_v47, 4  ;;  %v2110_v19 = vrot.slane %v2108_v0, 5  ;;  %v5339_v23 = vrot.slane %v2144_v33, 9  ;;  %v2715_v27 = vsel %vm2706_vm2, %v5343_v62, %v6857_v48 }
 0x130   : > { %v2135_v36 = vsel %vm6337_vm1, %v2130_v56, %v2134_v38  ;;  %v2245_v4 = vsel %vm6318_vm14, %v2243_v54, %v2244_v11  ;;  %v2105_v50 = vor.u32 %v2104_v9, %v2100_v15  ;;  %v2718_v6 = vsel %vm2706_vm2, %v5344_v28, %v6890_v14 }
 0x131   : > { %v5420_v10 = vcombine.low %v2125_v51, %v2135_v36  ;;  %2602 = vrot.lane.b32.xlu0 %v5409_v7, %s5902_s22  ;;  %v2234_v53 = vrot.slane %v6983_v8, 5  ;;  %v2237_v13 = vrot.slane %v1894_v58, 5  ;;  %v2743_v21 = vsel %vm2737_vm3, %v2715_v27, %v6919_v60  ;;  %v5810_v36 = vld [vmem:[#allocation2 + $0x3c] sm:$0xf] }
 0x132   : > { %v5430_v40 = vcombine.low %v2242_v59, %v2245_v4  ;;  %v2101_v22 = vsel %vm6337_vm1, %v2096_v24, %v2100_v15  ;;  %v2106_v3 = vrot.slane %v2105_v50, 4  ;;  %v2764_v48 = vsel %vm2758_vm4, %v2743_v21, %v6944_v43  ;;  %v5809_v24 = vld [vmem:[#allocation2 + $0x34] sm:$0xf] }
 0x133   : > { %2654 = vrot.lane.b32.xlu1 %v5420_v10, %s5903_s23  ;;  %v2325_v32 = vpop.permute.xlu1 %2324  ;;  %v2236_v62 = vrot.slane %v2234_v53, 4  ;;  %v2745_v14 = vsel %vm2737_vm3, %v2718_v6, %v6910_v35  ;;  %v2235_v60 = vsel %vm6318_vm14, %v5339_v23, %v2234_v53  ;;  %v2785_v34 = vsel %vm2779_vm5, %v2764_v48, %v6971_v31 }
 0x134   : > { %v2111_v8 = vsel %vm6337_vm1, %v2106_v3, %v2110_v19  ;;  %v2806_v43 = vsel %vm2800_vm6, %v2785_v34, %v2531_v55  ;;  %v5349_v35 = vcombine.low %v6773_v52, %v6779_v29  ;;  %v5350_v38 = vcombine.low %v6806_v17, %v6813_v41 }
 0x135   : > { %v2641_v25 = vpop.permute.xlu0 %2640  ;;  %v5419_v63 = vcombine.low %v2101_v22, %v2111_v8  ;;  %v2238_v26 = vsel %vm6318_vm14, %v2236_v62, %v2237_v13  ;;  %v2827_v28 = vsel %vm2821_vm10, %v2806_v43, %v2591_v61  ;;  %v2766_v39 = vsel %vm2758_vm4, %v2745_v14, %v6926_v20 }
 0x136   : > { %v5429_v31 = vcombine.low %v2235_v60, %v2238_v26  ;;  %v2848_v16 = vsel %vm2842_vm12, %v2827_v28, %v2641_v25  ;;  %v2787_v55 = vsel %vm2779_vm5, %v2766_v39, %v6950_v37  ;;  %v5905_v2 = vmov (!%p5309_p11), 0  }
 0x137   : > { %2704 = vrot.lane.b32.xlu1 %v5430_v40, %s5904_s27  ;;  %2652 = vrot.lane.b32.xlu0 %v5419_v63, %s5903_s23  ;;  %v2808_v5 = vsel %vm2800_vm6, %v2787_v55, %v6968_v30 }
 0x138   : > { %v2829_v20 = vsel %vm2821_vm10, %v2808_v5, %v6988_v12  ;;  %v5808_v12 = vld [vmem:[#allocation2 + $0x30] sm:$0xf]  ;;  %v5812_v5 = vld [vmem:[#allocation2 + $0x48] sm:$0xf] }
 0x139   : > { %v2691_v58 = vpop.permute.xlu0 %2690  ;;  %v2850_v49 = vsel %vm2842_vm12, %v2829_v20, %v2643_v45  ;;  %v5345_v15 = vcombine.low %v5808_v12, %v5809_v24  ;;  %v5811_v45 = vld [vmem:[#allocation2 + $0x40] sm:$0xf]  ;;  %v5813_v20 = vld [vmem:[#allocation2 + $0x4c] sm:$0xf] }
 0x13a   : > { %v2327_v1 = vpop.permute.xlu1 %2326  ;;  %v2869_v7 = vsel %vm2863_vm15, %v2848_v16, %v2691_v58  ;;  %v5346_v59 = vcombine.low %v5810_v36, %v5811_v45 }
 0x13b   : > { %5667 = vmatprep.mubr.msk.bf16.mxu0 %vm2904_vm0, %v2869_v7  ;;  %2702 = vrot.lane.b32.xlu0 %v5429_v31, %s5904_s27  ;;  %v2721_v10 = vsel %vm2706_vm2, %v5345_v15, %v2325_v32 }
 0x13c   : > { %v2724_v50 = vsel %vm2706_vm2, %v5346_v59, %v2327_v1 }
 0x13d   : > { %v2693_v11 = vpop.permute.xlu0 %2692 }
 0x13e   : > { %v2377_v47 = vpop.permute.xlu1 %2376  ;;  %v2871_v42 = vsel %vm2863_vm15, %v2850_v49, %v2693_v11  ;;  %v5347_v49 = vcombine.low %v5812_v5, %v5813_v20  ;;  %v7120_v20 = vld [vmem:[%s7912_s5] ss:$0 sm:$0xff] }
 0x13f   : > { %5668 = vmatmul.mubr.msk.bf16.gmra.mrb[4].mxu0 %vm2904_vm0, %v2871_v42  ;;  %v2749_v53 = vsel %vm2737_vm3, %v2724_v50, %v2377_v47  ;;  %v5814_v47 = vld [vmem:[#allocation2 + $0x54] sm:$0xf]  ;;  %v5815_v42 = vld [vmem:[#allocation2 + $0x58] sm:$0xf] }
 0x141   : > { %v2375_v37 = vpop.permute.xlu0 %2374 }
 0x142   : > { %v2437_v9 = vpop.permute.xlu1 %2436  ;;  %v2747_v19 = vsel %vm2737_vm3, %v2721_v10, %v2375_v37  ;;  %v5348_v37 = vcombine.low %v5814_v47, %v5815_v42 }
 0x143   : > { %v2770_v22 = vsel %vm2758_vm4, %v2749_v53, %v2437_v9 }
 0x145   : > { %v2435_v51 = vpop.permute.xlu0 %2434 }
 0x146   : > { %v2487_v56 = vpop.permute.xlu1 %2486  ;;  %v2768_v27 = vsel %vm2758_vm4, %v2747_v19, %v2435_v51 }
 0x147   : > { %v2791_v48 = vsel %vm2779_vm5, %v2770_v22, %v2487_v56 }
 0x14a   : > { %v2537_v30 = vpop.permute.xlu1 %2536 }
 0x14b   : > { %v2485_v54 = vpop.permute.xlu0 %2484  ;;  %v2812_v14 = vsel %vm2800_vm6, %v2791_v48, %v2537_v30 }
 0x14c   : > { %v2789_v13 = vsel %vm2779_vm5, %v2768_v27, %v2485_v54 }
 0x14e   : > { %v2597_v0 = vpop.permute.xlu1 %2596 }
 0x14f   : > { %v2535_v33 = vpop.permute.xlu0 %2534  ;;  %v2833_v8 = vsel %vm2821_vm10, %v2812_v14, %v2597_v0 }
 0x150   : > { %v2810_v21 = vsel %vm2800_vm6, %v2789_v13, %v2535_v33 }
 0x152   : > { %v2647_v61 = vpop.permute.xlu1 %2646 }
 0x153   : > { %v2595_v4 = vpop.permute.xlu0 %2594  ;;  %v2854_v60 = vsel %vm2842_vm12, %v2833_v8, %v2647_v61 }
 0x154   : > { %v2831_v40 = vsel %vm2821_vm10, %v2810_v21, %v2595_v4 }
 0x158   : > { %v2329_v23 = vpop.permute.xlu1 %2328 }
 0x159   : > { %v2727_v9 = vsel %vm2706_vm2, %v5347_v49, %v2329_v23 }
 0x15a   : > { %v2645_v6 = vpop.permute.xlu0 %2644 }
 0x15b   : > { %v2852_v3 = vsel %vm2842_vm12, %v2831_v40, %v2645_v6 }
 0x15e   : > { %v2695_v32 = vpop.permute.xlu0 %2694 }
 0x15f   : > { %v2331_v62 = vpop.permute.xlu1 %2330  ;;  %v2873_v25 = vsel %vm2863_vm15, %v2852_v3, %v2695_v32 }
 0x160   : > { %5671 = vmatprep.mubr.msk.bf16.mxu0 %vm2904_vm0, %v2873_v25  ;;  %v2730_v30 = vsel %vm2706_vm2, %v5348_v37, %v2331_v62 }
 0x162   : > { %v2697_v34 = vpop.permute.xlu0 %2696 }
 0x163   : > { %v2381_v63 = vpop.permute.xlu1 %2380  ;;  %v2875_v26 = vsel %vm2863_vm15, %v2854_v60, %v2697_v34 }
 0x164   : > { %5672 = vmatmul.mubr.msk.bf16.gmra.mrb[8].mxu0 %vm2904_vm0, %v2875_v26  ;;  %v2753_v12 = vsel %vm2737_vm3, %v2730_v30, %v2381_v63 }
 0x166   : > { %v2379_v43 = vpop.permute.xlu0 %2378 }
 0x167   : > { %v2441_v28 = vpop.permute.xlu1 %2440  ;;  %v2751_v51 = vsel %vm2737_vm3, %v2727_v9, %v2379_v43 }
 0x168   : > { %v2774_v4 = vsel %vm2758_vm4, %v2753_v12, %v2441_v28 }
 0x16a   : > { %v2439_v39 = vpop.permute.xlu0 %2438 }
 0x16b   : > { %v2491_v31 = vpop.permute.xlu1 %2490  ;;  %v2772_v54 = vsel %vm2758_vm4, %v2751_v51, %v2439_v39 }
 0x16c   : > { %v2795_v10 = vsel %vm2779_vm5, %v2774_v4, %v2491_v31 }
 0x16f   : > { %v2541_v16 = vpop.permute.xlu1 %2540 }
 0x170   : > { %v2489_v58 = vpop.permute.xlu0 %2488  ;;  %v2816_v50 = vsel %vm2800_vm6, %v2795_v10, %v2541_v16 }
 0x171   : > { %v2793_v33 = vsel %vm2779_vm5, %v2772_v54, %v2489_v58 }
 0x173   : > { %v2601_v55 = vpop.permute.xlu1 %2600 }
 0x174   : > { %v2539_v1 = vpop.permute.xlu0 %2538  ;;  %v2837_v19 = vsel %vm2821_vm10, %v2816_v50, %v2601_v55 }
 0x175   : > { %v2814_v61 = vsel %vm2800_vm6, %v2793_v33, %v2539_v1 }
 0x177   : > { %v2651_v7 = vpop.permute.xlu1 %2650 }
 0x178   : > { %v2599_v11 = vpop.permute.xlu0 %2598  ;;  %v2858_v27 = vsel %vm2842_vm12, %v2837_v19, %v2651_v7  ;;  %v7115_v7 = vld [vmem:[%s7911_s4] ss:$0 sm:$0xff] }
 0x179   : > { %v2835_v24 = vsel %vm2821_vm10, %v2814_v61, %v2599_v11 }
 0x17e   : > { %v2333_v56 = vpop.permute.xlu1 %2332 }
 0x17f   : > { %v2733_v60 = vsel %vm2706_vm2, %v5349_v35, %v2333_v56 }
 0x180   : > { %v2649_v0 = vpop.permute.xlu0 %2648 }
 0x181   : > { %v2856_v15 = vsel %vm2842_vm12, %v2835_v24, %v2649_v0 }
 0x184   : > { %v2699_v36 = vpop.permute.xlu0 %2698 }
 0x185   : > { %v2877_v59 = vsel %vm2863_vm15, %v2856_v15, %v2699_v36 }
 0x186   : > { %v2335_v45 = vpop.permute.xlu1 %2334  ;;  %5675 = vmatprep.mubr.msk.bf16.mxu0 %vm2904_vm0, %v2877_v59 }
 0x187   : > { %v2736_v14 = vsel %vm2706_vm2, %v5350_v38, %v2335_v45 }
 0x18a   : > { %v2385_v23 = vpop.permute.xlu1 %2384  ;;  %v2701_v6 = vpop.permute.xlu0 %2700 }
 0x18b   : > { %v2879_v53 = vsel %vm2863_vm15, %v2858_v27, %v2701_v6  ;;  %v2757_v34 = vsel %vm2737_vm3, %v2736_v14, %v2385_v23  ;;  %v3384_v27 = vld [vmem:[#allocation3 + $0xc] sm:$0xf] }
 0x18c   : > { %5676 = vmatmul.mubr.msk.bf16.gmra.mrb[12].mxu0 %vm2904_vm0, %v2879_v53 }
 0x18e   : > { %v2445_v13 = vpop.permute.xlu1 %2444 }
 0x18f   : > { %v2383_v21 = vpop.permute.xlu0 %2382  ;;  %v2778_v28 = vsel %vm2758_vm4, %v2757_v34, %v2445_v13 }
 0x190   : > { %v2755_v63 = vsel %vm2737_vm3, %v2733_v60, %v2383_v21 }
 0x193   : > { %v2443_v22 = vpop.permute.xlu0 %2442 }
 0x194   : > { %v2495_v40 = vpop.permute.xlu1 %2494  ;;  %v2776_v26 = vsel %vm2758_vm4, %v2755_v63, %v2443_v22  ;;  %v3381_v63 = vld [vmem:[#allocation3 + $0x8] sm:$0x1] }
 0x195   : > { %v2799_v17 = vsel %vm2779_vm5, %v2778_v28, %v2495_v40  ;;  %v3376_v40 = vld [vmem:[#allocation3] sm:$0xf] }
 0x198   : > { %v2545_v3 = vpop.permute.xlu1 %2544 }
 0x199   : > { %v2820_v38 = vsel %vm2800_vm6, %v2799_v17, %v2545_v3 }
 0x19b   : > { %v2493_v32 = vpop.permute.xlu0 %2492 }
 0x19c   : > { %v2605_v62 = vpop.permute.xlu1 %2604  ;;  %v2797_v39 = vsel %vm2779_vm5, %v2776_v26, %v2493_v32 }
 0x19d   : > { %v2841_v35 = vsel %vm2821_vm10, %v2820_v38, %v2605_v62 }
 0x19f   : > { %v2543_v48 = vpop.permute.xlu0 %2542 }
 0x1a0   : > { %v2818_v41 = vsel %vm2800_vm6, %v2797_v39, %v2543_v48  ;;  %v3388_v48 = vld [vmem:[#allocation3 + $0x14] sm:$0x1] }
 0x1a3   : > { %v2603_v25 = vpop.permute.xlu0 %2602 }
 0x1a4   : > { %v2839_v52 = vsel %vm2821_vm10, %v2818_v41, %v2603_v25 }
 0x1a5   : > { %v2655_v8 = vpop.permute.xlu1 %2654 }
 0x1a6   : > { %v2862_v58 = vsel %vm2842_vm12, %v2841_v35, %v2655_v8 }
 0x1a9   : > { %v2653_v43 = vpop.permute.xlu0 %2652  ;;  %v2705_v29 = vpop.permute.xlu1 %2704 }
 0x1aa   : > { %v2860_v31 = vsel %vm2842_vm12, %v2839_v52, %v2653_v43  ;;  %v2883_v1 = vsel %vm2863_vm15, %v2862_v58, %v2705_v29 }
 0x1ad   : > { %v2703_v16 = vpop.permute.xlu0 %2702 }
 0x1ae   : > { %v2881_v55 = vsel %vm2863_vm15, %v2860_v31, %v2703_v16 }
 0x1af   : > { %5679 = vmatprep.mubr.msk.bf16.mxu0 %vm2904_vm0, %v2881_v55 }
 0x1b0   : > { %5680 = vmatmul.mubr.msk.bf16.gmra.mrb[16].mxu0 %vm2904_vm0, %v2883_v1 }
 0x1fc   : > { %v5665_v5 = vpop.f32.mrb[0].mxu0 }
 0x1fd   : > { %v3051_v49 = vmul.f32 %v5665_v5, %v7115_v7  ;;  %v2963_v11 = vpop.f32.mrb[1].mxu0 }
 0x1fe   : > { %v3049_v47 = vmul.f32 %v7115_v7, %v2963_v11  ;;  %v5666_v42 = vpop.f32.mrb[2].mxu0 }
 0x1ff   : > { %v3078_v37 = vadd.f32 %v7120_v20, %v3051_v49  ;;  %v3052_v9 = vmul.f32 %v5666_v42, %v7115_v7  ;;  %v2966_v51 = vpop.f32.mrb[3].mxu0 }
 0x200   : > { %v3076_v56 = vadd.f32 %v7120_v20, %v3049_v47  ;;  %v3050_v30 = vmul.f32 %v7115_v7, %v2966_v51 }
 0x201   : > { %v3098_v54 = vmax.f32 %v3078_v37, 0.0  ;;  %v3079_v0 = vadd.f32 %v7120_v20, %v3052_v9 }
 0x202   : > { %v3096_v33 = vmax.f32 %v3076_v56, 0.0  ;;  %v3077_v61 = vadd.f32 %v7120_v20, %v3050_v30 }
 0x203   : > { %v5613_v12 = vpack.c.bf16 %v3098_v54, %v3098_v54  ;;  %v3099_v24 = vmax.f32 %v3079_v0, 0.0 }
 0x204   : > { %v5611_v15 = vpack.c.bf16 %v3096_v33, %v3096_v33  ;;  %v3097_v36 = vmax.f32 %v3077_v61, 0.0 }
 0x205   : > { %v3194_v45 = vshrl.u32 %v5613_v12, 16  ;;  %v5614_v59 = vpack.c.bf16 %v3099_v24, %v3099_v24  ;;  %v3197_v19 = vshll.u32 %v5613_v12, 16 }
 0x206   : > { %v3177_v4 = vshrl.u32 %v5611_v15, 16  ;;  %v5612_v10 = vpack.c.bf16 %v3097_v36, %v3097_v36  ;;  %v3180_v53 = vshll.u32 %v5611_v15, 16 }
 0x207   : > { %v3196_v50 = vrot.slane %v3194_v45, 7  ;;  %v3202_v23 = vshrl.u32 %v5614_v59, 16  ;;  %v3205_v3 = vshll.u32 %v5614_v59, 16  ;;  %v3398_v45 = vld [vmem:[#allocation3 + $0x24] sm:$0xf] }
 0x208   : > { %v3179_v6 = vrot.slane %v3177_v4, 7  ;;  %v3185_v13 = vshrl.u32 %v5612_v10, 16  ;;  %v3188_v25 = vshll.u32 %v5612_v10, 16 }
 0x209   : > { %v3199_v21 = vor.u32 %v3197_v19, %v3196_v50  ;;  %v3204_v22 = vrot.slane %v3202_v23, 7  ;;  %v3200_v14 = vrot.slane %v3196_v50, 4  ;;  %v3391_v19 = vld [vmem:[#allocation3 + $0x18] sm:$0xf] }
 0x20a   : > { %v3182_v32 = vor.u32 %v3180_v53, %v3179_v6  ;;  %v3187_v62 = vrot.slane %v3185_v13, 7  ;;  %v3183_v26 = vrot.slane %v3179_v6, 4  ;;  %v3402_v53 = vld [vmem:[#allocation3 + $0x2c] sm:$0x1] }
 0x20b   : > { %v3385_v8 = vsel %vm6074_vm9, %v3199_v21, %v3384_v27  ;;  %v3207_v60 = vor.u32 %v3205_v3, %v3204_v22  ;;  %v3209_v34 = vrot.slane %v3204_v22, 4 }
 0x20c   : > { %3386 = vst [vmem:[#allocation3 + $0xc] sm:$0xf] %v3385_v8  ;;  %v3377_v43 = vsel %vm6074_vm9, %v3182_v32, %v3376_v40  ;;  %v3190_v28 = vor.u32 %v3188_v25, %v3187_v62  ;;  %v3192_v39 = vrot.slane %v3187_v62, 4 }
 0x20d   : > { %3378 = vst [vmem:[#allocation3] sm:$0xf] %v3377_v43  ;;  %v3208_v17 = vsel %vm6137_vm11, %v3200_v14, %v3207_v60  ;;  %v3389_v41 = vsel %vm6048_vm8, %v3209_v34, %v3388_v48  ;;  %v3395_v48 = vld [vmem:[#allocation3 + $0x20] sm:$0x1] }
 0x20e   : > { %3387 = vst.msk [vmem:[#allocation3 + $0x10] sm:$0xf] %vm622_vm7, %v3208_v17  ;;  %3390 = vst [vmem:[#allocation3 + $0x14] sm:$0x1] %v3389_v41  ;;  %v3191_v38 = vsel %vm6137_vm11, %v3183_v26, %v3190_v28  ;;  %v3382_v52 = vsel %vm6048_vm8, %v3192_v39, %v3381_v63 }
 0x20f   : > { %3380 = vst.msk [vmem:[#allocation3 + $0x4] sm:$0xf] %vm622_vm7, %v3191_v38  ;;  %3383 = vst [vmem:[#allocation3 + $0x8] sm:$0x1] %v3382_v52 }
 0x210   : > { %3450 = vst.msk [vmem:[#allocation3] sm:$0xf] (!%p5309_p11), %vm622_vm7, %v5905_v2  ;;  %3451 = vst.msk [vmem:[#allocation3 + $0x4] sm:$0xf] (!%p5309_p11), %vm622_vm7, %v5905_v2 }
 0x211   : > { %3452 = vst.msk [vmem:[#allocation3 + $0x8] sm:$0xf] (!%p5309_p11), %vm622_vm7, %v5905_v2 }
 0x212   : > { %v5669_v29 = vpop.f32.mrb[4].mxu0 }
 0x213   : > { %v3055_v35 = vmul.f32 %v5669_v29, %v7115_v7  ;;  %v2979_v31 = vpop.f32.mrb[5].mxu0 }
 0x214   : > { %v3053_v16 = vmul.f32 %v7115_v7, %v2979_v31  ;;  %v5670_v58 = vpop.f32.mrb[6].mxu0 }
 0x215   : > { %v3082_v55 = vadd.f32 %v7120_v20, %v3055_v35  ;;  %v3056_v1 = vmul.f32 %v5670_v58, %v7115_v7  ;;  %v2982_v5 = vpop.f32.mrb[7].mxu0 }
 0x216   : > { %v3080_v49 = vadd.f32 %v7120_v20, %v3053_v16  ;;  %v3054_v11 = vmul.f32 %v7115_v7, %v2982_v5 }
 0x217   : > { %v3102_v47 = vmax.f32 %v3082_v55, 0.0  ;;  %v3083_v42 = vadd.f32 %v7120_v20, %v3056_v1 }
 0x218   : > { %v3100_v37 = vmax.f32 %v3080_v49, 0.0  ;;  %v3081_v9 = vadd.f32 %v7120_v20, %v3054_v11 }
 0x219   : > { %v5617_v51 = vpack.c.bf16 %v3102_v47, %v3102_v47  ;;  %v3103_v56 = vmax.f32 %v3083_v42, 0.0 }
 0x21a   : > { %v5615_v30 = vpack.c.bf16 %v3100_v37, %v3100_v37  ;;  %v3101_v54 = vmax.f32 %v3081_v9, 0.0 }
 0x21b   : > { %v3228_v0 = vshrl.u32 %v5617_v51, 16  ;;  %v5618_v33 = vpack.c.bf16 %v3103_v56, %v3103_v56  ;;  %v3231_v15 = vshll.u32 %v5617_v51, 16 }
 0x21c   : > { %v3211_v61 = vshrl.u32 %v5615_v30, 16  ;;  %v5616_v12 = vpack.c.bf16 %v3101_v54, %v3101_v54  ;;  %v3214_v4 = vshll.u32 %v5615_v30, 16 }
 0x21d   : > { %v3230_v24 = vrot.slane %v3228_v0, 7  ;;  %v3236_v36 = vshrl.u32 %v5618_v33, 16  ;;  %v3239_v27 = vshll.u32 %v5618_v33, 16  ;;  %v3412_v0 = vld [vmem:[#allocation3 + $0x3c] sm:$0xf] }
 0x21e   : > { %v3213_v59 = vrot.slane %v3211_v61, 7  ;;  %v3219_v10 = vshrl.u32 %v5616_v12, 16  ;;  %v3222_v21 = vshll.u32 %v5616_v12, 16 }
 0x21f   : > { %v3233_v50 = vor.u32 %v3231_v15, %v3230_v24  ;;  %v3238_v23 = vrot.slane %v3236_v36, 7  ;;  %v3234_v40 = vrot.slane %v3230_v24, 4  ;;  %v3405_v15 = vld [vmem:[#allocation3 + $0x30] sm:$0xf] }
 0x220   : > { %v3216_v6 = vor.u32 %v3214_v4, %v3213_v59  ;;  %v3221_v13 = vrot.slane %v3219_v10, 7  ;;  %v3217_v62 = vrot.slane %v3213_v59, 4  ;;  %v3416_v4 = vld [vmem:[#allocation3 + $0x44] sm:$0x1] }
 0x221   : > { %v3399_v22 = vsel %vm6074_vm9, %v3233_v50, %v3398_v45  ;;  %v3241_v3 = vor.u32 %v3239_v27, %v3238_v23  ;;  %v3243_v32 = vrot.slane %v3238_v23, 4 }
 0x222   : > { %3400 = vst [vmem:[#allocation3 + $0x24] sm:$0xf] %v3399_v22  ;;  %v3392_v25 = vsel %vm6074_vm9, %v3216_v6, %v3391_v19  ;;  %v3224_v14 = vor.u32 %v3222_v21, %v3221_v13  ;;  %v3226_v8 = vrot.slane %v3221_v13, 4 }
 0x223   : > { %3393 = vst [vmem:[#allocation3 + $0x18] sm:$0xf] %v3392_v25  ;;  %v3242_v60 = vsel %vm6137_vm11, %v3234_v40, %v3241_v3  ;;  %v3403_v34 = vsel %vm6048_vm8, %v3243_v32, %v3402_v53  ;;  %v3409_v53 = vld [vmem:[#allocation3 + $0x38] sm:$0x1] }
 0x224   : > { %3401 = vst.msk [vmem:[#allocation3 + $0x28] sm:$0xf] %vm622_vm7, %v3242_v60  ;;  %3404 = vst [vmem:[#allocation3 + $0x2c] sm:$0x1] %v3403_v34  ;;  %v3225_v63 = vsel %vm6137_vm11, %v3217_v62, %v3224_v14  ;;  %v3396_v26 = vsel %vm6048_vm8, %v3226_v8, %v3395_v48 }
 0x225   : > { %3394 = vst.msk [vmem:[#allocation3 + $0x1c] sm:$0xf] %vm622_vm7, %v3225_v63  ;;  %3397 = vst [vmem:[#allocation3 + $0x20] sm:$0x1] %v3396_v26 }
 0x237   : > { %v5673_v43 = vpop.f32.mrb[8].mxu0 }
 0x238   : > { %v3059_v28 = vmul.f32 %v5673_v43, %v7115_v7  ;;  %v2995_v39 = vpop.f32.mrb[9].mxu0 }
 0x239   : > { %v3057_v17 = vmul.f32 %v7115_v7, %v2995_v39  ;;  %v5674_v41 = vpop.f32.mrb[10].mxu0 }
 0x23a   : > { %v3086_v38 = vadd.f32 %v7120_v20, %v3059_v28  ;;  %v3060_v52 = vmul.f32 %v5674_v41, %v7115_v7  ;;  %v2998_v29 = vpop.f32.mrb[11].mxu0 }
 0x23b   : > { %v3084_v35 = vadd.f32 %v7120_v20, %v3057_v17  ;;  %v3058_v31 = vmul.f32 %v7115_v7, %v2998_v29 }
 0x23c   : > { %v3106_v16 = vmax.f32 %v3086_v38, 0.0  ;;  %v3087_v58 = vadd.f32 %v7120_v20, %v3060_v52 }
 0x23d   : > { %v3104_v55 = vmax.f32 %v3084_v35, 0.0  ;;  %v3085_v1 = vadd.f32 %v7120_v20, %v3058_v31 }
 0x23e   : > { %v5621_v5 = vpack.c.bf16 %v3106_v16, %v3106_v16  ;;  %v3107_v49 = vmax.f32 %v3087_v58, 0.0 }
 0x23f   : > { %v5619_v11 = vpack.c.bf16 %v3104_v55, %v3104_v55  ;;  %v3105_v47 = vmax.f32 %v3085_v1, 0.0 }
 0x240   : > { %v3262_v42 = vshrl.u32 %v5621_v5, 16  ;;  %v5622_v37 = vpack.c.bf16 %v3107_v49, %v3107_v49  ;;  %v3265_v30 = vshll.u32 %v5621_v5, 16 }
 0x241   : > { %v3245_v9 = vshrl.u32 %v5619_v11, 16  ;;  %v5620_v51 = vpack.c.bf16 %v3105_v47, %v3105_v47  ;;  %v3248_v61 = vshll.u32 %v5619_v11, 16 }
 0x242   : > { %v3264_v56 = vrot.slane %v3262_v42, 7  ;;  %v3270_v54 = vshrl.u32 %v5622_v37, 16  ;;  %v3273_v45 = vshll.u32 %v5622_v37, 16  ;;  %v3426_v42 = vld [vmem:[#allocation3 + $0x54] sm:$0xf] }
 0x243   : > { %v3247_v33 = vrot.slane %v3245_v9, 7  ;;  %v3253_v12 = vshrl.u32 %v5620_v51, 16  ;;  %v3256_v50 = vshll.u32 %v5620_v51, 16 }
 0x244   : > { %v3267_v24 = vor.u32 %v3265_v30, %v3264_v56  ;;  %v3272_v36 = vrot.slane %v3270_v54, 7  ;;  %v3268_v19 = vrot.slane %v3264_v56, 4  ;;  %v3419_v30 = vld [vmem:[#allocation3 + $0x48] sm:$0xf] }
 0x245   : > { %v3250_v59 = vor.u32 %v3248_v61, %v3247_v33  ;;  %v3255_v10 = vrot.slane %v3253_v12, 7  ;;  %v3251_v13 = vrot.slane %v3247_v33, 4  ;;  %v3430_v61 = vld [vmem:[#allocation3 + $0x5c] sm:$0x1] }
 0x246   : > { %v3413_v23 = vsel %vm6074_vm9, %v3267_v24, %v3412_v0  ;;  %v3275_v27 = vor.u32 %v3273_v45, %v3272_v36  ;;  %v3277_v6 = vrot.slane %v3272_v36, 4 }
 0x247   : > { %3414 = vst [vmem:[#allocation3 + $0x3c] sm:$0xf] %v3413_v23  ;;  %v3406_v21 = vsel %vm6074_vm9, %v3250_v59, %v3405_v15  ;;  %v3258_v40 = vor.u32 %v3256_v50, %v3255_v10  ;;  %v3260_v22 = vrot.slane %v3255_v10, 4 }
 0x248   : > { %3407 = vst [vmem:[#allocation3 + $0x30] sm:$0xf] %v3406_v21  ;;  %v3276_v3 = vsel %vm6137_vm11, %v3268_v19, %v3275_v27  ;;  %v3417_v32 = vsel %vm6048_vm8, %v3277_v6, %v3416_v4  ;;  %v3423_v4 = vld [vmem:[#allocation3 + $0x50] sm:$0x1] }
 0x249   : > { %3415 = vst.msk [vmem:[#allocation3 + $0x40] sm:$0xf] %vm622_vm7, %v3276_v3  ;;  %3418 = vst [vmem:[#allocation3 + $0x44] sm:$0x1] %v3417_v32  ;;  %v3259_v48 = vsel %vm6137_vm11, %v3251_v13, %v3258_v40  ;;  %v3410_v62 = vsel %vm6048_vm8, %v3260_v22, %v3409_v53 }
 0x24a   : > { %3408 = vst.msk [vmem:[#allocation3 + $0x34] sm:$0xf] %vm622_vm7, %v3259_v48  ;;  %3411 = vst [vmem:[#allocation3 + $0x38] sm:$0x1] %v3410_v62 }
 0x25f   : > { %v5677_v25 = vpop.f32.mrb[12].mxu0 }
 0x260   : > { %v3063_v14 = vmul.f32 %v5677_v25, %v7115_v7  ;;  %v3011_v8 = vpop.f32.mrb[13].mxu0 }
 0x261   : > { %v3061_v60 = vmul.f32 %v7115_v7, %v3011_v8  ;;  %v5678_v34 = vpop.f32.mrb[14].mxu0 }
 0x262   : > { %v3090_v63 = vadd.f32 %v7120_v20, %v3063_v14  ;;  %v3064_v26 = vmul.f32 %v5678_v34, %v7115_v7  ;;  %v3014_v43 = vpop.f32.mrb[15].mxu0 }
 0x263   : > { %v3088_v28 = vadd.f32 %v7120_v20, %v3061_v60  ;;  %v3062_v39 = vmul.f32 %v7115_v7, %v3014_v43 }
 0x264   : > { %v3110_v17 = vmax.f32 %v3090_v63, 0.0  ;;  %v3091_v41 = vadd.f32 %v7120_v20, %v3064_v26 }
 0x265   : > { %v3108_v38 = vmax.f32 %v3088_v28, 0.0  ;;  %v3089_v52 = vadd.f32 %v7120_v20, %v3062_v39 }
 0x266   : > { %v5625_v29 = vpack.c.bf16 %v3110_v17, %v3110_v17  ;;  %v3111_v35 = vmax.f32 %v3091_v41, 0.0 }
 0x267   : > { %v5623_v31 = vpack.c.bf16 %v3108_v38, %v3108_v38  ;;  %v3109_v16 = vmax.f32 %v3089_v52, 0.0 }
 0x268   : > { %v3296_v58 = vshrl.u32 %v5625_v29, 16  ;;  %v5626_v55 = vpack.c.bf16 %v3111_v35, %v3111_v35  ;;  %v3299_v11 = vshll.u32 %v5625_v29, 16 }
 0x269   : > { %v3279_v1 = vshrl.u32 %v5623_v31, 16  ;;  %v5624_v5 = vpack.c.bf16 %v3109_v16, %v3109_v16  ;;  %v3282_v9 = vshll.u32 %v5623_v31, 16 }
 0x26a   : > { %v3298_v49 = vrot.slane %v3296_v58, 7  ;;  %v3304_v47 = vshrl.u32 %v5626_v55, 16  ;;  %v3307_v0 = vshll.u32 %v5626_v55, 16  ;;  %v3440_v58 = vld [vmem:[#allocation3 + $0x6c] sm:$0xf] }
 0x26b   : > { %v3281_v37 = vrot.slane %v3279_v1, 7  ;;  %v3287_v51 = vshrl.u32 %v5624_v5, 16  ;;  %v3290_v24 = vshll.u32 %v5624_v5, 16 }
 0x26c   : > { %v3301_v56 = vor.u32 %v3299_v11, %v3298_v49  ;;  %v3306_v54 = vrot.slane %v3304_v47, 7  ;;  %v3302_v15 = vrot.slane %v3298_v49, 4  ;;  %v3433_v49 = vld [vmem:[#allocation3 + $0x60] sm:$0xf] }
 0x26d   : > { %v3284_v33 = vor.u32 %v3282_v9, %v3281_v37  ;;  %v3289_v12 = vrot.slane %v3287_v51, 7  ;;  %v3285_v10 = vrot.slane %v3281_v37, 4 }
 0x26e   : > { %v3427_v36 = vsel %vm6074_vm9, %v3301_v56, %v3426_v42  ;;  %v3309_v45 = vor.u32 %v3307_v0, %v3306_v54  ;;  %v3311_v59 = vrot.slane %v3306_v54, 4  ;;  %v3444_v42 = vld [vmem:[#allocation3 + $0x74] sm:$0x1]  ;;  %v3437_v0 = vld [vmem:[#allocation3 + $0x68] sm:$0x1] }
 0x26f   : > { %3428 = vst [vmem:[#allocation3 + $0x54] sm:$0xf] %v3427_v36  ;;  %v3420_v50 = vsel %vm6074_vm9, %v3284_v33, %v3419_v30  ;;  %v3292_v19 = vor.u32 %v3290_v24, %v3289_v12  ;;  %v3294_v23 = vrot.slane %v3289_v12, 4 }
 0x270   : > { %3421 = vst [vmem:[#allocation3 + $0x48] sm:$0xf] %v3420_v50  ;;  %v3310_v27 = vsel %vm6137_vm11, %v3302_v15, %v3309_v45  ;;  %v3431_v6 = vsel %vm6048_vm8, %v3311_v59, %v3430_v61 }
 0x271   : > { %3429 = vst.msk [vmem:[#allocation3 + $0x58] sm:$0xf] %vm622_vm7, %v3310_v27  ;;  %3432 = vst [vmem:[#allocation3 + $0x5c] sm:$0x1] %v3431_v6  ;;  %v3293_v53 = vsel %vm6137_vm11, %v3285_v10, %v3292_v19  ;;  %v3424_v13 = vsel %vm6048_vm8, %v3294_v23, %v3423_v4 }
 0x272   : > { %3422 = vst.msk [vmem:[#allocation3 + $0x4c] sm:$0xf] %vm622_vm7, %v3293_v53  ;;  %3425 = vst [vmem:[#allocation3 + $0x50] sm:$0x1] %v3424_v13 }
 0x283   : > { %v5681_v21 = vpop.f32.mrb[16].mxu0 }
 0x284   : > { %v3067_v40 = vmul.f32 %v5681_v21, %v7115_v7  ;;  %v3027_v22 = vpop.f32.mrb[17].mxu0 }
 0x285   : > { %v3065_v3 = vmul.f32 %v7115_v7, %v3027_v22  ;;  %v5682_v32 = vpop.f32.mrb[18].mxu0 }
 0x286   : > { %v3094_v48 = vadd.f32 %v7120_v20, %v3067_v40  ;;  %v3068_v62 = vmul.f32 %v5682_v32, %v7115_v7  ;;  %v3030_v25 = vpop.f32.mrb[19].mxu0 }
 0x287   : > { %v3092_v14 = vadd.f32 %v7120_v20, %v3065_v3  ;;  %v3066_v8 = vmul.f32 %v7115_v7, %v3030_v25 }
 0x288   : > { %v3114_v60 = vmax.f32 %v3094_v48, 0.0  ;;  %v3095_v34 = vadd.f32 %v7120_v20, %v3068_v62 }
 0x289   : > { %v3112_v63 = vmax.f32 %v3092_v14, 0.0  ;;  %v3093_v26 = vadd.f32 %v7120_v20, %v3066_v8 }
 0x28a   : > { %v5629_v43 = vpack.c.bf16 %v3114_v60, %v3114_v60  ;;  %v3115_v28 = vmax.f32 %v3095_v34, 0.0 }
 0x28b   : > { %v5627_v39 = vpack.c.bf16 %v3112_v63, %v3112_v63  ;;  %v3113_v17 = vmax.f32 %v3093_v26, 0.0 }
 0x28c   : > { %v3330_v41 = vshrl.u32 %v5629_v43, 16  ;;  %v5630_v38 = vpack.c.bf16 %v3115_v28, %v3115_v28  ;;  %v3333_v31 = vshll.u32 %v5629_v43, 16 }
 0x28d   : > { %v3313_v52 = vshrl.u32 %v5627_v39, 16  ;;  %v5628_v29 = vpack.c.bf16 %v3113_v17, %v3113_v17  ;;  %v3316_v7 = vshll.u32 %v5627_v39, 16 }
 0x28e   : > { %v3332_v35 = vrot.slane %v3330_v41, 7  ;;  %v3338_v16 = vshrl.u32 %v5630_v38, 16  ;;  %v3341_v47 = vshll.u32 %v5630_v38, 16 }
 0x28f   : > { %v3315_v55 = vrot.slane %v3313_v52, 7  ;;  %v3321_v1 = vshrl.u32 %v5628_v29, 16  ;;  %v3324_v9 = vshll.u32 %v5628_v29, 16 }
 0x290   : > { %v3335_v5 = vor.u32 %v3333_v31, %v3332_v35  ;;  %v3340_v11 = vrot.slane %v3338_v16, 7  ;;  %v3336_v51 = vrot.slane %v3332_v35, 4  ;;  %3449 = sbr.rel (%p5309_p11) target bundleno = 663 (0x297), region = 68 }
 0x291   : > { %v3318_v20 = vor.u32 %v3316_v7, %v3315_v55  ;;  %v3323_v37 = vrot.slane %v3321_v1, 7  ;;  %v3319_v33 = vrot.slane %v3315_v55, 4 }
 0x292   : > { %v3441_v56 = vsel %vm6074_vm9, %v3335_v5, %v3440_v58  ;;  %v3343_v30 = vor.u32 %v3341_v47, %v3340_v11  ;;  %v3345_v54 = vrot.slane %v3340_v11, 4 }
 0x293   : > { %3442 = vst [vmem:[#allocation3 + $0x6c] sm:$0xf] %v3441_v56  ;;  %v3434_v61 = vsel %vm6074_vm9, %v3318_v20, %v3433_v49  ;;  %v3326_v12 = vor.u32 %v3324_v9, %v3323_v37  ;;  %v3328_v24 = vrot.slane %v3323_v37, 4 }
 0x294   : > { %3435 = vst [vmem:[#allocation3 + $0x60] sm:$0xf] %v3434_v61  ;;  %v3344_v15 = vsel %vm6137_vm11, %v3336_v51, %v3343_v30  ;;  %v3445_v36 = vsel %vm6048_vm8, %v3345_v54, %v3444_v42 }
 0x295   : > { %3443 = vst.msk [vmem:[#allocation3 + $0x70] sm:$0xf] %vm622_vm7, %v3344_v15  ;;  %3446 = vst [vmem:[#allocation3 + $0x74] sm:$0x1] %v3445_v36  ;;  %v3327_v45 = vsel %vm6137_vm11, %v3319_v33, %v3326_v12  ;;  %v3438_v59 = vsel %vm6048_vm8, %v3328_v24, %v3437_v0 }
 0x296   : > { %3436 = vst.msk [vmem:[#allocation3 + $0x64] sm:$0xf] %vm622_vm7, %v3327_v45  ;;  %3439 = vst [vmem:[#allocation3 + $0x68] sm:$0x1] %v3438_v59 }
 0x297 PF: > { %3455 = sbr.rel (%p5310_p12) target bundleno = 670 (0x29e), region = 72  ;;  %v5906_v57 = vmov (!%p5310_p12), 0  }
 0x298   : > { %3457 = vst.msk [vmem:[#allocation3 + $0x6c] sm:$0xf] (!%p5310_p12), %vm622_vm7, %v5906_v57  ;;  %3458 = vst.msk [vmem:[#allocation3 + $0x70] sm:$0xf] (!%p5310_p12), %vm622_vm7, %v5906_v57 }
 0x299   : > { %3459 = vst.msk [vmem:[#allocation3 + $0x74] sm:$0xf] (!%p5310_p12), %vm622_vm7, %v5906_v57 }
 0x29e PF: > { %v3767_v44 = vld [vmem:[#allocation3 + $0x18] sm:$0xf]  ;;  %v7242_v4 = vld [vmem:[#allocation3 + $0x1c] sm:$0xf]  ;;  %v3765_v10 = vld [vmem:[#allocation3 + $0xc] sm:$0xf] }
 0x29f   : > { %v5517_v50 = vcombine.low %v3767_v44, %v7242_v4  ;;  %v3814_v19 = vshrl.u32 %v3767_v44, 16  ;;  %v3817_v23 = vshll.u32 %v3767_v44, 16  ;;  %v7245_v27 = vld [vmem:[#allocation3 + $0x10] sm:$0xf]  ;;  %v3790_v6 = vshrl.u32 %v3765_v10, 16  ;;  %s5907_s30 = smov 40  }
 0x2a0   : > { %v5516_v53 = vcombine.low %v3765_v10, %v7245_v27  ;;  %v3793_v13 = vshll.u32 %v3765_v10, 16  ;;  %v3461_v21 = vld [vmem:[#allocation3 + $0x4] sm:$0xf]  ;;  %v3476_v40 = vld [vmem:[#allocation3 + $0x8] sm:$0x1]  ;;  %v3823_v22 = vshll.u32 %v7242_v4, 16 }
 0x2a1   : > { %4520 = vrot.lane.b32.xlu1 %v5517_v50, %s5902_s22  ;;  %v3816_v3 = vrot.slane %v3814_v19, 4  ;;  %v3819_v32 = vrot.slane %v3817_v23, 5  ;;  %v7250_v48 = vrot.slane %v3790_v6, 4  ;;  %v3676_v62 = vld [vmem:[#allocation3] sm:$0xe]  ;;  %v3710_v25 = vrot.slane %v3461_v21, 5 }
 0x2a2   : > { %4518 = vrot.lane.b32.xlu0 %v5516_v53, %s5902_s22  ;;  %v7253_v14 = vrot.slane %v3793_v13, 5  ;;  %v5468_v8 = vrot.slane %v3676_v62, 9  ;;  %v3713_v60 = vrot.slane %v3476_v40, 5  ;;  %v3463_v34 = vld [vmem:[#allocation3 + $0x10] sm:$0xf]  ;;  %v3494_v63 = vshll.u32 %v3461_v21, 16 }
 0x2a3   : > { %v3712_v26 = vrot.slane %v3710_v25, 4  ;;  %v3477_v43 = vld [vmem:[#allocation3 + $0x14] sm:$0x1]  ;;  %v3677_v28 = vld [vmem:[#allocation3 + $0xc] sm:$0xe]  ;;  %v3717_v39 = vrot.slane %v3463_v34, 5  ;;  %v3820_v17 = vor.u32 %v3819_v32, %v3816_v3 }
 0x2a4   : > { %v3711_v41 = vsel %vm6318_vm14, %v5468_v8, %v3710_v25  ;;  %v5469_v38 = vrot.slane %v3677_v28, 9  ;;  %v3720_v52 = vrot.slane %v3477_v43, 5  ;;  %v3460_v29 = vld [vmem:[#allocation3] sm:$0xf]  ;;  %v3496_v35 = vrot.slane %v3494_v63, 5  ;;  %s5908_s24 = smov 48  }
 0x2a5   : > { %v3714_v31 = vsel %vm6318_vm14, %v3712_v26, %v3713_v60  ;;  %v3719_v16 = vrot.slane %v3717_v39, 4  ;;  %v3485_v58 = vshrl.u32 %v3460_v29, 16  ;;  %v3488_v55 = vshll.u32 %v3460_v29, 16  ;;  %v3782_v11 = vld [vmem:[#allocation3 + $0x20] sm:$0x1]  ;;  %s5909_s20 = smov 56  }
 0x2a6   : > { %v5508_v7 = vcombine.low %v3711_v41, %v3714_v31  ;;  %v3718_v1 = vsel %vm6318_vm14, %v5469_v38, %v3717_v39  ;;  %v3498_v5 = vshrl.u32 %v3461_v21, 16  ;;  %v3504_v49 = vshll.u32 %v3476_v40, 16  ;;  %v3462_v47 = vld [vmem:[#allocation3 + $0xc] sm:$0xf]  ;;  %v3982_v59 = vld [vmem:[#allocation3 + $0x18] sm:$0xe] }
 0x2a7   : > { %v3721_v20 = vsel %vm6318_vm14, %v3719_v16, %v3720_v52  ;;  %v3487_v42 = vrot.slane %v3485_v58, 4  ;;  %v3490_v37 = vrot.slane %v3488_v55, 5  ;;  %v3821_v9 = vrot.slane %v3820_v17, 4  ;;  %v3781_v17 = vld [vmem:[#allocation3 + $0x14] sm:$0x1]  ;;  %s5910_s26 = smov 64  }
 0x2a8   : > { %4470 = vrot.lane.b32.xlu1 %v5508_v7, %s5899_s19  ;;  %v5509_v51 = vcombine.low %v3718_v1, %v3721_v20  ;;  %v3500_v56 = vrot.slane %v3498_v5, 4  ;;  %v3506_v30 = vrot.slane %v3504_v49, 5  ;;  %v3825_v54 = vrot.slane %v3823_v22, 5  ;;  %v4072_v52 = vld [vmem:[#allocation3 + $0x24] sm:$0xf] }
 0x2a9   : > { %v3491_v0 = vor.u32 %v3490_v37, %v3487_v42  ;;  %v3827_v33 = vshrl.u32 %v7242_v4, 16  ;;  %v3833_v61 = vshll.u32 %v3782_v11, 16  ;;  %v3509_v12 = vshrl.u32 %v3462_v47, 16  ;;  %v3981_v5 = vld [vmem:[#allocation3 + $0xc] sm:$0xe] }
 0x2aa   : > { %v3501_v24 = vor.u32 %v3500_v56, %v3496_v35  ;;  %v3826_v15 = vsel %vm6337_vm1, %v3821_v9, %v3825_v54  ;;  %v3512_v36 = vshll.u32 %v3462_v47, 16  ;;  %v3518_v45 = vshll.u32 %v3463_v34, 16  ;;  %v7289_v49 = vld [vmem:[#allocation3 + $0x28] sm:$0xf]  ;;  %v7296_v56 = vld [vmem:[#allocation3 + $0x18] sm:$0xf] }
 0x2ab   : > { %v3492_v2 = vrot.slane %v3491_v0, 4  ;;  %v3829_v57 = vrot.slane %v3827_v33, 4  ;;  %v3835_v44 = vrot.slane %v3833_v61, 5  ;;  %v3511_v10 = vrot.slane %v3509_v12, 4 }
 0x2ac   : > { %4472 = vrot.lane.b32.xlu1 %v5509_v51, %s5899_s19  ;;  %v3502_v50 = vrot.slane %v3501_v24, 4  ;;  %v3514_v19 = vrot.slane %v3512_v36, 5  ;;  %v3520_v23 = vrot.slane %v3518_v45, 5  ;;  %v3522_v6 = vshrl.u32 %v3463_v34, 16  ;;  %v7294_v51 = vld [vmem:[#allocation3 + $0x2c] sm:$0x1] }
 0x2ad   : > { %v3497_v53 = vsel %vm6337_vm1, %v3492_v2, %v3496_v35  ;;  %v3830_v13 = vor.u32 %v3829_v57, %v3825_v54  ;;  %v3528_v21 = vshll.u32 %v3477_v43, 16  ;;  %v5477_v40 = vrot.slane %v3982_v59, 9 }
 0x2ae   : > { %v3507_v22 = vsel %vm6337_vm1, %v3502_v50, %v3506_v30  ;;  %v3515_v3 = vor.u32 %v3514_v19, %v3511_v10  ;;  %v3524_v32 = vrot.slane %v3522_v6, 4  ;;  %v4022_v62 = vrot.slane %v7242_v4, 5  ;;  %v7309_v50 = vld [vmem:[#allocation3 + $0x1c] sm:$0xf]  ;;  %v3464_v19 = vld [vmem:[#allocation3 + $0x18] sm:$0xf] }
 0x2af   : > { %v5500_v25 = vcombine.low %v3497_v53, %v3507_v22  ;;  %v3831_v8 = vrot.slane %v3830_v13, 4  ;;  %v3530_v60 = vrot.slane %v3528_v21, 5  ;;  %v4025_v63 = vrot.slane %v3782_v11, 5  ;;  %v7311_v21 = vld [vmem:[#allocation3 + $0x1c] sm:$0xf] }
 0x2b0   : > { %v3516_v26 = vrot.slane %v3515_v3, 4  ;;  %v3525_v28 = vor.u32 %v3524_v32, %v3520_v23  ;;  %v4023_v34 = vsel %vm6318_vm14, %v5477_v40, %v4022_v62  ;;  %v4024_v39 = vrot.slane %v4022_v62, 4  ;;  %v7318_v62 = vld [vmem:[#allocation3 + $0x20] sm:$0x1] }
 0x2b1   : > { %4430 = vrot.lane.b32.xlu0 %v5500_v25, %s5898_s17  ;;  %v3836_v43 = vsel %vm6337_vm1, %v3831_v8, %v3835_v44  ;;  %v3796_v41 = vor.u32 %v7253_v14, %v7250_v48  ;;  %v3799_v4 = vshll.u32 %v7245_v27, 16  ;;  %v3803_v38 = vshrl.u32 %v7245_v27, 16 }
 0x2b2   : > { %v5525_v29 = vcombine.low %v3826_v15, %v3836_v43  ;;  %v3521_v35 = vsel %vm6337_vm1, %v3516_v26, %v3520_v23  ;;  %v3526_v31 = vrot.slane %v3525_v28, 4  ;;  %v4026_v16 = vsel %vm6318_vm14, %v4024_v39, %v4025_v63  ;;  %v5834_v26 = vld [vmem:[%s7913_s6] sm:$0xff]  }
 0x2b3   : > { %v5533_v58 = vcombine.low %v4023_v34, %v4026_v16  ;;  %v3797_v55 = vrot.slane %v3796_v41, 4  ;;  %v3801_v7 = vrot.slane %v3799_v4, 5  ;;  %v3805_v1 = vrot.slane %v3803_v38, 4  ;;  %v7330_v38 = vld [vmem:[#allocation3 + $0x20] sm:$0x1]  ;;  %5683 = vmatprep.subr.bf16.mxu1 %v5834_v26 }
 0x2b4   : > { %4560 = vrot.lane.b32.xlu1 %v5525_v29, %s5904_s27  ;;  %v3531_v48 = vsel %vm6337_vm1, %v3526_v31, %v3530_v60  ;;  %v3809_v14 = vshll.u32 %v3781_v17, 16  ;;  %v4119_v11 = vshrl.u32 %v4072_v52, 16  ;;  %v4122_v47 = vshll.u32 %v4072_v52, 16  ;;  %5684 = vmatpush3.bf16.msra.mxu1 %v5834_v26 }
 0x2b5   : > { %v5501_v20 = vcombine.low %v3521_v35, %v3531_v48  ;;  %v3802_v42 = vsel %vm6337_vm1, %v3797_v55, %v3801_v7  ;;  %v3806_v37 = vor.u32 %v3805_v1, %v3801_v7  ;;  %v5541_v9 = vcombine.low %v4072_v52, %v7289_v49  ;;  %v5835_v55 = vld [vmem:[%s7913_s6 + $0x8] sm:$0xff]  }
 0x2b6   : > { %v3811_v30 = vrot.slane %v3809_v14, 5  ;;  %v4121_v54 = vrot.slane %v4119_v11, 4  ;;  %v4124_v0 = vrot.slane %v4122_v47, 5  ;;  %v5476_v33 = vrot.slane %v3981_v5, 9  ;;  %v7340_v14 = vld [vmem:[#allocation3 + $0x28] sm:$0xf]  ;;  %5685 = vmatprep.subr.bf16.mxu1 %v5835_v55 }
 0x2b7   : > { %4432 = vrot.lane.b32.xlu0 %v5501_v20, %s5898_s17  ;;  %v3807_v61 = vrot.slane %v3806_v37, 4  ;;  %v4015_v12 = vrot.slane %v7245_v27, 5  ;;  %v4018_v24 = vrot.slane %v3781_v17, 5  ;;  %v4128_v15 = vshll.u32 %v7289_v49, 16  ;;  %v5836_v11 = vld [vmem:[%s7913_s6 + $0x10] sm:$0xff]  }
 0x2b8   : > { %4600 = vrot.lane.b32.xlu1 %v5533_v58, %s5907_s30  ;;  %v4125_v36 = vor.u32 %v4124_v0, %v4121_v54  ;;  %v4132_v45 = vshrl.u32 %v7289_v49, 16  ;;  %v4138_v59 = vshll.u32 %v7294_v51, 16  ;;  %v4095_v2 = vshrl.u32 %v7296_v56, 16  ;;  %v3466_v58 = vld [vmem:[#allocation3 + $0x24] sm:$0xf]  ;;  %5686 = vmatpush3.bf16.msra.mxu1 %v5835_v55 }
 0x2b9   : > { %v3812_v57 = vsel %vm6337_vm1, %v3807_v61, %v3811_v30  ;;  %v4016_v44 = vsel %vm6318_vm14, %v5476_v33, %v4015_v12  ;;  %v4017_v27 = vrot.slane %v4015_v12, 4  ;;  %v4130_v10 = vrot.slane %v4128_v15, 5  ;;  %v3479_v12 = vld [vmem:[#allocation3 + $0x2c] sm:$0x1]  ;;  %5687 = vmatprep.subr.bf16.mxu1 %v5836_v11 }
 0x2ba   : > { %v5524_v23 = vcombine.low %v3802_v42, %v3812_v57  ;;  %v4126_v6 = vrot.slane %v4125_v36, 4  ;;  %v4134_v53 = vrot.slane %v4132_v45, 4  ;;  %v4140_v13 = vrot.slane %v4138_v59, 5  ;;  %v5838_v57 = vld [vmem:[%s7913_s6 + $0x18] sm:$0xff]  }
 0x2bb   : > { %v4019_v40 = vsel %vm6318_vm14, %v4017_v27, %v4018_v24  ;;  %v4097_v22 = vrot.slane %v4095_v2, 4  ;;  %v4098_v3 = vshll.u32 %v7296_v56, 16  ;;  %v5540_v32 = vcombine.low %v7296_v56, %v7309_v50  ;;  %v4286_v2 = vld [vmem:[#allocation3 + $0x18] sm:$0xe] }
 0x2bc   : > { %4558 = vrot.lane.b32.xlu0 %v5524_v23, %s5904_s27  ;;  %4648 = vrot.lane.b32.xlu1 %v5541_v9, %s5908_s24  ;;  %v5532_v25 = vcombine.low %v4016_v44, %v4019_v40  ;;  %v4131_v8 = vsel %vm6337_vm1, %v4126_v6, %v4130_v10  ;;  %v4135_v60 = vor.u32 %v4134_v53, %v4130_v10  ;;  %v3533_v63 = vshrl.u32 %v3464_v19, 16  ;;  %v3679_v23 = vld [vmem:[#allocation3 + $0x24] sm:$0xe] }
 0x2bd   : > { %v4100_v28 = vrot.slane %v4098_v3, 5  ;;  %v3536_v34 = vshll.u32 %v3464_v19, 16  ;;  %v3542_v39 = vshll.u32 %v7311_v21, 16  ;;  %v3546_v43 = vshrl.u32 %v7311_v21, 16  ;;  %5688 = vmatpush3.bf16.msra.mxu1 %v5836_v11 }
 0x2be   : > { %v4136_v17 = vrot.slane %v4135_v60, 4  ;;  %v3535_v41 = vrot.slane %v3533_v63, 4  ;;  %v3552_v4 = vshll.u32 %v7318_v62, 16  ;;  %v4104_v52 = vshll.u32 %v7309_v50, 16  ;;  %5689 = vmatprep.subr.bf16.mxu1 %v5838_v57 }
 0x2bf   : > { %v3538_v29 = vrot.slane %v3536_v34, 5  ;;  %v3544_v35 = vrot.slane %v3542_v39, 5  ;;  %v3548_v31 = vrot.slane %v3546_v43, 4  ;;  %v4101_v16 = vor.u32 %v4100_v28, %v4097_v22 }
 0x2c0   : > { %4598 = vrot.lane.b32.xlu0 %v5532_v25, %s5907_s30  ;;  %v4141_v7 = vsel %vm6337_vm1, %v4136_v17, %v4140_v13  ;;  %v3554_v1 = vrot.slane %v3552_v4, 5  ;;  %v4106_v5 = vrot.slane %v4104_v52, 5  ;;  %v4108_v48 = vshrl.u32 %v7309_v50, 16 }
 0x2c1   : > { %v5549_v47 = vcombine.low %v4131_v8, %v4141_v7  ;;  %v3539_v20 = vor.u32 %v3538_v29, %v3535_v41  ;;  %v3549_v42 = vor.u32 %v3548_v31, %v3544_v35  ;;  %v4102_v37 = vrot.slane %v4101_v16, 4  ;;  %v4287_v8 = vld [vmem:[#allocation3 + $0x24] sm:$0xe]  ;;  %5690 = vmatpush3.bf16.msra.mxu1 %v5838_v57  ;;  %v3984_v57 = vld [vmem:[#allocation3 + $0x30] sm:$0xe] }
 0x2c2   : > { %v4110_v9 = vrot.slane %v4108_v48, 4  ;;  %v4114_v56 = vshll.u32 %v7330_v38, 16  ;;  %v3557_v30 = vshrl.u32 %v3466_v58, 16  ;;  %v3560_v54 = vshll.u32 %v3466_v58, 16 }
 0x2c3   : > { %4688 = vrot.lane.b32.xlu1 %v5549_v47, %s5909_s20  ;;  %v3540_v0 = vrot.slane %v3539_v20, 4  ;;  %v3550_v33 = vrot.slane %v3549_v42, 4  ;;  %v4107_v61 = vsel %vm6337_vm1, %v4102_v37, %v4106_v5  ;;  %v3566_v24 = vshll.u32 %v7340_v14, 16  ;;  %v3772_v47 = vld [vmem:[#allocation3 + $0x34] sm:$0xf] }
 0x2c4   : > { %4646 = vrot.lane.b32.xlu0 %v5540_v32, %s5908_s24  ;;  %v4111_v15 = vor.u32 %v4110_v9, %v4106_v5  ;;  %v4116_v36 = vrot.slane %v4114_v56, 5  ;;  %v3559_v45 = vrot.slane %v3557_v30, 4  ;;  %v3562_v59 = vrot.slane %v3560_v54, 5  ;;  %v3678_v5 = vld [vmem:[#allocation3 + $0x18] sm:$0xe] }
 0x2c5   : > { %v3545_v44 = vsel %vm6337_vm1, %v3540_v0, %v3544_v35  ;;  %v3555_v27 = vsel %vm6337_vm1, %v3550_v33, %v3554_v1  ;;  %v3568_v10 = vrot.slane %v3566_v24, 5  ;;  %v3570_v19 = vshrl.u32 %v7340_v14, 16  ;;  %v3784_v9 = vld [vmem:[#allocation3 + $0x38] sm:$0x1]  ;;  %v7387_v56 = vld [vmem:[#allocation3 + $0x24] sm:$0xf] }
 0x2c6   : > { %v5502_v6 = vcombine.low %v3545_v44, %v3555_v27  ;;  %v4112_v53 = vrot.slane %v4111_v15, 4  ;;  %v3563_v13 = vor.u32 %v3562_v59, %v3559_v45  ;;  %v3576_v40 = vshll.u32 %v3479_v12, 16 }
 0x2c7   : > { %v3572_v22 = vrot.slane %v3570_v19, 4  ;;  %v5484_v3 = vrot.slane %v4286_v2, 9  ;;  %v4320_v32 = vrot.slane %v7309_v50, 5  ;;  %v4323_v25 = vrot.slane %v7330_v38, 5  ;;  %v7366_v50 = vld [vmem:[#allocation3 + $0x30] sm:$0xf] }
 0x2c8   : > { %4434 = vrot.lane.b32.xlu1 %v5502_v6, %s5898_s17  ;;  %v4117_v60 = vsel %vm6337_vm1, %v4112_v53, %v4116_v36  ;;  %v3564_v63 = vrot.slane %v3563_v13, 4  ;;  %v3578_v26 = vrot.slane %v3576_v40, 5  ;;  %v5471_v28 = vrot.slane %v3679_v23, 9 }
 0x2c9   : > { %v5548_v34 = vcombine.low %v4107_v61, %v4117_v60  ;;  %v3573_v39 = vor.u32 %v3572_v22, %v3568_v10  ;;  %v4321_v43 = vsel %vm6318_vm14, %v5484_v3, %v4320_v32  ;;  %v4322_v17 = vrot.slane %v4320_v32, 4  ;;  %v3783_v32 = vld [vmem:[#allocation3 + $0x2c] sm:$0x1] }
 0x2ca   : > { %v3569_v41 = vsel %vm6337_vm1, %v3564_v63, %v3568_v10  ;;  %v3731_v4 = vrot.slane %v7340_v14, 5  ;;  %v3734_v38 = vrot.slane %v3479_v12, 5  ;;  %v5485_v52 = vrot.slane %v4287_v8, 9 }
 0x2cb   : > { %4686 = vrot.lane.b32.xlu0 %v5548_v34, %s5909_s20  ;;  %v3574_v29 = vrot.slane %v3573_v39, 4  ;;  %v4324_v35 = vsel %vm6318_vm14, %v4322_v17, %v4323_v25  ;;  %v4327_v31 = vrot.slane %v7289_v49, 5  ;;  %v4330_v16 = vrot.slane %v7294_v51, 5 }
 0x2cc   : > { %v5556_v58 = vcombine.low %v4321_v43, %v4324_v35  ;;  %v3732_v55 = vsel %vm6318_vm14, %v5471_v28, %v3731_v4  ;;  %v3733_v7 = vrot.slane %v3731_v4, 4  ;;  %v3862_v1 = vshrl.u32 %v7366_v50, 16 }
 0x2cd   : > { %v3579_v48 = vsel %vm6337_vm1, %v3574_v29, %v3578_v26  ;;  %v4328_v14 = vsel %vm6318_vm14, %v5485_v52, %v4327_v31  ;;  %v4329_v11 = vrot.slane %v4327_v31, 4  ;;  %v3865_v49 = vshll.u32 %v7366_v50, 16  ;;  %v7406_v26 = vld [vmem:[#allocation3 + $0x3c] sm:$0xf]  ;;  %v3983_v31 = vld [vmem:[#allocation3 + $0x24] sm:$0xe] }
 0x2ce   : > { %v5503_v51 = vcombine.low %v3569_v41, %v3579_v48  ;;  %v3735_v20 = vsel %vm6318_vm14, %v3733_v7, %v3734_v38  ;;  %v3864_v42 = vrot.slane %v3862_v1, 4  ;;  %v5519_v37 = vcombine.low %v7366_v50, %v3772_v47  ;;  %v7417_v7 = vld [vmem:[#allocation3 + $0x40] sm:$0xf] }
 0x2cf   : > { %4726 = vrot.lane.b32.xlu0 %v5556_v58, %s5910_s26  ;;  %v5511_v30 = vcombine.low %v3732_v55, %v3735_v20  ;;  %v4331_v54 = vsel %vm6318_vm14, %v4329_v11, %v4330_v16  ;;  %v3867_v0 = vrot.slane %v3865_v49, 5  ;;  %v5470_v33 = vrot.slane %v3678_v5, 9  ;;  %v7424_v49 = vld [vmem:[#allocation3 + $0x30] sm:$0xf] }
 0x2d0   : > { %4436 = vrot.lane.b32.xlu1 %v5503_v51, %s5898_s17  ;;  %v5557_v61 = vcombine.low %v4328_v14, %v4331_v54  ;;  %v3724_v12 = vrot.slane %v7311_v21, 5  ;;  %v3727_v24 = vrot.slane %v7318_v62, 5  ;;  %v3871_v15 = vshll.u32 %v3772_v47, 16  ;;  %v3770_v62 = vld [vmem:[#allocation3 + $0x28] sm:$0xf] }
 0x2d1   : > { %v3868_v36 = vor.u32 %v3867_v0, %v3864_v42  ;;  %v3875_v45 = vshrl.u32 %v3772_v47, 16  ;;  %v3881_v59 = vshll.u32 %v3784_v9, 16  ;;  %v3838_v2 = vshrl.u32 %v7387_v56, 16 }
 0x2d2   : > { %v3725_v44 = vsel %vm6318_vm14, %v5470_v33, %v3724_v12  ;;  %v3726_v27 = vrot.slane %v3724_v12, 4  ;;  %v3873_v10 = vrot.slane %v3871_v15, 5  ;;  %v3841_v19 = vshll.u32 %v7387_v56, 16  ;;  %v7433_v12 = vld [vmem:[#allocation3 + $0x34] sm:$0xf] }
 0x2d3   : > { %4728 = vrot.lane.b32.xlu0 %v5557_v61, %s5910_s26  ;;  %v3869_v23 = vrot.slane %v3868_v36, 4  ;;  %v3877_v21 = vrot.slane %v3875_v45, 4  ;;  %v3883_v6 = vrot.slane %v3881_v59, 5  ;;  %v3840_v53 = vrot.slane %v3838_v2, 4  ;;  %v3468_v2 = vld [vmem:[#allocation3 + $0x30] sm:$0xf] }
 0x2d4   : > { %4476 = vrot.lane.b32.xlu1 %v5511_v30, %s5899_s19  ;;  %v3728_v13 = vsel %vm6318_vm14, %v3726_v27, %v3727_v24  ;;  %v3843_v40 = vrot.slane %v3841_v19, 5  ;;  %v5518_v22 = vcombine.low %v7387_v56, %v3770_v62  ;;  %v5479_v3 = vrot.slane %v3984_v57, 9  ;;  %v7440_v57 = vld [vmem:[#allocation3 + $0x34] sm:$0xf] }
 0x2d5   : > { %v5510_v25 = vcombine.low %v3725_v44, %v3728_v13  ;;  %v3874_v8 = vsel %vm6337_vm1, %v3869_v23, %v3873_v10  ;;  %v3878_v60 = vor.u32 %v3877_v21, %v3873_v10  ;;  %v4036_v63 = vrot.slane %v3772_v47, 5  ;;  %v7422_v47 = vld [vmem:[#allocation3 + $0x44] sm:$0x1]  ;;  %v7442_v23 = vld [vmem:[#allocation3 + $0x38] sm:$0x1] }
 0x2d6   : > { %v4039_v28 = vrot.slane %v3784_v9, 5  ;;  %v3844_v34 = vor.u32 %v3843_v40, %v3840_v53  ;;  %v3847_v39 = vshll.u32 %v3770_v62, 16  ;;  %v3851_v43 = vshrl.u32 %v3770_v62, 16 }
 0x2d7   : > { %4474 = vrot.lane.b32.xlu0 %v5510_v25, %s5899_s19  ;;  %v3879_v17 = vrot.slane %v3878_v60, 4  ;;  %v4037_v50 = vsel %vm6318_vm14, %v5479_v3, %v4036_v63  ;;  %v4038_v41 = vrot.slane %v4036_v63, 4  ;;  %v3857_v4 = vshll.u32 %v3783_v32, 16  ;;  %v7455_v63 = vld [vmem:[#allocation3 + $0x38] sm:$0x1] }
 0x2d8   : > { %4524 = vrot.lane.b32.xlu1 %v5519_v37, %s5902_s22  ;;  %v3845_v38 = vrot.slane %v3844_v34, 4  ;;  %v3849_v52 = vrot.slane %v3847_v39, 5  ;;  %v3853_v29 = vrot.slane %v3851_v43, 4  ;;  %v4167_v35 = vshrl.u32 %v7406_v26, 16 }
 0x2d9   : > { %v3884_v16 = vsel %vm6337_vm1, %v3879_v17, %v3883_v6  ;;  %v4040_v58 = vsel %vm6318_vm14, %v4038_v41, %v4039_v28  ;;  %v3859_v55 = vrot.slane %v3857_v4, 5  ;;  %v4170_v1 = vshll.u32 %v7406_v26, 16  ;;  %v7461_v17 = vld [vmem:[#allocation3 + $0x40] sm:$0xf] }
 0x2da   : > { %v5527_v5 = vcombine.low %v3874_v8, %v3884_v16  ;;  %v5535_v48 = vcombine.low %v4037_v50, %v4040_v58  ;;  %v3850_v14 = vsel %vm6337_vm1, %v3845_v38, %v3849_v52  ;;  %v3854_v11 = vor.u32 %v3853_v29, %v3849_v52 }
 0x2db   : > { %4522 = vrot.lane.b32.xlu0 %v5518_v22, %s5902_s22  ;;  %v4169_v51 = vrot.slane %v4167_v35, 4  ;;  %v4172_v20 = vrot.slane %v4170_v1, 5  ;;  %v5543_v42 = vcombine.low %v7406_v26, %v7417_v7  ;;  %v5478_v37 = vrot.slane %v3983_v31, 9  ;;  %v7457_v26 = vld [vmem:[#allocation3 + $0x3c] sm:$0xf] }
 0x2dc   : > { %4564 = vrot.lane.b32.xlu1 %v5527_v5, %s5904_s27  ;;  %v3855_v9 = vrot.slane %v3854_v11, 4  ;;  %v4029_v56 = vrot.slane %v3770_v62, 5  ;;  %v4032_v30 = vrot.slane %v3783_v32, 5  ;;  %v4176_v54 = vshll.u32 %v7417_v7, 16 }
 0x2dd   : > { %v4173_v0 = vor.u32 %v4172_v20, %v4169_v51  ;;  %v4180_v33 = vshrl.u32 %v7417_v7, 16  ;;  %v4186_v61 = vshll.u32 %v7422_v47, 16  ;;  %v4143_v24 = vshrl.u32 %v7424_v49, 16 }
 0x2de   : > { %v3860_v15 = vsel %vm6337_vm1, %v3855_v9, %v3859_v55  ;;  %v4030_v36 = vsel %vm6318_vm14, %v5478_v37, %v4029_v56  ;;  %v4031_v45 = vrot.slane %v4029_v56, 4  ;;  %v4178_v59 = vrot.slane %v4176_v54, 5 }
 0x2df   : > { %v5526_v44 = vcombine.low %v3850_v14, %v3860_v15  ;;  %v4174_v27 = vrot.slane %v4173_v0, 4  ;;  %v4182_v10 = vrot.slane %v4180_v33, 4  ;;  %v4188_v19 = vrot.slane %v4186_v61, 5  ;;  %v4288_v0 = vld [vmem:[#allocation3 + $0x30] sm:$0xe] }
 0x2e0   : > { %4604 = vrot.lane.b32.xlu1 %v5535_v48, %s5907_s30  ;;  %v4033_v21 = vsel %vm6318_vm14, %v4031_v45, %v4032_v30  ;;  %v4145_v6 = vrot.slane %v4143_v24, 4  ;;  %v4146_v62 = vshll.u32 %v7424_v49, 16  ;;  %v5542_v53 = vcombine.low %v7424_v49, %v7433_v12 }
 0x2e1   : > { %4562 = vrot.lane.b32.xlu0 %v5526_v44, %s5904_s27  ;;  %v5534_v13 = vcombine.low %v4030_v36, %v4033_v21  ;;  %v4179_v40 = vsel %vm6337_vm1, %v4174_v27, %v4178_v59  ;;  %v4183_v22 = vor.u32 %v4182_v10, %v4178_v59  ;;  %v3581_v3 = vshrl.u32 %v3468_v2, 16  ;;  %v3681_v36 = vld [vmem:[#allocation3 + $0x3c] sm:$0xe] }
 0x2e2   : > { %v4148_v32 = vrot.slane %v4146_v62, 5  ;;  %v3584_v25 = vshll.u32 %v3468_v2, 16  ;;  %v3590_v8 = vshll.u32 %v7440_v57, 16  ;;  %v3594_v60 = vshrl.u32 %v7440_v57, 16 }
 0x2e3   : > { %v4184_v28 = vrot.slane %v4183_v22, 4  ;;  %v3583_v34 = vrot.slane %v3581_v3, 4  ;;  %v3600_v39 = vshll.u32 %v7442_v23, 16  ;;  %v4152_v43 = vshll.u32 %v7433_v12, 16 }
 0x2e4   : > { %4652 = vrot.lane.b32.xlu1 %v5543_v42, %s5908_s24  ;;  %v3586_v50 = vrot.slane %v3584_v25, 5  ;;  %v3592_v41 = vrot.slane %v3590_v8, 5  ;;  %v3596_v4 = vrot.slane %v3594_v60, 4  ;;  %v4149_v38 = vor.u32 %v4148_v32, %v4145_v6  ;;  %v3481_v42 = vld [vmem:[#allocation3 + $0x44] sm:$0x1] }
 0x2e5   : > { %4602 = vrot.lane.b32.xlu0 %v5534_v13, %s5907_s30  ;;  %v4189_v52 = vsel %vm6337_vm1, %v4184_v28, %v4188_v19  ;;  %v3602_v29 = vrot.slane %v3600_v39, 5  ;;  %v4154_v35 = vrot.slane %v4152_v43, 5  ;;  %v4156_v31 = vshrl.u32 %v7433_v12, 16  ;;  %v4289_v6 = vld [vmem:[#allocation3 + $0x3c] sm:$0xe] }
 0x2e6   : > { %v5551_v16 = vcombine.low %v4179_v40, %v4189_v52  ;;  %v3587_v58 = vor.u32 %v3586_v50, %v3583_v34  ;;  %v3597_v55 = vor.u32 %v3596_v4, %v3592_v41  ;;  %v4150_v1 = vrot.slane %v4149_v38, 4  ;;  %v7488_v8 = vld [vmem:[#allocation3 + $0x48] sm:$0xf] }
 0x2e7   : > { %v4158_v5 = vrot.slane %v4156_v31, 4  ;;  %v4162_v48 = vshll.u32 %v7455_v63, 16  ;;  %v3605_v14 = vshrl.u32 %v7457_v26, 16  ;;  %v3608_v11 = vshll.u32 %v7457_v26, 16 }
 0x2e8   : > { %4692 = vrot.lane.b32.xlu1 %v5551_v16, %s5909_s20  ;;  %v3588_v49 = vrot.slane %v3587_v58, 4  ;;  %v3598_v51 = vrot.slane %v3597_v55, 4  ;;  %v4155_v20 = vsel %vm6337_vm1, %v4150_v1, %v4154_v35  ;;  %v3614_v37 = vshll.u32 %v7461_v17, 16  ;;  %v3776_v58 = vld [vmem:[#allocation3 + $0x4c] sm:$0xf] }
 0x2e9   : > { %4650 = vrot.lane.b32.xlu0 %v5542_v53, %s5908_s24  ;;  %v4159_v9 = vor.u32 %v4158_v5, %v4154_v35  ;;  %v4164_v56 = vrot.slane %v4162_v48, 5  ;;  %v3607_v30 = vrot.slane %v3605_v14, 4  ;;  %v3610_v54 = vrot.slane %v3608_v11, 5  ;;  %v3786_v48 = vld [vmem:[#allocation3 + $0x50] sm:$0x1] }
 0x2ea   : > { %v3593_v33 = vsel %vm6337_vm1, %v3588_v49, %v3592_v41  ;;  %v3603_v61 = vsel %vm6337_vm1, %v3598_v51, %v3602_v29  ;;  %v3616_v24 = vrot.slane %v3614_v37, 5  ;;  %v3618_v15 = vshrl.u32 %v7461_v17, 16  ;;  %v3680_v29 = vld [vmem:[#allocation3 + $0x30] sm:$0xe]  ;;  %v7509_v14 = vld [vmem:[#allocation3 + $0x3c] sm:$0xf] }
 0x2eb   : > { %v5504_v45 = vcombine.low %v3593_v33, %v3603_v61  ;;  %v4160_v59 = vrot.slane %v4159_v9, 4  ;;  %v3611_v2 = vor.u32 %v3610_v54, %v3607_v30  ;;  %v3624_v44 = vshll.u32 %v3481_v42, 16  ;;  %v3986_v61 = vld [vmem:[#allocation3 + $0x48] sm:$0xe] }
 0x2ec   : > { %v3620_v27 = vrot.slane %v3618_v15, 4  ;;  %v5486_v10 = vrot.slane %v4288_v0, 9  ;;  %v4334_v19 = vrot.slane %v7433_v12, 5  ;;  %v4337_v21 = vrot.slane %v7455_v63, 5 }
 0x2ed   : > { %4438 = vrot.lane.b32.xlu1 %v5504_v45, %s5898_s17  ;;  %v4165_v62 = vsel %vm6337_vm1, %v4160_v59, %v4164_v56  ;;  %v3612_v53 = vrot.slane %v3611_v2, 4  ;;  %v3626_v13 = vrot.slane %v3624_v44, 5  ;;  %v5473_v40 = vrot.slane %v3681_v36, 9 }
 0x2ee   : > { %v5550_v22 = vcombine.low %v4155_v20, %v4165_v62  ;;  %v3621_v3 = vor.u32 %v3620_v27, %v3616_v24  ;;  %v4335_v32 = vsel %vm6318_vm14, %v5486_v10, %v4334_v19  ;;  %v4336_v25 = vrot.slane %v4334_v19, 4 }
 0x2ef   : > { %v3617_v12 = vsel %vm6337_vm1, %v3612_v53, %v3616_v24  ;;  %v3745_v60 = vrot.slane %v7461_v17, 5  ;;  %v3748_v63 = vrot.slane %v3481_v42, 5  ;;  %v5487_v28 = vrot.slane %v4289_v6, 9  ;;  %v3785_v6 = vld [vmem:[#allocation3 + $0x44] sm:$0x1] }
 0x2f0   : > { %4690 = vrot.lane.b32.xlu0 %v5550_v22, %s5909_s20  ;;  %v3622_v34 = vrot.slane %v3621_v3, 4  ;;  %v4338_v39 = vsel %vm6318_vm14, %v4336_v25, %v4337_v21  ;;  %v4341_v43 = vrot.slane %v7417_v7, 5  ;;  %v4344_v50 = vrot.slane %v7422_v47, 5  ;;  %v7528_v22 = vld [vmem:[#allocation3 + $0x54] sm:$0xf] }
 0x2f1   : > { %v5558_v41 = vcombine.low %v4335_v32, %v4338_v39  ;;  %v3746_v4 = vsel %vm6318_vm14, %v5473_v40, %v3745_v60  ;;  %v3747_v38 = vrot.slane %v3745_v60, 4  ;;  %v3910_v52 = vshrl.u32 %v7488_v8, 16 }
 0x2f2   : > { %v3627_v35 = vsel %vm6337_vm1, %v3622_v34, %v3626_v13  ;;  %v4342_v31 = vsel %vm6318_vm14, %v5487_v28, %v4341_v43  ;;  %v4343_v16 = vrot.slane %v4341_v43, 4  ;;  %v3913_v7 = vshll.u32 %v7488_v8, 16 }
 0x2f3   : > { %v5505_v55 = vcombine.low %v3617_v12, %v3627_v35  ;;  %v3749_v47 = vsel %vm6318_vm14, %v3747_v38, %v3748_v63  ;;  %v3912_v1 = vrot.slane %v3910_v52, 4  ;;  %v5521_v5 = vcombine.low %v7488_v8, %v3776_v58 }
 0x2f4   : > { %4730 = vrot.lane.b32.xlu0 %v5558_v41, %s5910_s26  ;;  %v5513_v11 = vcombine.low %v3746_v4, %v3749_v47  ;;  %v4345_v49 = vsel %vm6318_vm14, %v4343_v16, %v4344_v50  ;;  %v3915_v51 = vrot.slane %v3913_v7, 5  ;;  %v5472_v20 = vrot.slane %v3680_v29, 9  ;;  %v3985_v41 = vld [vmem:[#allocation3 + $0x3c] sm:$0xe]  ;;  %v7539_v29 = vld [vmem:[#allocation3 + $0x58] sm:$0xf] }
 0x2f5   : > { %4440 = vrot.lane.b32.xlu1 %v5505_v55, %s5898_s17  ;;  %v5559_v42 = vcombine.low %v4342_v31, %v4345_v49  ;;  %v3738_v37 = vrot.slane %v7440_v57, 5  ;;  %v3741_v9 = vrot.slane %v7442_v23, 5  ;;  %v3919_v56 = vshll.u32 %v3776_v58, 16  ;;  %v3774_v23 = vld [vmem:[#allocation3 + $0x40] sm:$0xf] }
 0x2f6   : > { %v3916_v30 = vor.u32 %v3915_v51, %v3912_v1  ;;  %v3923_v54 = vshrl.u32 %v3776_v58, 16  ;;  %v3929_v0 = vshll.u32 %v3786_v48, 16  ;;  %v3886_v33 = vshrl.u32 %v7509_v14, 16  ;;  %v7544_v55 = vld [vmem:[#allocation3 + $0x5c] sm:$0x1] }
 0x2f7   : > { %v3739_v24 = vsel %vm6318_vm14, %v5472_v20, %v3738_v37  ;;  %v3740_v15 = vrot.slane %v3738_v37, 4  ;;  %v3921_v36 = vrot.slane %v3919_v56, 5  ;;  %v3889_v45 = vshll.u32 %v7509_v14, 16  ;;  %v7546_v47 = vld [vmem:[#allocation3 + $0x48] sm:$0xf] }
 0x2f8   : > { %4732 = vrot.lane.b32.xlu0 %v5559_v42, %s5910_s26  ;;  %v3917_v59 = vrot.slane %v3916_v30, 4  ;;  %v3925_v57 = vrot.slane %v3923_v54, 4  ;;  %v3931_v2 = vrot.slane %v3929_v0, 5  ;;  %v3888_v44 = vrot.slane %v3886_v33, 4 }
 0x2f9   : > { %4480 = vrot.lane.b32.xlu1 %v5513_v11, %s5899_s19  ;;  %v3742_v27 = vsel %vm6318_vm14, %v3740_v15, %v3741_v9  ;;  %v3891_v10 = vrot.slane %v3889_v45, 5  ;;  %v5520_v19 = vcombine.low %v7509_v14, %v3774_v23  ;;  %v5481_v21 = vrot.slane %v3986_v61, 9  ;;  %v7560_v61 = vld [vmem:[#allocation3 + $0x4c] sm:$0xf] }
 0x2fa   : > { %v5512_v62 = vcombine.low %v3739_v24, %v3742_v27  ;;  %v3922_v53 = vsel %vm6337_vm1, %v3917_v59, %v3921_v36  ;;  %v3926_v13 = vor.u32 %v3925_v57, %v3921_v36  ;;  %v4050_v40 = vrot.slane %v3776_v58, 5  ;;  %v7562_v24 = vld [vmem:[#allocation3 + $0x48] sm:$0xf]  ;;  %v7564_v57 = vld [vmem:[#allocation3 + $0x4c] sm:$0xf] }
 0x2fb   : > { %v4053_v3 = vrot.slane %v3786_v48, 5  ;;  %v3892_v32 = vor.u32 %v3891_v10, %v3888_v44  ;;  %v3895_v25 = vshll.u32 %v3774_v23, 16  ;;  %v3899_v8 = vshrl.u32 %v3774_v23, 16  ;;  %v7572_v10 = vld [vmem:[#allocation3 + $0x50] sm:$0x1] }
 0x2fc   : > { %4478 = vrot.lane.b32.xlu0 %v5512_v62, %s5899_s19  ;;  %v3927_v12 = vrot.slane %v3926_v13, 4  ;;  %v4051_v60 = vsel %vm6318_vm14, %v5481_v21, %v4050_v40  ;;  %v4052_v63 = vrot.slane %v4050_v40, 4  ;;  %v3905_v28 = vshll.u32 %v3785_v6, 16 }
 0x2fd   : > { %4528 = vrot.lane.b32.xlu1 %v5521_v5, %s5902_s22  ;;  %v3893_v34 = vrot.slane %v3892_v32, 4  ;;  %v3897_v39 = vrot.slane %v3895_v25, 5  ;;  %v3901_v43 = vrot.slane %v3899_v8, 4  ;;  %v4215_v50 = vshrl.u32 %v7528_v22, 16  ;;  %v7582_v8 = vld [vmem:[#allocation3 + $0x50] sm:$0x1] }
 0x2fe   : > { %v3932_v4 = vsel %vm6337_vm1, %v3927_v12, %v3931_v2  ;;  %v4054_v38 = vsel %vm6318_vm14, %v4052_v63, %v4053_v3  ;;  %v3907_v52 = vrot.slane %v3905_v28, 5  ;;  %v4218_v35 = vshll.u32 %v7528_v22, 16 }
 0x2ff   : > { %v5529_v31 = vcombine.low %v3922_v53, %v3932_v4  ;;  %v5537_v16 = vcombine.low %v4051_v60, %v4054_v38  ;;  %v3898_v58 = vsel %vm6337_vm1, %v3893_v34, %v3897_v39  ;;  %v3902_v7 = vor.u32 %v3901_v43, %v3897_v39  ;;  %v7586_v39 = vld [vmem:[#allocation3 + $0x54] sm:$0xf]  ;;  %v7592_v38 = vld [vmem:[#allocation3 + $0x58] sm:$0xf] }
 0x300   : > { %4526 = vrot.lane.b32.xlu0 %v5520_v19, %s5902_s22  ;;  %v4217_v1 = vrot.slane %v4215_v50, 4  ;;  %v4220_v5 = vrot.slane %v4218_v35, 5  ;;  %v5545_v48 = vcombine.low %v7528_v22, %v7539_v29  ;;  %v5480_v14 = vrot.slane %v3985_v41, 9 }
 0x301   : > { %4568 = vrot.lane.b32.xlu1 %v5529_v31, %s5904_s27  ;;  %v3903_v11 = vrot.slane %v3902_v7, 4  ;;  %v4043_v49 = vrot.slane %v3774_v23, 5  ;;  %v4046_v51 = vrot.slane %v3785_v6, 5  ;;  %v4224_v20 = vshll.u32 %v7539_v29, 16 }
 0x302   : > { %v4221_v42 = vor.u32 %v4220_v5, %v4217_v1  ;;  %v4228_v37 = vshrl.u32 %v7539_v29, 16  ;;  %v4234_v9 = vshll.u32 %v7544_v55, 16  ;;  %v4191_v56 = vshrl.u32 %v7546_v47, 16 }
 0x303   : > { %v3908_v30 = vsel %vm6337_vm1, %v3903_v11, %v3907_v52  ;;  %v4044_v54 = vsel %vm6318_vm14, %v5480_v14, %v4043_v49  ;;  %v4045_v0 = vrot.slane %v4043_v49, 4  ;;  %v4226_v33 = vrot.slane %v4224_v20, 5  ;;  %v3483_v11 = vld [vmem:[#allocation3 + $0x5c] sm:$0x1] }
 0x304   : > { %v5528_v15 = vcombine.low %v3898_v58, %v3908_v30  ;;  %v4222_v36 = vrot.slane %v4221_v42, 4  ;;  %v4230_v45 = vrot.slane %v4228_v37, 4  ;;  %v4236_v59 = vrot.slane %v4234_v9, 5  ;;  %v4290_v9 = vld [vmem:[#allocation3 + $0x48] sm:$0xe] }
 0x305   : > { %4608 = vrot.lane.b32.xlu1 %v5537_v16, %s5907_s30  ;;  %v4047_v2 = vsel %vm6318_vm14, %v4045_v0, %v4046_v51  ;;  %v4193_v23 = vrot.slane %v4191_v56, 4  ;;  %v4194_v44 = vshll.u32 %v7546_v47, 16  ;;  %v5544_v27 = vcombine.low %v7546_v47, %v7560_v61 }
 0x306   : > { %4566 = vrot.lane.b32.xlu0 %v5528_v15, %s5904_s27  ;;  %v5536_v19 = vcombine.low %v4044_v54, %v4047_v2  ;;  %v4227_v21 = vsel %vm6337_vm1, %v4222_v36, %v4226_v33  ;;  %v4231_v6 = vor.u32 %v4230_v45, %v4226_v33  ;;  %v3629_v62 = vshrl.u32 %v7562_v24, 16  ;;  %v3683_v33 = vld [vmem:[#allocation3 + $0x54] sm:$0xe] }
 0x307   : > { %v4196_v53 = vrot.slane %v4194_v44, 5  ;;  %v3632_v13 = vshll.u32 %v7562_v24, 16  ;;  %v3638_v40 = vshll.u32 %v7564_v57, 16  ;;  %v3642_v22 = vshrl.u32 %v7564_v57, 16 }
 0x308   : > { %v4232_v3 = vrot.slane %v4231_v6, 4  ;;  %v3631_v32 = vrot.slane %v3629_v62, 4  ;;  %v3648_v25 = vshll.u32 %v7572_v10, 16  ;;  %v4200_v12 = vshll.u32 %v7560_v61, 16 }
 0x309   : > { %4656 = vrot.lane.b32.xlu1 %v5545_v48, %s5908_s24  ;;  %v3634_v60 = vrot.slane %v3632_v13, 5  ;;  %v3640_v63 = vrot.slane %v3638_v40, 5  ;;  %v3644_v28 = vrot.slane %v3642_v22, 4  ;;  %v4197_v34 = vor.u32 %v4196_v53, %v4193_v23 }
 0x30a   : > { %4606 = vrot.lane.b32.xlu0 %v5536_v19, %s5907_s30  ;;  %v4237_v43 = vsel %vm6337_vm1, %v4232_v3, %v4236_v59  ;;  %v3650_v50 = vrot.slane %v3648_v25, 5  ;;  %v4202_v41 = vrot.slane %v4200_v12, 5  ;;  %v4204_v4 = vshrl.u32 %v7560_v61, 16  ;;  %v4291_v19 = vld [vmem:[#allocation3 + $0x54] sm:$0xe] }
 0x30b   : > { %v5553_v52 = vcombine.low %v4227_v21, %v4237_v43  ;;  %v3635_v35 = vor.u32 %v3634_v60, %v3631_v32  ;;  %v3645_v31 = vor.u32 %v3644_v28, %v3640_v63  ;;  %v4198_v16 = vrot.slane %v4197_v34, 4  ;;  %v7614_v32 = vld [vmem:[#allocation3 + $0x60] sm:$0xf] }
 0x30c   : > { %v4206_v58 = vrot.slane %v4204_v4, 4  ;;  %v4210_v7 = vshll.u32 %v7582_v8, 16  ;;  %v3653_v47 = vshrl.u32 %v7586_v39, 16  ;;  %v3656_v1 = vshll.u32 %v7586_v39, 16 }
 0x30d   : > { %4696 = vrot.lane.b32.xlu1 %v5553_v52, %s5909_s20  ;;  %v3636_v5 = vrot.slane %v3635_v35, 4  ;;  %v3646_v48 = vrot.slane %v3645_v31, 4  ;;  %v4203_v14 = vsel %vm6337_vm1, %v4198_v16, %v4202_v41  ;;  %v3662_v49 = vshll.u32 %v7592_v38, 16  ;;  %v3682_v35 = vld [vmem:[#allocation3 + $0x48] sm:$0xe] }
 0x30e   : > { %4654 = vrot.lane.b32.xlu0 %v5544_v27, %s5908_s24  ;;  %v4207_v51 = vor.u32 %v4206_v58, %v4202_v41  ;;  %v4212_v20 = vrot.slane %v4210_v7, 5  ;;  %v3655_v42 = vrot.slane %v3653_v47, 4  ;;  %v3658_v37 = vrot.slane %v3656_v1, 5  ;;  %v3780_v7 = vld [vmem:[#allocation3 + $0x64] sm:$0xf] }
 0x30f   : > { %v3641_v56 = vsel %vm6337_vm1, %v3636_v5, %v3640_v63  ;;  %v3651_v30 = vsel %vm6337_vm1, %v3646_v48, %v3650_v50  ;;  %v3664_v54 = vrot.slane %v3662_v49, 5  ;;  %v3666_v0 = vshrl.u32 %v7592_v38, 16  ;;  %v3788_v48 = vld [vmem:[#allocation3 + $0x68] sm:$0x1] }
 0x310   : > { %v5506_v15 = vcombine.low %v3641_v56, %v3651_v30  ;;  %v4208_v36 = vrot.slane %v4207_v51, 4  ;;  %v3659_v45 = vor.u32 %v3658_v37, %v3655_v42  ;;  %v3672_v59 = vshll.u32 %v3483_v11, 16 }
 0x311   : > { %v3668_v2 = vrot.slane %v3666_v0, 4  ;;  %v5488_v23 = vrot.slane %v4290_v9, 9  ;;  %v4348_v44 = vrot.slane %v7560_v61, 5  ;;  %v4351_v27 = vrot.slane %v7582_v8, 5 }
 0x312   : > { %4442 = vrot.lane.b32.xlu1 %v5506_v15, %s5898_s17  ;;  %v4213_v21 = vsel %vm6337_vm1, %v4208_v36, %v4212_v20  ;;  %v3660_v6 = vrot.slane %v3659_v45, 4  ;;  %v3674_v62 = vrot.slane %v3672_v59, 5  ;;  %v5475_v53 = vrot.slane %v3683_v33, 9  ;;  %v3988_v36 = vld [vmem:[#allocation3 + $0x60] sm:$0xe] }
 0x313   : > { %v5552_v13 = vcombine.low %v4203_v14, %v4213_v21  ;;  %v3669_v40 = vor.u32 %v3668_v2, %v3664_v54  ;;  %v4349_v22 = vsel %vm6318_vm14, %v5488_v23, %v4348_v44  ;;  %v4350_v3 = vrot.slane %v4348_v44, 4  ;;  %v7619_v60 = vpop.permute.xlu1 %4520  ;;  %v7637_v14 = vld [vmem:[#allocation3 + $0x54] sm:$0xf] }
 0x314   : > { %v3665_v61 = vsel %vm6337_vm1, %v3660_v6, %v3664_v54  ;;  %v3759_v25 = vrot.slane %v7592_v38, 5  ;;  %v3762_v8 = vrot.slane %v3483_v11, 5  ;;  %v5489_v12 = vrot.slane %v4291_v19, 9  ;;  %v3778_v19 = vld [vmem:[#allocation3 + $0x58] sm:$0xf]  ;;  %v7652_v6 = vpop.permute.xlu0 %4518 }
 0x315   : > { %4694 = vrot.lane.b32.xlu0 %v5552_v13, %s5909_s20  ;;  %v3670_v63 = vrot.slane %v3669_v40, 4  ;;  %v4352_v28 = vsel %vm6318_vm14, %v4350_v3, %v4351_v27  ;;  %v4355_v34 = vrot.slane %v7539_v29, 5  ;;  %v4358_v43 = vrot.slane %v7544_v55, 5 }
 0x316   : > { %v5560_v50 = vcombine.low %v4349_v22, %v4352_v28  ;;  %v3760_v41 = vsel %vm6318_vm14, %v5475_v53, %v3759_v25  ;;  %v3761_v4 = vrot.slane %v3759_v25, 4  ;;  %v3958_v52 = vshrl.u32 %v7614_v32, 16  ;;  %v3787_v22 = vld [vmem:[#allocation3 + $0x5c] sm:$0x1] }
 0x317   : > { %v3675_v31 = vsel %vm6337_vm1, %v3670_v63, %v3674_v62  ;;  %v4356_v16 = vsel %vm6318_vm14, %v5489_v12, %v4355_v34  ;;  %v4357_v58 = vrot.slane %v4355_v34, 4  ;;  %v3961_v29 = vshll.u32 %v7614_v32, 16 }
 0x318   : > { %v5507_v47 = vcombine.low %v3665_v61, %v3675_v31  ;;  %v3763_v55 = vsel %vm6318_vm14, %v3761_v4, %v3762_v8  ;;  %v3960_v1 = vrot.slane %v3958_v52, 4  ;;  %v5523_v5 = vcombine.low %v7614_v32, %v3780_v7  ;;  %v7660_v8 = vld [vmem:[#allocation3 + $0x6c] sm:$0xf] }
 0x319   : > { %4734 = vrot.lane.b32.xlu0 %v5560_v50, %s5910_s26  ;;  %v5515_v11 = vcombine.low %v3760_v41, %v3763_v55  ;;  %v4359_v49 = vsel %vm6318_vm14, %v4357_v58, %v4358_v43  ;;  %v3963_v51 = vrot.slane %v3961_v29, 5  ;;  %v5474_v20 = vrot.slane %v3682_v35, 9  ;;  %v4085_v55 = vld [vmem:[#allocation3 + $0x70] sm:$0xf] }
 0x31a   : > { %4444 = vrot.lane.b32.xlu1 %v5507_v47, %s5898_s17  ;;  %v5561_v42 = vcombine.low %v4356_v16, %v4359_v49  ;;  %v3752_v37 = vrot.slane %v7564_v57, 5  ;;  %v3755_v9 = vrot.slane %v7572_v10, 5  ;;  %v3967_v56 = vshll.u32 %v3780_v7, 16  ;;  %v7645_v30 = vpop.permute.xlu1 %4470 }
 0x31b   : > { %v3964_v54 = vor.u32 %v3963_v51, %v3960_v1  ;;  %v3971_v0 = vshrl.u32 %v3780_v7, 16  ;;  %v3977_v33 = vshll.u32 %v3788_v48, 16  ;;  %v3934_v15 = vshrl.u32 %v7637_v14, 16  ;;  %v4093_v51 = vld [vmem:[#allocation3 + $0x74] sm:$0x1] }
 0x31c   : > { %v3753_v45 = vsel %vm6318_vm14, %v5474_v20, %v3752_v37  ;;  %v3754_v59 = vrot.slane %v3752_v37, 4  ;;  %v3969_v2 = vrot.slane %v3967_v56, 5  ;;  %v3937_v23 = vshll.u32 %v7637_v14, 16  ;;  %v7676_v20 = vld [vmem:[#allocation3 + $0x60] sm:$0xf] }
 0x31d   : > { %4736 = vrot.lane.b32.xlu0 %v5561_v42, %s5910_s26  ;;  %v3965_v44 = vrot.slane %v3964_v54, 4  ;;  %v3973_v10 = vrot.slane %v3971_v0, 4  ;;  %v3979_v27 = vrot.slane %v3977_v33, 5  ;;  %v3936_v21 = vrot.slane %v3934_v15, 4 }
 0x31e   : > { %4484 = vrot.lane.b32.xlu1 %v5515_v11, %s5899_s19  ;;  %v3756_v62 = vsel %vm6318_vm14, %v3754_v59, %v3755_v9  ;;  %v3939_v53 = vrot.slane %v3937_v23, 5  ;;  %v5522_v13 = vcombine.low %v7637_v14, %v3778_v19  ;;  %v5483_v40 = vrot.slane %v3988_v36, 9  ;;  %v7662_v43 = vpop.permute.xlu1 %4472 }
 0x31f   : > { %v5514_v3 = vcombine.low %v3753_v45, %v3756_v62  ;;  %v3970_v32 = vsel %vm6337_vm1, %v3965_v44, %v3969_v2  ;;  %v3974_v61 = vor.u32 %v3973_v10, %v3969_v2  ;;  %v4064_v25 = vrot.slane %v3780_v7, 5  ;;  %v3987_v7 = vld [vmem:[#allocation3 + $0x54] sm:$0xe] }
 0x320   : > { %v4067_v12 = vrot.slane %v3788_v48, 5  ;;  %v3940_v63 = vor.u32 %v3939_v53, %v3936_v21  ;;  %v3943_v28 = vshll.u32 %v3778_v19, 16  ;;  %v3947_v34 = vshrl.u32 %v3778_v19, 16 }
 0x321   : > { %4482 = vrot.lane.b32.xlu0 %v5514_v3, %s5899_s19  ;;  %v3975_v50 = vrot.slane %v3974_v61, 4  ;;  %v4065_v41 = vsel %vm6318_vm14, %v5483_v40, %v4064_v25  ;;  %v4066_v4 = vrot.slane %v4064_v25, 4  ;;  %v3953_v52 = vshll.u32 %v3787_v22, 16 }
 0x322   : > { %4532 = vrot.lane.b32.xlu1 %v5523_v5, %s5902_s22  ;;  %v3941_v35 = vrot.slane %v3940_v63, 4  ;;  %v3945_v31 = vrot.slane %v3943_v28, 5  ;;  %v3949_v16 = vrot.slane %v3947_v34, 4  ;;  %v4263_v58 = vshrl.u32 %v7660_v8, 16 }
 0x323   : > { %v3980_v29 = vsel %vm6337_vm1, %v3975_v50, %v3979_v27  ;;  %v4068_v47 = vsel %vm6318_vm14, %v4066_v4, %v4067_v12  ;;  %v4266_v1 = vshll.u32 %v7660_v8, 16  ;;  %v7674_v48 = vpop.permute.xlu0 %4430  ;;  %v3955_v49 = vrot.slane %v3953_v52, 5 }
 0x324   : > { %v5531_v14 = vcombine.low %v3970_v32, %v3980_v29  ;;  %v5539_v11 = vcombine.low %v4065_v41, %v4068_v47  ;;  %v3950_v5 = vor.u32 %v3949_v16, %v3945_v31  ;;  %v3946_v42 = vsel %vm6337_vm1, %v3941_v35, %v3945_v31  ;;  %v4083_v32 = vld [vmem:[#allocation3 + $0x64] sm:$0xf]  ;;  %v4092_v35 = vld [vmem:[#allocation3 + $0x68] sm:$0x1] }
 0x325   : > { %4530 = vrot.lane.b32.xlu0 %v5522_v13, %s5902_s22  ;;  %v4265_v37 = vrot.slane %v4263_v58, 4  ;;  %v4268_v9 = vrot.slane %v4266_v1, 5  ;;  %v5482_v56 = vrot.slane %v3987_v7, 9  ;;  %v4057_v0 = vrot.slane %v3778_v19, 5  ;;  %v4293_v13 = vld [vmem:[#allocation3 + $0x6c] sm:$0xe] }
 0x326   : > { %4572 = vrot.lane.b32.xlu1 %v5531_v14, %s5904_s27  ;;  %v3951_v54 = vrot.slane %v3950_v5, 4  ;;  %v4060_v33 = vrot.slane %v3787_v22, 5  ;;  %v4272_v15 = vshll.u32 %v4085_v55, 16  ;;  %v7682_v36 = vpop.permute.xlu1 %4560  ;;  %v4276_v59 = vshrl.u32 %v4085_v55, 16  ;;  %v4292_v14 = vld [vmem:[#allocation3 + $0x60] sm:$0xe] }
 0x327   : > { %v4269_v45 = vor.u32 %v4268_v9, %v4265_v37  ;;  %v4282_v2 = vshll.u32 %v4093_v51, 16  ;;  %v4239_v23 = vshrl.u32 %v7676_v20, 16  ;;  %v4058_v10 = vsel %vm6318_vm14, %v5482_v56, %v4057_v0 }
 0x328   : > { %v3956_v44 = vsel %vm6337_vm1, %v3951_v54, %v3955_v49  ;;  %v4059_v27 = vrot.slane %v4057_v0, 4  ;;  %v4274_v21 = vrot.slane %v4272_v15, 5  ;;  %v4278_v19 = vrot.slane %v4276_v59, 4 }
 0x329   : > { %v5530_v62 = vcombine.low %v3946_v42, %v3956_v44  ;;  %v4270_v53 = vrot.slane %v4269_v45, 4  ;;  %v7689_v40 = vpop.permute.xlu0 %4432  ;;  %v5547_v22 = vcombine.low %v7660_v8, %v4085_v55  ;;  %v4241_v61 = vrot.slane %v4239_v23, 4  ;;  %v5846_v23 = vld [vmem:[#allocation3] sm:$0xf] }
 0x32a   : > { %4612 = vrot.lane.b32.xlu1 %v5539_v11, %s5907_s30  ;;  %v4061_v3 = vsel %vm6318_vm14, %v4059_v27, %v4060_v33  ;;  %v4242_v25 = vshll.u32 %v7676_v20, 16  ;;  %v7696_v12 = vpop.permute.xlu1 %4600  ;;  %v4279_v28 = vor.u32 %v4278_v19, %v4274_v21  ;;  %v4284_v34 = vrot.slane %v4282_v2, 5  ;;  %v5845_v2 = vld [vmem:[#allocation3 + $0x4] sm:$0xf] }
 0x32b   : > { %4570 = vrot.lane.b32.xlu0 %v5530_v62, %s5904_s27  ;;  %v5538_v63 = vcombine.low %v4058_v10, %v4061_v3  ;;  %v5491_v41 = vrot.slane %v4293_v13, 9  ;;  %v4369_v4 = vrot.slane %v4085_v55, 5  ;;  %v4372_v52 = vrot.slane %v4093_v51, 5  ;;  %v5848_v62 = vld [vmem:[#allocation3 + $0xc] sm:$0xf] }
 0x32c   : > { %v4244_v50 = vrot.slane %v4242_v25, 5  ;;  %v4275_v8 = vsel %vm6337_vm1, %v4270_v53, %v4274_v21  ;;  %v4280_v31 = vrot.slane %v4279_v28, 4  ;;  %v4248_v16 = vshll.u32 %v4083_v32, 16  ;;  %v5847_v21 = vld [vmem:[#allocation3 + $0x10] sm:$0xf] }
 0x32d   : > { %v4252_v58 = vshrl.u32 %v4083_v32, 16  ;;  %v5546_v7 = vcombine.low %v7676_v20, %v4083_v32  ;;  %v4370_v29 = vsel %vm6318_vm14, %v5491_v41, %v4369_v4  ;;  %v4371_v47 = vrot.slane %v4369_v4, 4  ;;  %v5840_v3 = vld [vmem:[%s7913_s6 + $0x20] ss:$0 sps:$4 sm:$0xff]  }
 0x32e   : > { %4660 = vrot.lane.b32.xlu1 %v5547_v22, %s5908_s24  ;;  %v4245_v1 = vor.u32 %v4244_v50, %v4241_v61  ;;  %v4559_v11 = vpop.permute.xlu0 %4558  ;;  %v4285_v55 = vsel %vm6337_vm1, %v4280_v31, %v4284_v34  ;;  %v4250_v5 = vrot.slane %v4248_v16, 5  ;;  %v4258_v51 = vshll.u32 %v4092_v35, 16  ;;  %v4649_v9 = vpop.permute.xlu1 %4648 }
 0x32f   : > { %4610 = vrot.lane.b32.xlu0 %v5538_v63, %s5907_s30  ;;  %v4254_v49 = vrot.slane %v4252_v58, 4  ;;  %v5555_v42 = vcombine.low %v4275_v8, %v4285_v55  ;;  %v4373_v37 = vsel %vm6318_vm14, %v4371_v47, %v4372_v52  ;;  %v5490_v0 = vrot.slane %v4292_v14, 9 }
 0x330   : > { %v4246_v20 = vrot.slane %v4245_v1, 4  ;;  %v4260_v54 = vrot.slane %v4258_v51, 5  ;;  %v5563_v33 = vcombine.low %v4370_v29, %v4373_v37  ;;  %v4362_v15 = vrot.slane %v4083_v32, 5 }
 0x331   : > { %v4255_v56 = vor.u32 %v4254_v49, %v4250_v5  ;;  %v4365_v45 = vrot.slane %v4092_v35, 5  ;;  %v5492_v44 = vcombine.low %v5846_v23, %v5845_v2  ;;  %v5493_v53 = vcombine.low %v5848_v62, %v5847_v21 }
 0x332   : > { %4700 = vrot.lane.b32.xlu1 %v5555_v42, %s5909_s20  ;;  %v4599_v59 = vpop.permute.xlu0 %4598  ;;  %v4251_v10 = vsel %vm6337_vm1, %v4246_v20, %v4250_v5  ;;  %v4364_v19 = vrot.slane %v4362_v15, 4  ;;  %v4363_v22 = vsel %vm6318_vm14, %v5490_v0, %v4362_v15  ;;  %vm4935_vm7 = vcmask 1043456   ;;  %v5850_v0 = vld [vmem:[#allocation3 + $0x1c] sm:$0xf]  ;;  %v5852_v15 = vld [vmem:[#allocation3 + $0x28] sm:$0xf] }
 0x333   : > { %4658 = vrot.lane.b32.xlu0 %v5546_v7, %s5908_s24  ;;  %v4256_v27 = vrot.slane %v4255_v56, 4  ;;  %v4744_v63 = vsel %vm2737_vm3, %v5492_v44, %v7674_v48  ;;  %v4747_v18 = vsel %vm2737_vm3, %v5493_v53, %v7689_v40  ;;  %5710 = vmatprep.subr.msk.bf16.mxu1 %vm4935_vm7, %v5840_v3  ;;  %v4937_v50 = vsel %vm4935_vm7, %v5840_v3, 0 }
 0x334   : > { %v4366_v61 = vsel %vm6318_vm14, %v4364_v19, %v4365_v45  ;;  %v4767_v41 = vsel %vm2779_vm5, %v4744_v63, %v7645_v30  ;;  %v4769_v46 = vsel %vm2779_vm5, %v4747_v18, %v7662_v43  ;;  %5692 = vmatpush3.bf16.msra.mxu1 %v4937_v50  ;;  %v5498_v48 = vcombine.low %v7562_v24, %v7564_v57 }
 0x335   : > { %v4261_v13 = vsel %vm6337_vm1, %v4256_v27, %v4260_v54  ;;  %v4689_v25 = vpop.permute.xlu1 %4688  ;;  %v5562_v34 = vcombine.low %v4363_v22, %v4366_v61  ;;  %v5499_v40 = vcombine.low %v7586_v39, %v7592_v38  ;;  %v4785_v52 = vsel %vm2821_vm10, %v4769_v46, %v7619_v60  ;;  %v5849_v54 = vld [vmem:[#allocation3 + $0x18] sm:$0xf] }
 0x336   : > { %4740 = vrot.lane.b32.xlu1 %v5563_v33, %s5910_s26  ;;  %v5554_v32 = vcombine.low %v4251_v10, %v4261_v13  ;;  %v4647_v28 = vpop.permute.xlu0 %4646  ;;  %v4783_v35 = vsel %vm2821_vm10, %v4767_v41, %v7652_v6  ;;  %vm4814_vm8 = vcmask 326656   ;;  %vm4831_vm9 = vcmask 392192   ;;  %v5851_v33 = vld [vmem:[#allocation3 + $0x24] sm:$0xf] }
 0x337   : > { %v4799_v43 = vsel %vm2863_vm15, %v4783_v35, %v4559_v11  ;;  %vm4865_vm11 = vcmask 523264   ;;  %v4801_v31 = vsel %vm2863_vm15, %v4785_v52, %v7682_v36  ;;  %vm4848_vm14 = vcmask 457728  }
 0x338   : > { %4698 = vrot.lane.b32.xlu0 %v5554_v32, %s5909_s20  ;;  %v4816_v8 = vsel %vm4814_vm8, %v4799_v43, %v4599_v59  ;;  %vm4918_vm1 = vcmask 588800   ;;  %v4818_v29 = vsel %vm4814_vm8, %v4801_v31, %v7696_v12  ;;  %v5495_v45 = vcombine.low %v5851_v33, %v5852_v15 }
 0x339   : > { %v4833_v16 = vsel %vm4831_vm9, %v4816_v8, %v4647_v28  ;;  %v4835_v47 = vsel %vm4831_vm9, %v4818_v29, %v4649_v9  ;;  %v5494_v9 = vcombine.low %v5849_v54, %v5850_v0  ;;  %v5497_v29 = vcombine.low %v7457_v26, %v7461_v17 }
 0x33a   : > { %v4435_v4 = vpop.permute.xlu1 %4434  ;;  %v4852_v1 = vsel %vm4848_vm14, %v4835_v47, %v4689_v25 }
 0x33b   : > { %v4750_v2 = vsel %vm2737_vm3, %v5494_v9, %v4435_v4 }
 0x33c   : > { %4738 = vrot.lane.b32.xlu0 %v5562_v34, %s5910_s26 }
 0x33d   : > { %v4687_v30 = vpop.permute.xlu0 %4686 }
 0x33e   : > { %v4850_v60 = vsel %vm4848_vm14, %v4833_v16, %v4687_v30 }
 0x341   : > { %v4727_v58 = vpop.permute.xlu0 %4726 }
 0x342   : > { %v4437_v7 = vpop.permute.xlu1 %4436  ;;  %v4867_v6 = vsel %vm4865_vm11, %v4850_v60, %v4727_v58  ;;  %v5853_v58 = vld [vmem:[#allocation3 + $0x30] sm:$0xf] }
 0x343   : > { %5693 = vmatprep.mubr.msk.bf16.mxu1 %vm4918_vm1, %v4867_v6  ;;  %v4753_v23 = vsel %vm2737_vm3, %v5495_v45, %v4437_v7  ;;  %v5854_v7 = vld [vmem:[#allocation3 + $0x34] sm:$0xf] }
 0x344   : > { %v5496_v6 = vcombine.low %v5853_v58, %v5854_v7 }
 0x345   : > { %v4729_v36 = vpop.permute.xlu0 %4728 }
 0x346   : > { %v4477_v14 = vpop.permute.xlu1 %4476  ;;  %v4869_v11 = vsel %vm4865_vm11, %v4852_v1, %v4729_v36 }
 0x347   : > { %5694 = vmatmul.mubr.msk.bf16.vlgmr.msra.gmra.mrb[0].mxu1 %vm4918_vm1, %v4869_v11  ;;  %v4773_v62 = vsel %vm2779_vm5, %v4753_v23, %v4477_v14 }
 0x349   : > { %v4475_v55 = vpop.permute.xlu0 %4474 }
 0x34a   : > { %v4525_v5 = vpop.permute.xlu1 %4524  ;;  %v4771_v44 = vsel %vm2779_vm5, %v4750_v2, %v4475_v55 }
 0x34b   : > { %v4789_v22 = vsel %vm2821_vm10, %v4773_v62, %v4525_v5 }
 0x34d   : > { %v4523_v49 = vpop.permute.xlu0 %4522 }
 0x34e   : > { %v4565_v51 = vpop.permute.xlu1 %4564  ;;  %v4787_v27 = vsel %vm2821_vm10, %v4771_v44, %v4523_v49 }
 0x34f   : > { %v4805_v61 = vsel %vm2863_vm15, %v4789_v22, %v4565_v51 }
 0x352   : > { %v4605_v42 = vpop.permute.xlu1 %4604 }
 0x353   : > { %v4563_v37 = vpop.permute.xlu0 %4562  ;;  %v4822_v18 = vsel %vm4814_vm8, %v4805_v61, %v4605_v42 }
 0x354   : > { %v4803_v53 = vsel %vm2863_vm15, %v4787_v27, %v4563_v37 }
 0x356   : > { %v4653_v20 = vpop.permute.xlu1 %4652 }
 0x357   : > { %v4603_v12 = vpop.permute.xlu0 %4602  ;;  %v4839_v28 = vsel %vm4831_vm9, %v4822_v18, %v4653_v20 }
 0x358   : > { %v4820_v19 = vsel %vm4814_vm8, %v4803_v53, %v4603_v12 }
 0x35a   : > { %v4693_v56 = vpop.permute.xlu1 %4692 }
 0x35b   : > { %v4651_v59 = vpop.permute.xlu0 %4650  ;;  %v4856_v34 = vsel %vm4848_vm14, %v4839_v28, %v4693_v56 }
 0x35c   : > { %v4837_v13 = vsel %vm4831_vm9, %v4820_v19, %v4651_v59 }
 0x35f   : > { %v4439_v10 = vpop.permute.xlu1 %4438 }
 0x360   : > { %v4756_v1 = vsel %vm2737_vm3, %v5496_v6, %v4439_v10 }
 0x362   : > { %v4691_v21 = vpop.permute.xlu0 %4690 }
 0x363   : > { %v4854_v3 = vsel %vm4848_vm14, %v4837_v13, %v4691_v21 }
 0x366   : > { %v4731_v32 = vpop.permute.xlu0 %4730 }
 0x367   : > { %v4441_v25 = vpop.permute.xlu1 %4440  ;;  %v4871_v63 = vsel %vm4865_vm11, %v4854_v3, %v4731_v32 }
 0x368   : > { %5697 = vmatprep.mubr.msk.bf16.mxu1 %vm4918_vm1, %v4871_v63  ;;  %v4759_v36 = vsel %vm2737_vm3, %v5497_v29, %v4441_v25 }
 0x36a   : > { %v4733_v50 = vpop.permute.xlu0 %4732 }
 0x36b   : > { %v4481_v41 = vpop.permute.xlu1 %4480  ;;  %v4873_v46 = vsel %vm4865_vm11, %v4856_v34, %v4733_v50 }
 0x36c   : > { %5698 = vmatmul.mubr.msk.bf16.gmra.mrb[4].mxu1 %vm4918_vm1, %v4873_v46  ;;  %v4777_v49 = vsel %vm2779_vm5, %v4759_v36, %v4481_v41 }
 0x36e   : > { %v4479_v4 = vpop.permute.xlu0 %4478 }
 0x36f   : > { %v4529_v52 = vpop.permute.xlu1 %4528  ;;  %v4775_v14 = vsel %vm2779_vm5, %v4756_v1, %v4479_v4 }
 0x370   : > { %v4793_v26 = vsel %vm2821_vm10, %v4777_v49, %v4529_v52  ;;  %v7821_v52 = vld [vmem:[%s7914_s7] ss:$0 sm:$0xff] }
 0x372   : > { %v4527_v35 = vpop.permute.xlu0 %4526 }
 0x373   : > { %v4569_v30 = vpop.permute.xlu1 %4568  ;;  %v4791_v55 = vsel %vm2821_vm10, %v4775_v14, %v4527_v35 }
 0x374   : > { %v4809_v12 = vsel %vm2863_vm15, %v4793_v26, %v4569_v30  ;;  %v7826_v30 = vld [vmem:[%s7915_s8] ss:$0 sm:$0xff] }
 0x377   : > { %v4609_v43 = vpop.permute.xlu1 %4608 }
 0x378   : > { %v4567_v8 = vpop.permute.xlu0 %4566  ;;  %v4826_v0 = vsel %vm4814_vm8, %v4809_v12, %v4609_v43 }
 0x379   : > { %v4807_v51 = vsel %vm2863_vm15, %v4791_v55, %v4567_v8 }
 0x37b   : > { %v4657_v31 = vpop.permute.xlu1 %4656 }
 0x37c   : > { %v4607_v16 = vpop.permute.xlu0 %4606  ;;  %v4843_v9 = vsel %vm4831_vm9, %v4826_v0, %v4657_v31 }
 0x37d   : > { %v4824_v42 = vsel %vm4814_vm8, %v4807_v51, %v4607_v16 }
 0x37f   : > { %v4697_v60 = vpop.permute.xlu1 %4696 }
 0x380   : > { %v4655_v47 = vpop.permute.xlu0 %4654  ;;  %v4860_v33 = vsel %vm4848_vm14, %v4843_v9, %v4697_v60 }
 0x381   : > { %v4841_v37 = vsel %vm4831_vm9, %v4824_v42, %v4655_v47 }
 0x384   : > { %v4443_v11 = vpop.permute.xlu1 %4442 }
 0x385   : > { %v4762_v3 = vsel %vm2737_vm3, %v5498_v48, %v4443_v11 }
 0x387   : > { %v4695_v5 = vpop.permute.xlu0 %4694 }
 0x388   : > { %v4858_v17 = vsel %vm4848_vm14, %v4841_v37, %v4695_v5 }
 0x38b   : > { %v4735_v20 = vpop.permute.xlu0 %4734 }
 0x38c   : > { %v4445_v56 = vpop.permute.xlu1 %4444  ;;  %v4875_v54 = vsel %vm4865_vm11, %v4858_v17, %v4735_v20 }
 0x38d   : > { %5701 = vmatprep.mubr.msk.bf16.mxu1 %vm4918_vm1, %v4875_v54  ;;  %v4765_v19 = vsel %vm2737_vm3, %v5499_v40, %v4445_v56 }
 0x38f   : > { %v4737_v15 = vpop.permute.xlu0 %4736 }
 0x390   : > { %v4485_v45 = vpop.permute.xlu1 %4484  ;;  %v4877_v59 = vsel %vm4865_vm11, %v4860_v33, %v4737_v15 }
 0x391   : > { %5702 = vmatmul.mubr.msk.bf16.gmra.mrb[8].mxu1 %vm4918_vm1, %v4877_v59  ;;  %v4781_v32 = vsel %vm2779_vm5, %v4765_v19, %v4485_v45 }
 0x393   : > { %v4483_v2 = vpop.permute.xlu0 %4482 }
 0x394   : > { %v4533_v23 = vpop.permute.xlu1 %4532  ;;  %v4779_v61 = vsel %vm2779_vm5, %v4762_v3, %v4483_v2 }
 0x395   : > { %v4797_v18 = vsel %vm2821_vm10, %v4781_v32, %v4533_v23 }
 0x397   : > { %v4531_v44 = vpop.permute.xlu0 %4530 }
 0x398   : > { %v4573_v10 = vpop.permute.xlu1 %4572  ;;  %v4795_v25 = vsel %vm2821_vm10, %v4779_v61, %v4531_v44 }
 0x399   : > { %v4813_v38 = vsel %vm2863_vm15, %v4797_v18, %v4573_v10 }
 0x39c   : > { %v4613_v27 = vpop.permute.xlu1 %4612 }
 0x39d   : > { %v4571_v21 = vpop.permute.xlu0 %4570  ;;  %v4830_v28 = vsel %vm4814_vm8, %v4813_v38, %v4613_v27 }
 0x39e   : > { %v4811_v39 = vsel %vm2863_vm15, %v4795_v25, %v4571_v21 }
 0x3a0   : > { %v4661_v62 = vpop.permute.xlu1 %4660 }
 0x3a1   : > { %v4611_v53 = vpop.permute.xlu0 %4610  ;;  %v4847_v48 = vsel %vm4831_vm9, %v4830_v28, %v4661_v62 }
 0x3a2   : > { %v4828_v40 = vsel %vm4814_vm8, %v4811_v39, %v4611_v53 }
 0x3a4   : > { %v4701_v22 = vpop.permute.xlu1 %4700 }
 0x3a5   : > { %v4659_v13 = vpop.permute.xlu0 %4658  ;;  %v4864_v41 = vsel %vm4848_vm14, %v4847_v48, %v4701_v22 }
 0x3a6   : > { %v4845_v24 = vsel %vm4831_vm9, %v4828_v40, %v4659_v13 }
 0x3a8   : > { %v4741_v57 = vpop.permute.xlu1 %4740 }
 0x3a9   : > { %v4881_v4 = vsel %vm4865_vm11, %v4864_v41, %v4741_v57 }
 0x3aa   : > { %v4699_v63 = vpop.permute.xlu0 %4698 }
 0x3ab   : > { %v4862_v34 = vsel %vm4848_vm14, %v4845_v24, %v4699_v63 }
 0x3ae   : > { %v4739_v50 = vpop.permute.xlu0 %4738 }
 0x3af   : > { %v4879_v46 = vsel %vm4865_vm11, %v4862_v34, %v4739_v50 }
 0x3b0   : > { %5705 = vmatprep.mubr.msk.bf16.mxu1 %vm4918_vm1, %v4879_v46 }
 0x3b1   : > { %5706 = vmatmul.mubr.msk.bf16.gmra.mrb[12].mxu1 %vm4918_vm1, %v4881_v4 }
 0x41a   : > { %v5695_v35 = vpop.f32.mrb[0].mxu1 }
 0x41b   : > { %v5045_v43 = vmul.f32 %v5695_v35, %v7821_v52  ;;  %v4973_v8 = vpop.f32.mrb[1].mxu1 }
 0x41c   : > { %v5043_v31 = vmul.f32 %v7821_v52, %v4973_v8  ;;  %v5696_v16 = vpop.f32.mrb[2].mxu1 }
 0x41d   : > { %v5068_v60 = vadd.f32 %v7826_v30, %v5045_v43  ;;  %v5046_v58 = vmul.f32 %v5696_v16, %v7821_v52  ;;  %v4976_v7 = vpop.f32.mrb[3].mxu1 }
 0x41e   : > { %v5066_v6 = vadd.f32 %v7826_v30, %v5043_v31  ;;  %v5044_v29 = vmul.f32 %v7821_v52, %v4976_v7 }
 0x41f   : > { %v5084_v47 = vmax.f32 %v5068_v60, 0.0  ;;  %v5069_v1 = vadd.f32 %v7826_v30, %v5046_v58 }
 0x420   : > { %v5082_v36 = vmax.f32 %v5066_v6, 0.0  ;;  %v5067_v14 = vadd.f32 %v7826_v30, %v5044_v29 }
 0x421   : > { %5100 = vst.msk [vmem:[%s6121_s28 + $0x10] sm:$0xff] %vm2737_vm3, %v5084_v47  ;;  %v5085_v11 = vmax.f32 %v5069_v1, 0.0 }
 0x422   : > { %5098 = vst.msk [vmem:[%s6121_s28] sm:$0xff] %vm2737_vm3, %v5082_v36  ;;  %v5083_v55 = vmax.f32 %v5067_v14, 0.0 }
 0x423   : > { %5101 = vst.msk [vmem:[%s6121_s28 + $0x18] sm:$0xff] %vm2737_vm3, %v5085_v11 }
 0x424   : > { %5099 = vst.msk [vmem:[%s6121_s28 + $0x8] sm:$0xff] %vm2737_vm3, %v5083_v55 }
 0x43f   : > { %v5699_v5 = vpop.f32.mrb[4].mxu1 }
 0x440   : > { %v5049_v49 = vmul.f32 %v5699_v5, %v7821_v52  ;;  %v4989_v51 = vpop.f32.mrb[5].mxu1 }
 0x441   : > { %v5047_v42 = vmul.f32 %v7821_v52, %v4989_v51  ;;  %v5700_v37 = vpop.f32.mrb[6].mxu1 }
 0x442   : > { %v5072_v26 = vadd.f32 %v7826_v30, %v5049_v49  ;;  %v5050_v17 = vmul.f32 %v5700_v37, %v7821_v52  ;;  %v4992_v20 = vpop.f32.mrb[7].mxu1 }
 0x443   : > { %v5070_v12 = vadd.f32 %v7826_v30, %v5047_v42  ;;  %v5048_v56 = vmul.f32 %v7821_v52, %v4992_v20 }
 0x444   : > { %v5088_v54 = vmax.f32 %v5072_v26, 0.0  ;;  %v5073_v0 = vadd.f32 %v7826_v30, %v5050_v17 }
 0x445   : > { %v5086_v9 = vmax.f32 %v5070_v12, 0.0  ;;  %v5071_v33 = vadd.f32 %v7826_v30, %v5048_v56 }
 0x446   : > { %5104 = vst.msk [vmem:[%s6121_s28 + $0x30] sm:$0xff] %vm2737_vm3, %v5088_v54  ;;  %v5089_v15 = vmax.f32 %v5073_v0, 0.0 }
 0x447   : > { %5102 = vst.msk [vmem:[%s6121_s28 + $0x20] sm:$0xff] %vm2737_vm3, %v5086_v9  ;;  %v5087_v45 = vmax.f32 %v5071_v33, 0.0 }
 0x448   : > { %5105 = vst.msk [vmem:[%s6121_s28 + $0x38] sm:$0xff] %vm2737_vm3, %v5089_v15 }
 0x449   : > { %5103 = vst.msk [vmem:[%s6121_s28 + $0x28] sm:$0xff] %vm2737_vm3, %v5087_v45 }
 0x464   : > { %v5703_v59 = vpop.f32.mrb[8].mxu1 }
 0x465   : > { %v5053_v2 = vmul.f32 %v5703_v59, %v7821_v52  ;;  %v5005_v23 = vpop.f32.mrb[9].mxu1 }
 0x466   : > { %v5051_v44 = vmul.f32 %v7821_v52, %v5005_v23  ;;  %v5704_v10 = vpop.f32.mrb[10].mxu1 }
 0x467   : > { %v5076_v27 = vadd.f32 %v7826_v30, %v5053_v2  ;;  %v5054_v21 = vmul.f32 %v5704_v10, %v7821_v52  ;;  %v5008_v62 = vpop.f32.mrb[11].mxu1 }
 0x468   : > { %v5074_v53 = vadd.f32 %v7826_v30, %v5051_v44  ;;  %v5052_v19 = vmul.f32 %v7821_v52, %v5008_v62 }
 0x469   : > { %v5092_v13 = vmax.f32 %v5076_v27, 0.0  ;;  %v5077_v22 = vadd.f32 %v7826_v30, %v5054_v21 }
 0x46a   : > { %v5090_v3 = vmax.f32 %v5074_v53, 0.0  ;;  %v5075_v32 = vadd.f32 %v7826_v30, %v5052_v19 }
 0x46b   : > { %5108 = vst.msk [vmem:[%s6121_s28 + $0x50] sm:$0xff] %vm2737_vm3, %v5092_v13  ;;  %v5093_v61 = vmax.f32 %v5077_v22, 0.0 }
 0x46c   : > { %5106 = vst.msk [vmem:[%s6121_s28 + $0x40] sm:$0xff] %vm2737_vm3, %v5090_v3  ;;  %v5091_v25 = vmax.f32 %v5075_v32, 0.0 }
 0x46d   : > { %5109 = vst.msk [vmem:[%s6121_s28 + $0x58] sm:$0xff] %vm2737_vm3, %v5093_v61 }
 0x46e   : > { %5107 = vst.msk [vmem:[%s6121_s28 + $0x48] sm:$0xff] %vm2737_vm3, %v5091_v25 }
 0x484   : > { %v5707_v63 = vpop.f32.mrb[12].mxu1 }
 0x485   : > { %v5057_v18 = vmul.f32 %v5707_v63, %v7821_v52  ;;  %v5021_v39 = vpop.f32.mrb[13].mxu1 }
 0x486   : > { %v5055_v38 = vmul.f32 %v7821_v52, %v5021_v39  ;;  %v5708_v40 = vpop.f32.mrb[14].mxu1 }
 0x487   : > { %v5080_v28 = vadd.f32 %v7826_v30, %v5057_v18  ;;  %v5058_v24 = vmul.f32 %v5708_v40, %v7821_v52  ;;  %v5024_v57 = vpop.f32.mrb[15].mxu1 }
 0x488   : > { %v5078_v48 = vadd.f32 %v7826_v30, %v5055_v38  ;;  %v5056_v34 = vmul.f32 %v7821_v52, %v5024_v57 }
 0x489   : > { %v5096_v50 = vmax.f32 %v5080_v28, 0.0  ;;  %v5081_v41 = vadd.f32 %v7826_v30, %v5058_v24 }
 0x48a   : > { %v5094_v46 = vmax.f32 %v5078_v48, 0.0  ;;  %v5079_v4 = vadd.f32 %v7826_v30, %v5056_v34 }
 0x48b   : > { %5112 = vst.msk [vmem:[%s6121_s28 + $0x70] sm:$0xff] %vm2737_vm3, %v5096_v50  ;;  %v5097_v35 = vmax.f32 %v5081_v41, 0.0 }
 0x48c   : > { %5110 = vst.msk [vmem:[%s6121_s28 + $0x60] sm:$0xff] %vm2737_vm3, %v5094_v46  ;;  %v5095_v43 = vmax.f32 %v5079_v4, 0.0 }
 0x48d   : > { %5113 = vst.msk [vmem:[%s6121_s28 + $0x78] sm:$0xff] %vm2737_vm3, %v5097_v35 }
 0x48e   : > { %5111 = vst.msk [vmem:[%s6121_s28 + $0x68] sm:$0xff] %vm2737_vm3, %v5095_v43 }
 0x48f PF: > { %s19_s13 = sadd.s32 1, %s5893_s13   ;;  %s7932_s30 = smov %s5885_s11 }
 0x490   : > { %p16_p13 = scmp.ge.s32.totalorder %s19_s13, 6   ;;  %s7933_s10 = smov %s5889_s12 }
 0x491   : > { %s7934_s11 = smov %s7937_s14  ;;  %s7935_s12 = smov %s7941_s15 }
 0x492   :  { %18 = sbr.rel (!%p16_p13) target bundleno = 3 (0x3), region = 114 }

</bundles_post_ra>
